<compile_context>
chip_gen: v6e
topology: v6e:2x2x1
jax: 0.10.0
libtpu: 0.0.40
codegen_flags: <defaults>
</compile_context>

<pallas_src>
import functools

import jax
import jax.numpy as jnp
import numpy as np
from jax.experimental import pallas as pl
from jax.experimental.pallas import tpu as pltpu


# -----------------------------------------------------------------------------
# Fused kernel: all GRU layers + final fc in one pallas_call.
# refs = (x, [w_ih, w_hh_cat, b_i, b_hn] * n_layers, fc_w, fc_b,   # inputs
#         out,                                                      # output
#         h_all, hseq, gi_r, gi_z, gi_n)                            # scratch
# -----------------------------------------------------------------------------
def _fused_gru_fc_kernel(*refs, n_layers, chunk, hidden):
    H = hidden
    n_in = 1 + 4 * n_layers + 2

    x_ref = refs[0]
    layer_refs = [tuple(refs[1 + 4 * l: 1 + 4 * l + 4]) for l in range(n_layers)]
    fc_w_ref = refs[1 + 4 * n_layers]
    fc_b_ref = refs[1 + 4 * n_layers + 1]
    out_ref = refs[n_in]
    h_all_ref = refs[n_in + 1]          # (n_layers, B, H) carried hidden state
    hseq_ref = refs[n_in + 2]           # (chunk, B, H) inter-layer hidden chunk
    gi_r_ref, gi_z_ref, gi_n_ref = refs[n_in + 3: n_in + 6]   # (chunk, B, H) each

    B = h_all_ref.shape[1]
    c = pl.program_id(0)

    @pl.when(c == 0)
    def _():
        h_all_ref[...] = jnp.zeros_like(h_all_ref)

    gi_refs = (gi_r_ref, gi_z_ref, gi_n_ref)

    for l in range(n_layers):
        w_ih_ref, w_hh_ref, b_i_ref, b_hn_ref = layer_refs[l]
        last_layer = (l == n_layers - 1)

        # ---- Phase 1: input-path matmuls for the whole chunk (no serial dep). ----
        # One (chunk*B, in) @ (in, H) matmul per gate; bias broadcast done once.
        x_chunk = x_ref[...] if l == 0 else hseq_ref[...]        # (chunk, B, in)
        in_dim = x_chunk.shape[-1]
        x_flat = x_chunk.reshape(chunk * B, in_dim).astype(jnp.float32)
        for g in range(3):
            gi = (jnp.dot(x_flat, w_ih_ref[g],
                          preferred_element_type=jnp.float32)
                  + b_i_ref[g])                                   # (chunk*B, H)
            gi_refs[g][...] = gi.reshape(chunk, B, H)

        # ---- Phase 2: serial recurrence over the chunk. ----
        # gi was fully materialized above, so overwriting hseq_ref in place with
        # this layer's outputs (consumed by the next layer) is safe.
        w_hh = w_hh_ref[...]                                      # (H, 3H) = [r|z|n]
        b_hn = b_hn_ref[...]                                      # (1, H)

        def step(j, h, w_hh=w_hh, b_hn=b_hn, write_seq=not last_layer):
            gh = jnp.dot(h, w_hh, preferred_element_type=jnp.float32)   # (B, 3H)
            r = jax.nn.sigmoid(gi_r_ref[j] + gh[:, :H])
            z = jax.nn.sigmoid(gi_z_ref[j] + gh[:, H:2 * H])
            n = jnp.tanh(gi_n_ref[j] + r * (gh[:, 2 * H:] + b_hn))
            h_new = n + z * (h - n)                               # == (1-z)*n + z*h
            if write_seq:
                hseq_ref[j] = h_new                               # dense (B, H) store
            return h_new

        h_final = jax.lax.fori_loop(0, chunk, step, h_all_ref[l],
                                    unroll=min(chunk, 8))
        h_all_ref[l] = h_final

    # Fused fc on the last timestep's top-layer hidden state (only the final
    # chunk's value is the real result; the output block is resident in VMEM).
    @pl.when(c == pl.num_programs(0) - 1)
    def _():
        out_ref[...] = (jnp.dot(h_all_ref[n_layers - 1], fc_w_ref[...],
                                preferred_element_type=jnp.float32)
                        + fc_b_ref[...]).astype(out_ref.dtype)


def gru_fc_fused(x_t, layer_params, fc_w_t, fc_b, *, hidden_dim, chunk):
    """x_t: time-major, batch-padded (T, B_pad, I)."""
    T, B, I = x_t.shape
    H = hidden_dim
    O = fc_w_t.shape[1]
    n_layers = len(layer_params)
    n_chunks = T // chunk

    flat_inputs = [x_t]
    in_specs = [pl.BlockSpec((chunk, B, I), lambda c: (c, 0, 0))]   # streamed x chunk
    for (w_ih_g, w_hh_cat, b_i_g, b_hn) in layer_params:
        flat_inputs += [w_ih_g, w_hh_cat, b_i_g, b_hn]
        in_specs += [
            pl.BlockSpec(w_ih_g.shape, lambda c: (0, 0, 0)),        # (3, in, H)
            pl.BlockSpec(w_hh_cat.shape, lambda c: (0, 0)),         # (H, 3H)
            pl.BlockSpec(b_i_g.shape, lambda c: (0, 0, 0)),         # (3, 1, H)
            pl.BlockSpec(b_hn.shape, lambda c: (0, 0)),             # (1, H)
        ]
    flat_inputs += [fc_w_t, fc_b]
    in_specs += [pl.BlockSpec(fc_w_t.shape, lambda c: (0, 0)),
                 pl.BlockSpec(fc_b.shape, lambda c: (0, 0))]

    kernel = functools.partial(_fused_gru_fc_kernel,
                               n_layers=n_layers, chunk=chunk, hidden=H)
    return pl.pallas_call(
        kernel,
        out_shape=jax.ShapeDtypeStruct((B, O), jnp.float32),
        grid_spec=pltpu.PrefetchScalarGridSpec(
            num_scalar_prefetch=0,
            grid=(n_chunks,),
            in_specs=in_specs,
            out_specs=pl.BlockSpec((B, O), lambda c: (0, 0)),
            scratch_shapes=[
                pltpu.VMEM((n_layers, B, H), jnp.float32),   # carried h per layer
                pltpu.VMEM((chunk, B, H), jnp.float32),      # inter-layer hidden chunk
                pltpu.VMEM((chunk, B, H), jnp.float32),      # gi_r
                pltpu.VMEM((chunk, B, H), jnp.float32),      # gi_z
                pltpu.VMEM((chunk, B, H), jnp.float32),      # gi_n
            ]),
        compiler_params=pltpu.CompilerParams(
            dimension_semantics=("arbitrary",),              # serial recurrence
            vmem_limit_bytes=64 * 1024 * 1024),
    )(*flat_inputs)


# -----------------------------------------------------------------------------
# Parameter layout conversion (PyTorch layout -> kernel layout).
# -----------------------------------------------------------------------------
def prepare_kernel_params(params, hidden_dim):
    H = hidden_dim
    layers = []
    for lyr in params["gru"]:
        w_ih = lyr["w_ih"]                                   # (3H, in)
        w_hh = lyr["w_hh"]                                   # (3H, H)
        b_ih = lyr["b_ih"].reshape(3, H)
        b_hh = lyr["b_hh"].reshape(3, H)
        in_dim = w_ih.shape[1]
        # per-gate input weights, transposed for x @ W^T as (in, H)
        w_ih_g = jnp.transpose(w_ih.reshape(3, H, in_dim), (0, 2, 1))      # (3, in, H)
        # concatenated hidden weights: one (H, 3H) operand, columns [r | z | n]
        w_hh_cat = jnp.concatenate(
            [w_hh[0:H].T, w_hh[H:2 * H].T, w_hh[2 * H:3 * H].T], axis=1)   # (H, 3H)
        # fold b_hr / b_hz into the input-path bias; keep b_hn separate
        b_i_g = jnp.concatenate([b_ih[:2] + b_hh[:2], b_ih[2:3]],
                                axis=0)[:, None, :]                        # (3, 1, H)
        b_hn = b_hh[2:3]                                                   # (1, H)
        layers.append((w_ih_g, w_hh_cat, b_i_g, b_hn))
    fc_w_t = params["fc_w"].T                                              # (H, O)
    fc_b = params["fc_b"].reshape(1, -1)                                   # (1, O)
    return layers, fc_w_t, fc_b


def _pick_chunk(T, B_pad, in_dim, hidden, *,
                budget_bytes=12 * 1024 * 1024, max_chunk=256):
    """Largest time-chunk dividing T that keeps chunk-scaled VMEM within budget."""
    # chunk-scaled VMEM (f32): double-buffered x block + hseq + 3x gi scratch.
    per_step = 4 * B_pad * (2 * in_dim + 4 * hidden)
    cap = max(1, min(max_chunk, budget_bytes // max(per_step, 1)))
    if T <= cap:
        return T
    best = 1
    for c in range(1, cap + 1):
        if T % c == 0:
            best = c
    # TODO(synk): dynamic-bound / masked tail chunk instead of requiring a divisor of T.
    return best


# -----------------------------------------------------------------------------
# Model forward (matches Model_GRU.forward, inference semantics)
# -----------------------------------------------------------------------------
def model_gru_forward(params, x, hidden_dim):
    layers, fc_w_t, fc_b = prepare_kernel_params(params, hidden_dim)
    B, T, I = x.shape
    B_pad = ((B + 7) // 8) * 8                 # f32 sublane tile
    chunk = _pick_chunk(T, B_pad, I, hidden_dim)

    # Time-major layout so the serial per-timestep accesses are dense (B, H) tiles;
    # pad batch to the sublane tile (layout plumbing only, padded rows discarded).
    x_t = jnp.transpose(x, (1, 0, 2))          # (T, B, I)
    if B_pad != B:
        x_t = jnp.pad(x_t, ((0, 0), (0, B_pad - B), (0, 0)))

    out_pad = gru_fc_fused(x_t, layers, fc_w_t, fc_b,
                           hidden_dim=hidden_dim, chunk=chunk)
    return out_pad[:B]


# -----------------------------------------------------------------------------
# Deterministic parameter init (PyTorch-layout, uniform(-1/sqrt(H), 1/sqrt(H)))
# -----------------------------------------------------------------------------
def init_params(key, input_size, hidden_dim, n_layers, output_size):
    k = 1.0 / np.sqrt(hidden_dim)
    params = {"gru": []}
    for layer in range(n_layers):
        in_dim = input_size if layer == 0 else hidden_dim
        key, k1, k2, k3, k4 = jax.random.split(key, 5)
        params["gru"].append({
            "w_ih": jax.random.uniform(k1, (3 * hidden_dim, in_dim), jnp.float32, -k, k),
            "w_hh": jax.random.uniform(k2, (3 * hidden_dim, hidden_dim), jnp.float32, -k, k),
            "b_ih": jax.random.uniform(k3, (3 * hidden_dim,), jnp.float32, -k, k),
            "b_hh": jax.random.uniform(k4, (3 * hidden_dim,), jnp.float32, -k, k),
        })
    key, k5, k6 = jax.random.split(key, 3)
    params["fc_w"] = jax.random.uniform(k5, (output_size, hidden_dim), jnp.float32, -k, k)
    params["fc_b"] = jax.random.uniform(k6, (output_size,), jnp.float32, -k, k)
    return params


# -----------------------------------------------------------------------------
# Pure-JAX reference (lax.scan, PyTorch gate math) for correctness check
# -----------------------------------------------------------------------------
def reference_forward(params, x, hidden_dim):
    H = hidden_dim
    B = x.shape[0]
    h_seq = jnp.transpose(x, (1, 0, 2))                    # (T, B, I)
    for lyr in params["gru"]:
        w_ih, w_hh = lyr["w_ih"], lyr["w_hh"]              # (3H, in), (3H, H)
        b_ih, b_hh = lyr["b_ih"], lyr["b_hh"]

        def step(h, x_t, w_ih=w_ih, w_hh=w_hh, b_ih=b_ih, b_hh=b_hh):
            gi = x_t @ w_ih.T + b_ih
            gh = h @ w_hh.T + b_hh
            r = jax.nn.sigmoid(gi[:, :H] + gh[:, :H])
            z = jax.nn.sigmoid(gi[:, H:2 * H] + gh[:, H:2 * H])
            n = jnp.tanh(gi[:, 2 * H:] + r * gh[:, 2 * H:])
            h_new = (1.0 - z) * n + z * h
            return h_new, h_new

        h0 = jnp.zeros((B, H), jnp.float32)
        _, h_seq = jax.lax.scan(step, h0, h_seq)
    return h_seq[-1] @ params["fc_w"].T + params["fc_b"]


if __name__ == "__main__":
    batch, seq_len = 2, 8
    input_size, hidden_dim, n_layers, output_size = 16, 32, 2, 4

    key = jax.random.PRNGKey(0)
    key, pkey, xkey = jax.random.split(key, 3)
    params = init_params(pkey, input_size, hidden_dim, n_layers, output_size)
    x = jax.random.normal(xkey, (batch, seq_len, input_size), jnp.float32)

    out = jax.block_until_ready(model_gru_forward(params, x, hidden_dim))
    ref = jax.block_until_ready(reference_forward(params, x, hidden_dim))

    assert out.shape == (batch, output_size)
    np.testing.assert_allclose(np.asarray(out), np.asarray(ref), rtol=1e-4, atol=1e-4)

    print("KERNEL_OK")
</pallas_src>

<mosaic_0001>
module attributes {stable_mosaic.version = 11 : i64} {
  func.func @_fused_gru_fc_kernel(%arg0: i32, %arg1: memref<8x8x16xf32, #tpu.memory_space<vmem>>, %arg2: memref<3x16x32xf32, #tpu.memory_space<vmem>>, %arg3: memref<32x96xf32, #tpu.memory_space<vmem>>, %arg4: memref<3x1x32xf32, #tpu.memory_space<vmem>>, %arg5: memref<1x32xf32, #tpu.memory_space<vmem>>, %arg6: memref<3x32x32xf32, #tpu.memory_space<vmem>>, %arg7: memref<32x96xf32, #tpu.memory_space<vmem>>, %arg8: memref<3x1x32xf32, #tpu.memory_space<vmem>>, %arg9: memref<1x32xf32, #tpu.memory_space<vmem>>, %arg10: memref<32x4xf32, #tpu.memory_space<vmem>>, %arg11: memref<1x4xf32, #tpu.memory_space<vmem>>, %arg12: memref<8x4xf32, #tpu.memory_space<vmem>>, %arg13: memref<2x8x32xf32, #tpu.memory_space<vmem>>, %arg14: memref<8x8x32xf32, #tpu.memory_space<vmem>>, %arg15: memref<8x8x32xf32, #tpu.memory_space<vmem>>, %arg16: memref<8x8x32xf32, #tpu.memory_space<vmem>>, %arg17: memref<8x8x32xf32, #tpu.memory_space<vmem>>) attributes {dimension_semantics = [#tpu.dimension_semantics<arbitrary>], iteration_bounds = array<i64: 1>, scalar_prefetch = 0 : i64, scratch_operands = 5 : i64, tpu.core_type = #tpu.core_type<tc>, window_params = [{transform_indices = @transform_0, window_bounds = array<i64: 8, 8, 16>}, {pipeline_mode = #tpu.pipeline_mode<synchronous>, transform_indices = @transform_1, window_bounds = array<i64: 3, 16, 32>}, {pipeline_mode = #tpu.pipeline_mode<synchronous>, transform_indices = @transform_2, window_bounds = array<i64: 32, 96>}, {pipeline_mode = #tpu.pipeline_mode<synchronous>, transform_indices = @transform_3, window_bounds = array<i64: 3, 1, 32>}, {pipeline_mode = #tpu.pipeline_mode<synchronous>, transform_indices = @transform_4, window_bounds = array<i64: 1, 32>}, {pipeline_mode = #tpu.pipeline_mode<synchronous>, transform_indices = @transform_5, window_bounds = array<i64: 3, 32, 32>}, {pipeline_mode = #tpu.pipeline_mode<synchronous>, transform_indices = @transform_6, window_bounds = array<i64: 32, 96>}, {pipeline_mode = #tpu.pipeline_mode<synchronous>, transform_indices = @transform_7, window_bounds = array<i64: 3, 1, 32>}, {pipeline_mode = #tpu.pipeline_mode<synchronous>, transform_indices = @transform_8, window_bounds = array<i64: 1, 32>}, {pipeline_mode = #tpu.pipeline_mode<synchronous>, transform_indices = @transform_9, window_bounds = array<i64: 32, 4>}, {pipeline_mode = #tpu.pipeline_mode<synchronous>, transform_indices = @transform_10, window_bounds = array<i64: 1, 4>}, {pipeline_mode = #tpu.pipeline_mode<synchronous>, transform_indices = @transform_11, window_bounds = array<i64: 8, 4>}]} {
    %c0_i32 = arith.constant 0 : i32
    %0 = arith.cmpi eq, %arg0, %c0_i32 : i32
    %1 = arith.extui %0 : i1 to i32
    %c0_i32_0 = arith.constant 0 : i32
    %2 = arith.cmpi ne, %1, %c0_i32_0 : i32
    scf.if %2 {
      %cst_255 = arith.constant 0.000000e+00 : f32
      %638 = vector.broadcast %cst_255 : f32 to vector<2x8x32xf32>
      %c0_256 = arith.constant 0 : index
      %c0_257 = arith.constant 0 : index
      %c0_258 = arith.constant 0 : index
      %639 = vector.load %arg13[%c0_256, %c0_257, %c0_258] : memref<2x8x32xf32, #tpu.memory_space<vmem>>, vector<2x8x32xf32>
      tpu.vector_store %arg13[%c0_256, %c0_257, %c0_258], %638 {strides = array<i32>} : memref<2x8x32xf32, #tpu.memory_space<vmem>>, vector<2x8x32xf32>,
    } else {
    }
    %c0 = arith.constant 0 : index
    %c0_1 = arith.constant 0 : index
    %c0_2 = arith.constant 0 : index
    %3 = vector.load %arg1[%c0, %c0_1, %c0_2] : memref<8x8x16xf32, #tpu.memory_space<vmem>>, vector<8x8x16xf32>
    %4 = vector.shape_cast %3 : vector<8x8x16xf32> to vector<64x16xf32>
    %c0_3 = arith.constant 0 : index
    %c0_4 = arith.constant 0 : index
    %c0_5 = arith.constant 0 : index
    %5 = vector.load %arg2[%c0_3, %c0_4, %c0_5] : memref<3x16x32xf32, #tpu.memory_space<vmem>>, vector<1x16x32xf32>
    %6 = vector.shape_cast %5 : vector<1x16x32xf32> to vector<16x32xf32>
    %cst = arith.constant dense<0.000000e+00> : vector<64x32xf32>
    %7 = tpu.matmul %4, %6, %cst {dimension_numbers = #tpu.dot_dimension_numbers<[1], [0], [0], [1], [0, 0, 1, 1], [], []>} : vector<64x16xf32>, vector<16x32xf32>, vector<64x32xf32> -> vector<64x32xf32>
    %c0_6 = arith.constant 0 : index
    %c0_7 = arith.constant 0 : index
    %c0_8 = arith.constant 0 : index
    %8 = vector.load %arg4[%c0_6, %c0_7, %c0_8] : memref<3x1x32xf32, #tpu.memory_space<vmem>>, vector<1x1x32xf32>
    %9 = vector.shape_cast %8 : vector<1x1x32xf32> to vector<1x32xf32>
    %10 = vector.broadcast %9 : vector<1x32xf32> to vector<64x32xf32>
    %11 = arith.addf %7, %10 : vector<64x32xf32>
    %12 = vector.shape_cast %11 : vector<64x32xf32> to vector<8x8x32xf32>
    %c0_9 = arith.constant 0 : index
    %c0_10 = arith.constant 0 : index
    %c0_11 = arith.constant 0 : index
    %13 = vector.load %arg15[%c0_9, %c0_10, %c0_11] : memref<8x8x32xf32, #tpu.memory_space<vmem>>, vector<8x8x32xf32>
    tpu.vector_store %arg15[%c0_9, %c0_10, %c0_11], %12 {strides = array<i32>} : memref<8x8x32xf32, #tpu.memory_space<vmem>>, vector<8x8x32xf32>,
    %c1 = arith.constant 1 : index
    %c0_12 = arith.constant 0 : index
    %c0_13 = arith.constant 0 : index
    %14 = vector.load %arg2[%c1, %c0_12, %c0_13] : memref<3x16x32xf32, #tpu.memory_space<vmem>>, vector<1x16x32xf32>
    %15 = vector.shape_cast %14 : vector<1x16x32xf32> to vector<16x32xf32>
    %cst_14 = arith.constant dense<0.000000e+00> : vector<64x32xf32>
    %16 = tpu.matmul %4, %15, %cst_14 {dimension_numbers = #tpu.dot_dimension_numbers<[1], [0], [0], [1], [0, 0, 1, 1], [], []>} : vector<64x16xf32>, vector<16x32xf32>, vector<64x32xf32> -> vector<64x32xf32>
    %c1_15 = arith.constant 1 : index
    %c0_16 = arith.constant 0 : index
    %c0_17 = arith.constant 0 : index
    %17 = vector.load %arg4[%c1_15, %c0_16, %c0_17] : memref<3x1x32xf32, #tpu.memory_space<vmem>>, vector<1x1x32xf32>
    %18 = vector.shape_cast %17 : vector<1x1x32xf32> to vector<1x32xf32>
    %19 = vector.broadcast %18 : vector<1x32xf32> to vector<64x32xf32>
    %20 = arith.addf %16, %19 : vector<64x32xf32>
    %21 = vector.shape_cast %20 : vector<64x32xf32> to vector<8x8x32xf32>
    %c0_18 = arith.constant 0 : index
    %c0_19 = arith.constant 0 : index
    %c0_20 = arith.constant 0 : index
    %22 = vector.load %arg16[%c0_18, %c0_19, %c0_20] : memref<8x8x32xf32, #tpu.memory_space<vmem>>, vector<8x8x32xf32>
    tpu.vector_store %arg16[%c0_18, %c0_19, %c0_20], %21 {strides = array<i32>} : memref<8x8x32xf32, #tpu.memory_space<vmem>>, vector<8x8x32xf32>,
    %c2 = arith.constant 2 : index
    %c0_21 = arith.constant 0 : index
    %c0_22 = arith.constant 0 : index
    %23 = vector.load %arg2[%c2, %c0_21, %c0_22] : memref<3x16x32xf32, #tpu.memory_space<vmem>>, vector<1x16x32xf32>
    %24 = vector.shape_cast %23 : vector<1x16x32xf32> to vector<16x32xf32>
    %cst_23 = arith.constant dense<0.000000e+00> : vector<64x32xf32>
    %25 = tpu.matmul %4, %24, %cst_23 {dimension_numbers = #tpu.dot_dimension_numbers<[1], [0], [0], [1], [0, 0, 1, 1], [], []>} : vector<64x16xf32>, vector<16x32xf32>, vector<64x32xf32> -> vector<64x32xf32>
    %c2_24 = arith.constant 2 : index
    %c0_25 = arith.constant 0 : index
    %c0_26 = arith.constant 0 : index
    %26 = vector.load %arg4[%c2_24, %c0_25, %c0_26] : memref<3x1x32xf32, #tpu.memory_space<vmem>>, vector<1x1x32xf32>
    %27 = vector.shape_cast %26 : vector<1x1x32xf32> to vector<1x32xf32>
    %28 = vector.broadcast %27 : vector<1x32xf32> to vector<64x32xf32>
    %29 = arith.addf %25, %28 : vector<64x32xf32>
    %30 = vector.shape_cast %29 : vector<64x32xf32> to vector<8x8x32xf32>
    %c0_27 = arith.constant 0 : index
    %c0_28 = arith.constant 0 : index
    %c0_29 = arith.constant 0 : index
    %31 = vector.load %arg17[%c0_27, %c0_28, %c0_29] : memref<8x8x32xf32, #tpu.memory_space<vmem>>, vector<8x8x32xf32>
    tpu.vector_store %arg17[%c0_27, %c0_28, %c0_29], %30 {strides = array<i32>} : memref<8x8x32xf32, #tpu.memory_space<vmem>>, vector<8x8x32xf32>,
    %c0_30 = arith.constant 0 : index
    %c0_31 = arith.constant 0 : index
    %32 = vector.load %arg3[%c0_30, %c0_31] : memref<32x96xf32, #tpu.memory_space<vmem>>, vector<32x96xf32>
    %c0_32 = arith.constant 0 : index
    %c0_33 = arith.constant 0 : index
    %33 = vector.load %arg5[%c0_32, %c0_33] : memref<1x32xf32, #tpu.memory_space<vmem>>, vector<1x32xf32>
    %c0_34 = arith.constant 0 : index
    %c0_35 = arith.constant 0 : index
    %c0_36 = arith.constant 0 : index
    %34 = vector.load %arg13[%c0_34, %c0_35, %c0_36] : memref<2x8x32xf32, #tpu.memory_space<vmem>>, vector<1x8x32xf32>
    %35 = vector.shape_cast %34 : vector<1x8x32xf32> to vector<8x32xf32>
    %c0_i32_37 = arith.constant 0 : i32
    %cst_38 = arith.constant dense<0.000000e+00> : vector<8x96xf32>
    %36 = tpu.matmul %35, %32, %cst_38 {dimension_numbers = #tpu.dot_dimension_numbers<[1], [0], [0], [1], [0, 0, 1, 1], [], []>} : vector<8x32xf32>, vector<32x96xf32>, vector<8x96xf32> -> vector<8x96xf32>
    %37 = arith.index_cast %c0_i32_37 : i32 to index
    %c0_39 = arith.constant 0 : index
    %c0_40 = arith.constant 0 : index
    %38 = vector.load %arg15[%37, %c0_39, %c0_40] : memref<8x8x32xf32, #tpu.memory_space<vmem>>, vector<1x8x32xf32>
    %39 = vector.shape_cast %38 : vector<1x8x32xf32> to vector<8x32xf32>
    %40 = vector.extract_strided_slice %36 {offsets = [0, 0], sizes = [8, 32], strides = [1, 1]} : vector<8x96xf32> to vector<8x32xf32>
    %41 = arith.addf %39, %40 : vector<8x32xf32>
    %42 = arith.negf %41 : vector<8x32xf32>
    %43 = math.exp %42 : vector<8x32xf32>
    %cst_41 = arith.constant 1.000000e+00 : f32
    %44 = vector.broadcast %cst_41 : f32 to vector<8x32xf32>
    %45 = arith.addf %44, %43 : vector<8x32xf32>
    %46 = arith.divf %44, %45 : vector<8x32xf32>
    %47 = arith.index_cast %c0_i32_37 : i32 to index
    %c0_42 = arith.constant 0 : index
    %c0_43 = arith.constant 0 : index
    %48 = vector.load %arg16[%47, %c0_42, %c0_43] : memref<8x8x32xf32, #tpu.memory_space<vmem>>, vector<1x8x32xf32>
    %49 = vector.shape_cast %48 : vector<1x8x32xf32> to vector<8x32xf32>
    %50 = vector.extract_strided_slice %36 {offsets = [0, 32], sizes = [8, 32], strides = [1, 1]} : vector<8x96xf32> to vector<8x32xf32>
    %51 = arith.addf %49, %50 : vector<8x32xf32>
    %52 = arith.negf %51 : vector<8x32xf32>
    %53 = math.exp %52 : vector<8x32xf32>
    %cst_44 = arith.constant 1.000000e+00 : f32
    %54 = vector.broadcast %cst_44 : f32 to vector<8x32xf32>
    %55 = arith.addf %54, %53 : vector<8x32xf32>
    %56 = arith.divf %54, %55 : vector<8x32xf32>
    %57 = arith.index_cast %c0_i32_37 : i32 to index
    %c0_45 = arith.constant 0 : index
    %c0_46 = arith.constant 0 : index
    %58 = vector.load %arg17[%57, %c0_45, %c0_46] : memref<8x8x32xf32, #tpu.memory_space<vmem>>, vector<1x8x32xf32>
    %59 = vector.shape_cast %58 : vector<1x8x32xf32> to vector<8x32xf32>
    %60 = vector.extract_strided_slice %36 {offsets = [0, 64], sizes = [8, 32], strides = [1, 1]} : vector<8x96xf32> to vector<8x32xf32>
    %61 = vector.broadcast %33 : vector<1x32xf32> to vector<8x32xf32>
    %62 = arith.addf %60, %61 : vector<8x32xf32>
    %63 = arith.mulf %46, %62 : vector<8x32xf32>
    %64 = arith.addf %59, %63 : vector<8x32xf32>
    %65 = math.tanh %64 : vector<8x32xf32>
    %66 = arith.subf %35, %65 : vector<8x32xf32>
    %67 = arith.mulf %56, %66 : vector<8x32xf32>
    %68 = arith.addf %65, %67 : vector<8x32xf32>
    %69 = arith.index_cast %c0_i32_37 : i32 to index
    %c0_47 = arith.constant 0 : index
    %c0_48 = arith.constant 0 : index
    %70 = vector.load %arg14[%69, %c0_47, %c0_48] : memref<8x8x32xf32, #tpu.memory_space<vmem>>, vector<1x8x32xf32>
    %71 = vector.shape_cast %70 : vector<1x8x32xf32> to vector<8x32xf32>
    %72 = vector.shape_cast %68 : vector<8x32xf32> to vector<1x8x32xf32>
    tpu.vector_store %arg14[%69, %c0_47, %c0_48], %72 {strides = array<i32>} : memref<8x8x32xf32, #tpu.memory_space<vmem>>, vector<1x8x32xf32>,
    %c1_i32 = arith.constant 1 : i32
    %cst_49 = arith.constant dense<0.000000e+00> : vector<8x96xf32>
    %73 = tpu.matmul %68, %32, %cst_49 {dimension_numbers = #tpu.dot_dimension_numbers<[1], [0], [0], [1], [0, 0, 1, 1], [], []>} : vector<8x32xf32>, vector<32x96xf32>, vector<8x96xf32> -> vector<8x96xf32>
    %74 = arith.index_cast %c1_i32 : i32 to index
    %c0_50 = arith.constant 0 : index
    %c0_51 = arith.constant 0 : index
    %75 = vector.load %arg15[%74, %c0_50, %c0_51] : memref<8x8x32xf32, #tpu.memory_space<vmem>>, vector<1x8x32xf32>
    %76 = vector.shape_cast %75 : vector<1x8x32xf32> to vector<8x32xf32>
    %77 = vector.extract_strided_slice %73 {offsets = [0, 0], sizes = [8, 32], strides = [1, 1]} : vector<8x96xf32> to vector<8x32xf32>
    %78 = arith.addf %76, %77 : vector<8x32xf32>
    %79 = arith.negf %78 : vector<8x32xf32>
    %80 = math.exp %79 : vector<8x32xf32>
    %cst_52 = arith.constant 1.000000e+00 : f32
    %81 = vector.broadcast %cst_52 : f32 to vector<8x32xf32>
    %82 = arith.addf %81, %80 : vector<8x32xf32>
    %83 = arith.divf %81, %82 : vector<8x32xf32>
    %84 = arith.index_cast %c1_i32 : i32 to index
    %c0_53 = arith.constant 0 : index
    %c0_54 = arith.constant 0 : index
    %85 = vector.load %arg16[%84, %c0_53, %c0_54] : memref<8x8x32xf32, #tpu.memory_space<vmem>>, vector<1x8x32xf32>
    %86 = vector.shape_cast %85 : vector<1x8x32xf32> to vector<8x32xf32>
    %87 = vector.extract_strided_slice %73 {offsets = [0, 32], sizes = [8, 32], strides = [1, 1]} : vector<8x96xf32> to vector<8x32xf32>
    %88 = arith.addf %86, %87 : vector<8x32xf32>
    %89 = arith.negf %88 : vector<8x32xf32>
    %90 = math.exp %89 : vector<8x32xf32>
    %cst_55 = arith.constant 1.000000e+00 : f32
    %91 = vector.broadcast %cst_55 : f32 to vector<8x32xf32>
    %92 = arith.addf %91, %90 : vector<8x32xf32>
    %93 = arith.divf %91, %92 : vector<8x32xf32>
    %94 = arith.index_cast %c1_i32 : i32 to index
    %c0_56 = arith.constant 0 : index
    %c0_57 = arith.constant 0 : index
    %95 = vector.load %arg17[%94, %c0_56, %c0_57] : memref<8x8x32xf32, #tpu.memory_space<vmem>>, vector<1x8x32xf32>
    %96 = vector.shape_cast %95 : vector<1x8x32xf32> to vector<8x32xf32>
    %97 = vector.extract_strided_slice %73 {offsets = [0, 64], sizes = [8, 32], strides = [1, 1]} : vector<8x96xf32> to vector<8x32xf32>
    %98 = vector.broadcast %33 : vector<1x32xf32> to vector<8x32xf32>
    %99 = arith.addf %97, %98 : vector<8x32xf32>
    %100 = arith.mulf %83, %99 : vector<8x32xf32>
    %101 = arith.addf %96, %100 : vector<8x32xf32>
    %102 = math.tanh %101 : vector<8x32xf32>
    %103 = arith.subf %68, %102 : vector<8x32xf32>
    %104 = arith.mulf %93, %103 : vector<8x32xf32>
    %105 = arith.addf %102, %104 : vector<8x32xf32>
    %106 = arith.index_cast %c1_i32 : i32 to index
    %c0_58 = arith.constant 0 : index
    %c0_59 = arith.constant 0 : index
    %107 = vector.load %arg14[%106, %c0_58, %c0_59] : memref<8x8x32xf32, #tpu.memory_space<vmem>>, vector<1x8x32xf32>
    %108 = vector.shape_cast %107 : vector<1x8x32xf32> to vector<8x32xf32>
    %109 = vector.shape_cast %105 : vector<8x32xf32> to vector<1x8x32xf32>
    tpu.vector_store %arg14[%106, %c0_58, %c0_59], %109 {strides = array<i32>} : memref<8x8x32xf32, #tpu.memory_space<vmem>>, vector<1x8x32xf32>,
    %c2_i32 = arith.constant 2 : i32
    %cst_60 = arith.constant dense<0.000000e+00> : vector<8x96xf32>
    %110 = tpu.matmul %105, %32, %cst_60 {dimension_numbers = #tpu.dot_dimension_numbers<[1], [0], [0], [1], [0, 0, 1, 1], [], []>} : vector<8x32xf32>, vector<32x96xf32>, vector<8x96xf32> -> vector<8x96xf32>
    %111 = arith.index_cast %c2_i32 : i32 to index
    %c0_61 = arith.constant 0 : index
    %c0_62 = arith.constant 0 : index
    %112 = vector.load %arg15[%111, %c0_61, %c0_62] : memref<8x8x32xf32, #tpu.memory_space<vmem>>, vector<1x8x32xf32>
    %113 = vector.shape_cast %112 : vector<1x8x32xf32> to vector<8x32xf32>
    %114 = vector.extract_strided_slice %110 {offsets = [0, 0], sizes = [8, 32], strides = [1, 1]} : vector<8x96xf32> to vector<8x32xf32>
    %115 = arith.addf %113, %114 : vector<8x32xf32>
    %116 = arith.negf %115 : vector<8x32xf32>
    %117 = math.exp %116 : vector<8x32xf32>
    %cst_63 = arith.constant 1.000000e+00 : f32
    %118 = vector.broadcast %cst_63 : f32 to vector<8x32xf32>
    %119 = arith.addf %118, %117 : vector<8x32xf32>
    %120 = arith.divf %118, %119 : vector<8x32xf32>
    %121 = arith.index_cast %c2_i32 : i32 to index
    %c0_64 = arith.constant 0 : index
    %c0_65 = arith.constant 0 : index
    %122 = vector.load %arg16[%121, %c0_64, %c0_65] : memref<8x8x32xf32, #tpu.memory_space<vmem>>, vector<1x8x32xf32>
    %123 = vector.shape_cast %122 : vector<1x8x32xf32> to vector<8x32xf32>
    %124 = vector.extract_strided_slice %110 {offsets = [0, 32], sizes = [8, 32], strides = [1, 1]} : vector<8x96xf32> to vector<8x32xf32>
    %125 = arith.addf %123, %124 : vector<8x32xf32>
    %126 = arith.negf %125 : vector<8x32xf32>
    %127 = math.exp %126 : vector<8x32xf32>
    %cst_66 = arith.constant 1.000000e+00 : f32
    %128 = vector.broadcast %cst_66 : f32 to vector<8x32xf32>
    %129 = arith.addf %128, %127 : vector<8x32xf32>
    %130 = arith.divf %128, %129 : vector<8x32xf32>
    %131 = arith.index_cast %c2_i32 : i32 to index
    %c0_67 = arith.constant 0 : index
    %c0_68 = arith.constant 0 : index
    %132 = vector.load %arg17[%131, %c0_67, %c0_68] : memref<8x8x32xf32, #tpu.memory_space<vmem>>, vector<1x8x32xf32>
    %133 = vector.shape_cast %132 : vector<1x8x32xf32> to vector<8x32xf32>
    %134 = vector.extract_strided_slice %110 {offsets = [0, 64], sizes = [8, 32], strides = [1, 1]} : vector<8x96xf32> to vector<8x32xf32>
    %135 = vector.broadcast %33 : vector<1x32xf32> to vector<8x32xf32>
    %136 = arith.addf %134, %135 : vector<8x32xf32>
    %137 = arith.mulf %120, %136 : vector<8x32xf32>
    %138 = arith.addf %133, %137 : vector<8x32xf32>
    %139 = math.tanh %138 : vector<8x32xf32>
    %140 = arith.subf %105, %139 : vector<8x32xf32>
    %141 = arith.mulf %130, %140 : vector<8x32xf32>
    %142 = arith.addf %139, %141 : vector<8x32xf32>
    %143 = arith.index_cast %c2_i32 : i32 to index
    %c0_69 = arith.constant 0 : index
    %c0_70 = arith.constant 0 : index
    %144 = vector.load %arg14[%143, %c0_69, %c0_70] : memref<8x8x32xf32, #tpu.memory_space<vmem>>, vector<1x8x32xf32>
    %145 = vector.shape_cast %144 : vector<1x8x32xf32> to vector<8x32xf32>
    %146 = vector.shape_cast %142 : vector<8x32xf32> to vector<1x8x32xf32>
    tpu.vector_store %arg14[%143, %c0_69, %c0_70], %146 {strides = array<i32>} : memref<8x8x32xf32, #tpu.memory_space<vmem>>, vector<1x8x32xf32>,
    %c3_i32 = arith.constant 3 : i32
    %cst_71 = arith.constant dense<0.000000e+00> : vector<8x96xf32>
    %147 = tpu.matmul %142, %32, %cst_71 {dimension_numbers = #tpu.dot_dimension_numbers<[1], [0], [0], [1], [0, 0, 1, 1], [], []>} : vector<8x32xf32>, vector<32x96xf32>, vector<8x96xf32> -> vector<8x96xf32>
    %148 = arith.index_cast %c3_i32 : i32 to index
    %c0_72 = arith.constant 0 : index
    %c0_73 = arith.constant 0 : index
    %149 = vector.load %arg15[%148, %c0_72, %c0_73] : memref<8x8x32xf32, #tpu.memory_space<vmem>>, vector<1x8x32xf32>
    %150 = vector.shape_cast %149 : vector<1x8x32xf32> to vector<8x32xf32>
    %151 = vector.extract_strided_slice %147 {offsets = [0, 0], sizes = [8, 32], strides = [1, 1]} : vector<8x96xf32> to vector<8x32xf32>
    %152 = arith.addf %150, %151 : vector<8x32xf32>
    %153 = arith.negf %152 : vector<8x32xf32>
    %154 = math.exp %153 : vector<8x32xf32>
    %cst_74 = arith.constant 1.000000e+00 : f32
    %155 = vector.broadcast %cst_74 : f32 to vector<8x32xf32>
    %156 = arith.addf %155, %154 : vector<8x32xf32>
    %157 = arith.divf %155, %156 : vector<8x32xf32>
    %158 = arith.index_cast %c3_i32 : i32 to index
    %c0_75 = arith.constant 0 : index
    %c0_76 = arith.constant 0 : index
    %159 = vector.load %arg16[%158, %c0_75, %c0_76] : memref<8x8x32xf32, #tpu.memory_space<vmem>>, vector<1x8x32xf32>
    %160 = vector.shape_cast %159 : vector<1x8x32xf32> to vector<8x32xf32>
    %161 = vector.extract_strided_slice %147 {offsets = [0, 32], sizes = [8, 32], strides = [1, 1]} : vector<8x96xf32> to vector<8x32xf32>
    %162 = arith.addf %160, %161 : vector<8x32xf32>
    %163 = arith.negf %162 : vector<8x32xf32>
    %164 = math.exp %163 : vector<8x32xf32>
    %cst_77 = arith.constant 1.000000e+00 : f32
    %165 = vector.broadcast %cst_77 : f32 to vector<8x32xf32>
    %166 = arith.addf %165, %164 : vector<8x32xf32>
    %167 = arith.divf %165, %166 : vector<8x32xf32>
    %168 = arith.index_cast %c3_i32 : i32 to index
    %c0_78 = arith.constant 0 : index
    %c0_79 = arith.constant 0 : index
    %169 = vector.load %arg17[%168, %c0_78, %c0_79] : memref<8x8x32xf32, #tpu.memory_space<vmem>>, vector<1x8x32xf32>
    %170 = vector.shape_cast %169 : vector<1x8x32xf32> to vector<8x32xf32>
    %171 = vector.extract_strided_slice %147 {offsets = [0, 64], sizes = [8, 32], strides = [1, 1]} : vector<8x96xf32> to vector<8x32xf32>
    %172 = vector.broadcast %33 : vector<1x32xf32> to vector<8x32xf32>
    %173 = arith.addf %171, %172 : vector<8x32xf32>
    %174 = arith.mulf %157, %173 : vector<8x32xf32>
    %175 = arith.addf %170, %174 : vector<8x32xf32>
    %176 = math.tanh %175 : vector<8x32xf32>
    %177 = arith.subf %142, %176 : vector<8x32xf32>
    %178 = arith.mulf %167, %177 : vector<8x32xf32>
    %179 = arith.addf %176, %178 : vector<8x32xf32>
    %180 = arith.index_cast %c3_i32 : i32 to index
    %c0_80 = arith.constant 0 : index
    %c0_81 = arith.constant 0 : index
    %181 = vector.load %arg14[%180, %c0_80, %c0_81] : memref<8x8x32xf32, #tpu.memory_space<vmem>>, vector<1x8x32xf32>
    %182 = vector.shape_cast %181 : vector<1x8x32xf32> to vector<8x32xf32>
    %183 = vector.shape_cast %179 : vector<8x32xf32> to vector<1x8x32xf32>
    tpu.vector_store %arg14[%180, %c0_80, %c0_81], %183 {strides = array<i32>} : memref<8x8x32xf32, #tpu.memory_space<vmem>>, vector<1x8x32xf32>,
    %c4_i32 = arith.constant 4 : i32
    %cst_82 = arith.constant dense<0.000000e+00> : vector<8x96xf32>
    %184 = tpu.matmul %179, %32, %cst_82 {dimension_numbers = #tpu.dot_dimension_numbers<[1], [0], [0], [1], [0, 0, 1, 1], [], []>} : vector<8x32xf32>, vector<32x96xf32>, vector<8x96xf32> -> vector<8x96xf32>
    %185 = arith.index_cast %c4_i32 : i32 to index
    %c0_83 = arith.constant 0 : index
    %c0_84 = arith.constant 0 : index
    %186 = vector.load %arg15[%185, %c0_83, %c0_84] : memref<8x8x32xf32, #tpu.memory_space<vmem>>, vector<1x8x32xf32>
    %187 = vector.shape_cast %186 : vector<1x8x32xf32> to vector<8x32xf32>
    %188 = vector.extract_strided_slice %184 {offsets = [0, 0], sizes = [8, 32], strides = [1, 1]} : vector<8x96xf32> to vector<8x32xf32>
    %189 = arith.addf %187, %188 : vector<8x32xf32>
    %190 = arith.negf %189 : vector<8x32xf32>
    %191 = math.exp %190 : vector<8x32xf32>
    %cst_85 = arith.constant 1.000000e+00 : f32
    %192 = vector.broadcast %cst_85 : f32 to vector<8x32xf32>
    %193 = arith.addf %192, %191 : vector<8x32xf32>
    %194 = arith.divf %192, %193 : vector<8x32xf32>
    %195 = arith.index_cast %c4_i32 : i32 to index
    %c0_86 = arith.constant 0 : index
    %c0_87 = arith.constant 0 : index
    %196 = vector.load %arg16[%195, %c0_86, %c0_87] : memref<8x8x32xf32, #tpu.memory_space<vmem>>, vector<1x8x32xf32>
    %197 = vector.shape_cast %196 : vector<1x8x32xf32> to vector<8x32xf32>
    %198 = vector.extract_strided_slice %184 {offsets = [0, 32], sizes = [8, 32], strides = [1, 1]} : vector<8x96xf32> to vector<8x32xf32>
    %199 = arith.addf %197, %198 : vector<8x32xf32>
    %200 = arith.negf %199 : vector<8x32xf32>
    %201 = math.exp %200 : vector<8x32xf32>
    %cst_88 = arith.constant 1.000000e+00 : f32
    %202 = vector.broadcast %cst_88 : f32 to vector<8x32xf32>
    %203 = arith.addf %202, %201 : vector<8x32xf32>
    %204 = arith.divf %202, %203 : vector<8x32xf32>
    %205 = arith.index_cast %c4_i32 : i32 to index
    %c0_89 = arith.constant 0 : index
    %c0_90 = arith.constant 0 : index
    %206 = vector.load %arg17[%205, %c0_89, %c0_90] : memref<8x8x32xf32, #tpu.memory_space<vmem>>, vector<1x8x32xf32>
    %207 = vector.shape_cast %206 : vector<1x8x32xf32> to vector<8x32xf32>
    %208 = vector.extract_strided_slice %184 {offsets = [0, 64], sizes = [8, 32], strides = [1, 1]} : vector<8x96xf32> to vector<8x32xf32>
    %209 = vector.broadcast %33 : vector<1x32xf32> to vector<8x32xf32>
    %210 = arith.addf %208, %209 : vector<8x32xf32>
    %211 = arith.mulf %194, %210 : vector<8x32xf32>
    %212 = arith.addf %207, %211 : vector<8x32xf32>
    %213 = math.tanh %212 : vector<8x32xf32>
    %214 = arith.subf %179, %213 : vector<8x32xf32>
    %215 = arith.mulf %204, %214 : vector<8x32xf32>
    %216 = arith.addf %213, %215 : vector<8x32xf32>
    %217 = arith.index_cast %c4_i32 : i32 to index
    %c0_91 = arith.constant 0 : index
    %c0_92 = arith.constant 0 : index
    %218 = vector.load %arg14[%217, %c0_91, %c0_92] : memref<8x8x32xf32, #tpu.memory_space<vmem>>, vector<1x8x32xf32>
    %219 = vector.shape_cast %218 : vector<1x8x32xf32> to vector<8x32xf32>
    %220 = vector.shape_cast %216 : vector<8x32xf32> to vector<1x8x32xf32>
    tpu.vector_store %arg14[%217, %c0_91, %c0_92], %220 {strides = array<i32>} : memref<8x8x32xf32, #tpu.memory_space<vmem>>, vector<1x8x32xf32>,
    %c5_i32 = arith.constant 5 : i32
    %cst_93 = arith.constant dense<0.000000e+00> : vector<8x96xf32>
    %221 = tpu.matmul %216, %32, %cst_93 {dimension_numbers = #tpu.dot_dimension_numbers<[1], [0], [0], [1], [0, 0, 1, 1], [], []>} : vector<8x32xf32>, vector<32x96xf32>, vector<8x96xf32> -> vector<8x96xf32>
    %222 = arith.index_cast %c5_i32 : i32 to index
    %c0_94 = arith.constant 0 : index
    %c0_95 = arith.constant 0 : index
    %223 = vector.load %arg15[%222, %c0_94, %c0_95] : memref<8x8x32xf32, #tpu.memory_space<vmem>>, vector<1x8x32xf32>
    %224 = vector.shape_cast %223 : vector<1x8x32xf32> to vector<8x32xf32>
    %225 = vector.extract_strided_slice %221 {offsets = [0, 0], sizes = [8, 32], strides = [1, 1]} : vector<8x96xf32> to vector<8x32xf32>
    %226 = arith.addf %224, %225 : vector<8x32xf32>
    %227 = arith.negf %226 : vector<8x32xf32>
    %228 = math.exp %227 : vector<8x32xf32>
    %cst_96 = arith.constant 1.000000e+00 : f32
    %229 = vector.broadcast %cst_96 : f32 to vector<8x32xf32>
    %230 = arith.addf %229, %228 : vector<8x32xf32>
    %231 = arith.divf %229, %230 : vector<8x32xf32>
    %232 = arith.index_cast %c5_i32 : i32 to index
    %c0_97 = arith.constant 0 : index
    %c0_98 = arith.constant 0 : index
    %233 = vector.load %arg16[%232, %c0_97, %c0_98] : memref<8x8x32xf32, #tpu.memory_space<vmem>>, vector<1x8x32xf32>
    %234 = vector.shape_cast %233 : vector<1x8x32xf32> to vector<8x32xf32>
    %235 = vector.extract_strided_slice %221 {offsets = [0, 32], sizes = [8, 32], strides = [1, 1]} : vector<8x96xf32> to vector<8x32xf32>
    %236 = arith.addf %234, %235 : vector<8x32xf32>
    %237 = arith.negf %236 : vector<8x32xf32>
    %238 = math.exp %237 : vector<8x32xf32>
    %cst_99 = arith.constant 1.000000e+00 : f32
    %239 = vector.broadcast %cst_99 : f32 to vector<8x32xf32>
    %240 = arith.addf %239, %238 : vector<8x32xf32>
    %241 = arith.divf %239, %240 : vector<8x32xf32>
    %242 = arith.index_cast %c5_i32 : i32 to index
    %c0_100 = arith.constant 0 : index
    %c0_101 = arith.constant 0 : index
    %243 = vector.load %arg17[%242, %c0_100, %c0_101] : memref<8x8x32xf32, #tpu.memory_space<vmem>>, vector<1x8x32xf32>
    %244 = vector.shape_cast %243 : vector<1x8x32xf32> to vector<8x32xf32>
    %245 = vector.extract_strided_slice %221 {offsets = [0, 64], sizes = [8, 32], strides = [1, 1]} : vector<8x96xf32> to vector<8x32xf32>
    %246 = vector.broadcast %33 : vector<1x32xf32> to vector<8x32xf32>
    %247 = arith.addf %245, %246 : vector<8x32xf32>
    %248 = arith.mulf %231, %247 : vector<8x32xf32>
    %249 = arith.addf %244, %248 : vector<8x32xf32>
    %250 = math.tanh %249 : vector<8x32xf32>
    %251 = arith.subf %216, %250 : vector<8x32xf32>
    %252 = arith.mulf %241, %251 : vector<8x32xf32>
    %253 = arith.addf %250, %252 : vector<8x32xf32>
    %254 = arith.index_cast %c5_i32 : i32 to index
    %c0_102 = arith.constant 0 : index
    %c0_103 = arith.constant 0 : index
    %255 = vector.load %arg14[%254, %c0_102, %c0_103] : memref<8x8x32xf32, #tpu.memory_space<vmem>>, vector<1x8x32xf32>
    %256 = vector.shape_cast %255 : vector<1x8x32xf32> to vector<8x32xf32>
    %257 = vector.shape_cast %253 : vector<8x32xf32> to vector<1x8x32xf32>
    tpu.vector_store %arg14[%254, %c0_102, %c0_103], %257 {strides = array<i32>} : memref<8x8x32xf32, #tpu.memory_space<vmem>>, vector<1x8x32xf32>,
    %c6_i32 = arith.constant 6 : i32
    %cst_104 = arith.constant dense<0.000000e+00> : vector<8x96xf32>
    %258 = tpu.matmul %253, %32, %cst_104 {dimension_numbers = #tpu.dot_dimension_numbers<[1], [0], [0], [1], [0, 0, 1, 1], [], []>} : vector<8x32xf32>, vector<32x96xf32>, vector<8x96xf32> -> vector<8x96xf32>
    %259 = arith.index_cast %c6_i32 : i32 to index
    %c0_105 = arith.constant 0 : index
    %c0_106 = arith.constant 0 : index
    %260 = vector.load %arg15[%259, %c0_105, %c0_106] : memref<8x8x32xf32, #tpu.memory_space<vmem>>, vector<1x8x32xf32>
    %261 = vector.shape_cast %260 : vector<1x8x32xf32> to vector<8x32xf32>
    %262 = vector.extract_strided_slice %258 {offsets = [0, 0], sizes = [8, 32], strides = [1, 1]} : vector<8x96xf32> to vector<8x32xf32>
    %263 = arith.addf %261, %262 : vector<8x32xf32>
    %264 = arith.negf %263 : vector<8x32xf32>
    %265 = math.exp %264 : vector<8x32xf32>
    %cst_107 = arith.constant 1.000000e+00 : f32
    %266 = vector.broadcast %cst_107 : f32 to vector<8x32xf32>
    %267 = arith.addf %266, %265 : vector<8x32xf32>
    %268 = arith.divf %266, %267 : vector<8x32xf32>
    %269 = arith.index_cast %c6_i32 : i32 to index
    %c0_108 = arith.constant 0 : index
    %c0_109 = arith.constant 0 : index
    %270 = vector.load %arg16[%269, %c0_108, %c0_109] : memref<8x8x32xf32, #tpu.memory_space<vmem>>, vector<1x8x32xf32>
    %271 = vector.shape_cast %270 : vector<1x8x32xf32> to vector<8x32xf32>
    %272 = vector.extract_strided_slice %258 {offsets = [0, 32], sizes = [8, 32], strides = [1, 1]} : vector<8x96xf32> to vector<8x32xf32>
    %273 = arith.addf %271, %272 : vector<8x32xf32>
    %274 = arith.negf %273 : vector<8x32xf32>
    %275 = math.exp %274 : vector<8x32xf32>
    %cst_110 = arith.constant 1.000000e+00 : f32
    %276 = vector.broadcast %cst_110 : f32 to vector<8x32xf32>
    %277 = arith.addf %276, %275 : vector<8x32xf32>
    %278 = arith.divf %276, %277 : vector<8x32xf32>
    %279 = arith.index_cast %c6_i32 : i32 to index
    %c0_111 = arith.constant 0 : index
    %c0_112 = arith.constant 0 : index
    %280 = vector.load %arg17[%279, %c0_111, %c0_112] : memref<8x8x32xf32, #tpu.memory_space<vmem>>, vector<1x8x32xf32>
    %281 = vector.shape_cast %280 : vector<1x8x32xf32> to vector<8x32xf32>
    %282 = vector.extract_strided_slice %258 {offsets = [0, 64], sizes = [8, 32], strides = [1, 1]} : vector<8x96xf32> to vector<8x32xf32>
    %283 = vector.broadcast %33 : vector<1x32xf32> to vector<8x32xf32>
    %284 = arith.addf %282, %283 : vector<8x32xf32>
    %285 = arith.mulf %268, %284 : vector<8x32xf32>
    %286 = arith.addf %281, %285 : vector<8x32xf32>
    %287 = math.tanh %286 : vector<8x32xf32>
    %288 = arith.subf %253, %287 : vector<8x32xf32>
    %289 = arith.mulf %278, %288 : vector<8x32xf32>
    %290 = arith.addf %287, %289 : vector<8x32xf32>
    %291 = arith.index_cast %c6_i32 : i32 to index
    %c0_113 = arith.constant 0 : index
    %c0_114 = arith.constant 0 : index
    %292 = vector.load %arg14[%291, %c0_113, %c0_114] : memref<8x8x32xf32, #tpu.memory_space<vmem>>, vector<1x8x32xf32>
    %293 = vector.shape_cast %292 : vector<1x8x32xf32> to vector<8x32xf32>
    %294 = vector.shape_cast %290 : vector<8x32xf32> to vector<1x8x32xf32>
    tpu.vector_store %arg14[%291, %c0_113, %c0_114], %294 {strides = array<i32>} : memref<8x8x32xf32, #tpu.memory_space<vmem>>, vector<1x8x32xf32>,
    %c7_i32 = arith.constant 7 : i32
    %cst_115 = arith.constant dense<0.000000e+00> : vector<8x96xf32>
    %295 = tpu.matmul %290, %32, %cst_115 {dimension_numbers = #tpu.dot_dimension_numbers<[1], [0], [0], [1], [0, 0, 1, 1], [], []>} : vector<8x32xf32>, vector<32x96xf32>, vector<8x96xf32> -> vector<8x96xf32>
    %296 = arith.index_cast %c7_i32 : i32 to index
    %c0_116 = arith.constant 0 : index
    %c0_117 = arith.constant 0 : index
    %297 = vector.load %arg15[%296, %c0_116, %c0_117] : memref<8x8x32xf32, #tpu.memory_space<vmem>>, vector<1x8x32xf32>
    %298 = vector.shape_cast %297 : vector<1x8x32xf32> to vector<8x32xf32>
    %299 = vector.extract_strided_slice %295 {offsets = [0, 0], sizes = [8, 32], strides = [1, 1]} : vector<8x96xf32> to vector<8x32xf32>
    %300 = arith.addf %298, %299 : vector<8x32xf32>
    %301 = arith.negf %300 : vector<8x32xf32>
    %302 = math.exp %301 : vector<8x32xf32>
    %cst_118 = arith.constant 1.000000e+00 : f32
    %303 = vector.broadcast %cst_118 : f32 to vector<8x32xf32>
    %304 = arith.addf %303, %302 : vector<8x32xf32>
    %305 = arith.divf %303, %304 : vector<8x32xf32>
    %306 = arith.index_cast %c7_i32 : i32 to index
    %c0_119 = arith.constant 0 : index
    %c0_120 = arith.constant 0 : index
    %307 = vector.load %arg16[%306, %c0_119, %c0_120] : memref<8x8x32xf32, #tpu.memory_space<vmem>>, vector<1x8x32xf32>
    %308 = vector.shape_cast %307 : vector<1x8x32xf32> to vector<8x32xf32>
    %309 = vector.extract_strided_slice %295 {offsets = [0, 32], sizes = [8, 32], strides = [1, 1]} : vector<8x96xf32> to vector<8x32xf32>
    %310 = arith.addf %308, %309 : vector<8x32xf32>
    %311 = arith.negf %310 : vector<8x32xf32>
    %312 = math.exp %311 : vector<8x32xf32>
    %cst_121 = arith.constant 1.000000e+00 : f32
    %313 = vector.broadcast %cst_121 : f32 to vector<8x32xf32>
    %314 = arith.addf %313, %312 : vector<8x32xf32>
    %315 = arith.divf %313, %314 : vector<8x32xf32>
    %316 = arith.index_cast %c7_i32 : i32 to index
    %c0_122 = arith.constant 0 : index
    %c0_123 = arith.constant 0 : index
    %317 = vector.load %arg17[%316, %c0_122, %c0_123] : memref<8x8x32xf32, #tpu.memory_space<vmem>>, vector<1x8x32xf32>
    %318 = vector.shape_cast %317 : vector<1x8x32xf32> to vector<8x32xf32>
    %319 = vector.extract_strided_slice %295 {offsets = [0, 64], sizes = [8, 32], strides = [1, 1]} : vector<8x96xf32> to vector<8x32xf32>
    %320 = vector.broadcast %33 : vector<1x32xf32> to vector<8x32xf32>
    %321 = arith.addf %319, %320 : vector<8x32xf32>
    %322 = arith.mulf %305, %321 : vector<8x32xf32>
    %323 = arith.addf %318, %322 : vector<8x32xf32>
    %324 = math.tanh %323 : vector<8x32xf32>
    %325 = arith.subf %290, %324 : vector<8x32xf32>
    %326 = arith.mulf %315, %325 : vector<8x32xf32>
    %327 = arith.addf %324, %326 : vector<8x32xf32>
    %328 = arith.index_cast %c7_i32 : i32 to index
    %c0_124 = arith.constant 0 : index
    %c0_125 = arith.constant 0 : index
    %329 = vector.load %arg14[%328, %c0_124, %c0_125] : memref<8x8x32xf32, #tpu.memory_space<vmem>>, vector<1x8x32xf32>
    %330 = vector.shape_cast %329 : vector<1x8x32xf32> to vector<8x32xf32>
    %331 = vector.shape_cast %327 : vector<8x32xf32> to vector<1x8x32xf32>
    tpu.vector_store %arg14[%328, %c0_124, %c0_125], %331 {strides = array<i32>} : memref<8x8x32xf32, #tpu.memory_space<vmem>>, vector<1x8x32xf32>,
    %c8_i32 = arith.constant 8 : i32
    %c0_126 = arith.constant 0 : index
    %c0_127 = arith.constant 0 : index
    %c0_128 = arith.constant 0 : index
    %332 = vector.load %arg13[%c0_126, %c0_127, %c0_128] : memref<2x8x32xf32, #tpu.memory_space<vmem>>, vector<1x8x32xf32>
    %333 = vector.shape_cast %332 : vector<1x8x32xf32> to vector<8x32xf32>
    %334 = vector.shape_cast %327 : vector<8x32xf32> to vector<1x8x32xf32>
    tpu.vector_store %arg13[%c0_126, %c0_127, %c0_128], %334 {strides = array<i32>} : memref<2x8x32xf32, #tpu.memory_space<vmem>>, vector<1x8x32xf32>,
    %c0_129 = arith.constant 0 : index
    %c0_130 = arith.constant 0 : index
    %c0_131 = arith.constant 0 : index
    %335 = vector.load %arg14[%c0_129, %c0_130, %c0_131] : memref<8x8x32xf32, #tpu.memory_space<vmem>>, vector<8x8x32xf32>
    %336 = vector.shape_cast %335 : vector<8x8x32xf32> to vector<64x32xf32>
    %c0_132 = arith.constant 0 : index
    %c0_133 = arith.constant 0 : index
    %c0_134 = arith.constant 0 : index
    %337 = vector.load %arg6[%c0_132, %c0_133, %c0_134] : memref<3x32x32xf32, #tpu.memory_space<vmem>>, vector<1x32x32xf32>
    %338 = vector.shape_cast %337 : vector<1x32x32xf32> to vector<32x32xf32>
    %cst_135 = arith.constant dense<0.000000e+00> : vector<64x32xf32>
    %339 = tpu.matmul %336, %338, %cst_135 {dimension_numbers = #tpu.dot_dimension_numbers<[1], [0], [0], [1], [0, 0, 1, 1], [], []>} : vector<64x32xf32>, vector<32x32xf32>, vector<64x32xf32> -> vector<64x32xf32>
    %c0_136 = arith.constant 0 : index
    %c0_137 = arith.constant 0 : index
    %c0_138 = arith.constant 0 : index
    %340 = vector.load %arg8[%c0_136, %c0_137, %c0_138] : memref<3x1x32xf32, #tpu.memory_space<vmem>>, vector<1x1x32xf32>
    %341 = vector.shape_cast %340 : vector<1x1x32xf32> to vector<1x32xf32>
    %342 = vector.broadcast %341 : vector<1x32xf32> to vector<64x32xf32>
    %343 = arith.addf %339, %342 : vector<64x32xf32>
    %344 = vector.shape_cast %343 : vector<64x32xf32> to vector<8x8x32xf32>
    %c0_139 = arith.constant 0 : index
    %c0_140 = arith.constant 0 : index
    %c0_141 = arith.constant 0 : index
    %345 = vector.load %arg15[%c0_139, %c0_140, %c0_141] : memref<8x8x32xf32, #tpu.memory_space<vmem>>, vector<8x8x32xf32>
    tpu.vector_store %arg15[%c0_139, %c0_140, %c0_141], %344 {strides = array<i32>} : memref<8x8x32xf32, #tpu.memory_space<vmem>>, vector<8x8x32xf32>,
    %c1_142 = arith.constant 1 : index
    %c0_143 = arith.constant 0 : index
    %c0_144 = arith.constant 0 : index
    %346 = vector.load %arg6[%c1_142, %c0_143, %c0_144] : memref<3x32x32xf32, #tpu.memory_space<vmem>>, vector<1x32x32xf32>
    %347 = vector.shape_cast %346 : vector<1x32x32xf32> to vector<32x32xf32>
    %cst_145 = arith.constant dense<0.000000e+00> : vector<64x32xf32>
    %348 = tpu.matmul %336, %347, %cst_145 {dimension_numbers = #tpu.dot_dimension_numbers<[1], [0], [0], [1], [0, 0, 1, 1], [], []>} : vector<64x32xf32>, vector<32x32xf32>, vector<64x32xf32> -> vector<64x32xf32>
    %c1_146 = arith.constant 1 : index
    %c0_147 = arith.constant 0 : index
    %c0_148 = arith.constant 0 : index
    %349 = vector.load %arg8[%c1_146, %c0_147, %c0_148] : memref<3x1x32xf32, #tpu.memory_space<vmem>>, vector<1x1x32xf32>
    %350 = vector.shape_cast %349 : vector<1x1x32xf32> to vector<1x32xf32>
    %351 = vector.broadcast %350 : vector<1x32xf32> to vector<64x32xf32>
    %352 = arith.addf %348, %351 : vector<64x32xf32>
    %353 = vector.shape_cast %352 : vector<64x32xf32> to vector<8x8x32xf32>
    %c0_149 = arith.constant 0 : index
    %c0_150 = arith.constant 0 : index
    %c0_151 = arith.constant 0 : index
    %354 = vector.load %arg16[%c0_149, %c0_150, %c0_151] : memref<8x8x32xf32, #tpu.memory_space<vmem>>, vector<8x8x32xf32>
    tpu.vector_store %arg16[%c0_149, %c0_150, %c0_151], %353 {strides = array<i32>} : memref<8x8x32xf32, #tpu.memory_space<vmem>>, vector<8x8x32xf32>,
    %c2_152 = arith.constant 2 : index
    %c0_153 = arith.constant 0 : index
    %c0_154 = arith.constant 0 : index
    %355 = vector.load %arg6[%c2_152, %c0_153, %c0_154] : memref<3x32x32xf32, #tpu.memory_space<vmem>>, vector<1x32x32xf32>
    %356 = vector.shape_cast %355 : vector<1x32x32xf32> to vector<32x32xf32>
    %cst_155 = arith.constant dense<0.000000e+00> : vector<64x32xf32>
    %357 = tpu.matmul %336, %356, %cst_155 {dimension_numbers = #tpu.dot_dimension_numbers<[1], [0], [0], [1], [0, 0, 1, 1], [], []>} : vector<64x32xf32>, vector<32x32xf32>, vector<64x32xf32> -> vector<64x32xf32>
    %c2_156 = arith.constant 2 : index
    %c0_157 = arith.constant 0 : index
    %c0_158 = arith.constant 0 : index
    %358 = vector.load %arg8[%c2_156, %c0_157, %c0_158] : memref<3x1x32xf32, #tpu.memory_space<vmem>>, vector<1x1x32xf32>
    %359 = vector.shape_cast %358 : vector<1x1x32xf32> to vector<1x32xf32>
    %360 = vector.broadcast %359 : vector<1x32xf32> to vector<64x32xf32>
    %361 = arith.addf %357, %360 : vector<64x32xf32>
    %362 = vector.shape_cast %361 : vector<64x32xf32> to vector<8x8x32xf32>
    %c0_159 = arith.constant 0 : index
    %c0_160 = arith.constant 0 : index
    %c0_161 = arith.constant 0 : index
    %363 = vector.load %arg17[%c0_159, %c0_160, %c0_161] : memref<8x8x32xf32, #tpu.memory_space<vmem>>, vector<8x8x32xf32>
    tpu.vector_store %arg17[%c0_159, %c0_160, %c0_161], %362 {strides = array<i32>} : memref<8x8x32xf32, #tpu.memory_space<vmem>>, vector<8x8x32xf32>,
    %c0_162 = arith.constant 0 : index
    %c0_163 = arith.constant 0 : index
    %364 = vector.load %arg7[%c0_162, %c0_163] : memref<32x96xf32, #tpu.memory_space<vmem>>, vector<32x96xf32>
    %c0_164 = arith.constant 0 : index
    %c0_165 = arith.constant 0 : index
    %365 = vector.load %arg9[%c0_164, %c0_165] : memref<1x32xf32, #tpu.memory_space<vmem>>, vector<1x32xf32>
    %c1_166 = arith.constant 1 : index
    %c0_167 = arith.constant 0 : index
    %c0_168 = arith.constant 0 : index
    %366 = vector.load %arg13[%c1_166, %c0_167, %c0_168] : memref<2x8x32xf32, #tpu.memory_space<vmem>>, vector<1x8x32xf32>
    %367 = vector.shape_cast %366 : vector<1x8x32xf32> to vector<8x32xf32>
    %c0_i32_169 = arith.constant 0 : i32
    %cst_170 = arith.constant dense<0.000000e+00> : vector<8x96xf32>
    %368 = tpu.matmul %367, %364, %cst_170 {dimension_numbers = #tpu.dot_dimension_numbers<[1], [0], [0], [1], [0, 0, 1, 1], [], []>} : vector<8x32xf32>, vector<32x96xf32>, vector<8x96xf32> -> vector<8x96xf32>
    %369 = arith.index_cast %c0_i32_169 : i32 to index
    %c0_171 = arith.constant 0 : index
    %c0_172 = arith.constant 0 : index
    %370 = vector.load %arg15[%369, %c0_171, %c0_172] : memref<8x8x32xf32, #tpu.memory_space<vmem>>, vector<1x8x32xf32>
    %371 = vector.shape_cast %370 : vector<1x8x32xf32> to vector<8x32xf32>
    %372 = vector.extract_strided_slice %368 {offsets = [0, 0], sizes = [8, 32], strides = [1, 1]} : vector<8x96xf32> to vector<8x32xf32>
    %373 = arith.addf %371, %372 : vector<8x32xf32>
    %374 = arith.negf %373 : vector<8x32xf32>
    %375 = math.exp %374 : vector<8x32xf32>
    %cst_173 = arith.constant 1.000000e+00 : f32
    %376 = vector.broadcast %cst_173 : f32 to vector<8x32xf32>
    %377 = arith.addf %376, %375 : vector<8x32xf32>
    %378 = arith.divf %376, %377 : vector<8x32xf32>
    %379 = arith.index_cast %c0_i32_169 : i32 to index
    %c0_174 = arith.constant 0 : index
    %c0_175 = arith.constant 0 : index
    %380 = vector.load %arg16[%379, %c0_174, %c0_175] : memref<8x8x32xf32, #tpu.memory_space<vmem>>, vector<1x8x32xf32>
    %381 = vector.shape_cast %380 : vector<1x8x32xf32> to vector<8x32xf32>
    %382 = vector.extract_strided_slice %368 {offsets = [0, 32], sizes = [8, 32], strides = [1, 1]} : vector<8x96xf32> to vector<8x32xf32>
    %383 = arith.addf %381, %382 : vector<8x32xf32>
    %384 = arith.negf %383 : vector<8x32xf32>
    %385 = math.exp %384 : vector<8x32xf32>
    %cst_176 = arith.constant 1.000000e+00 : f32
    %386 = vector.broadcast %cst_176 : f32 to vector<8x32xf32>
    %387 = arith.addf %386, %385 : vector<8x32xf32>
    %388 = arith.divf %386, %387 : vector<8x32xf32>
    %389 = arith.index_cast %c0_i32_169 : i32 to index
    %c0_177 = arith.constant 0 : index
    %c0_178 = arith.constant 0 : index
    %390 = vector.load %arg17[%389, %c0_177, %c0_178] : memref<8x8x32xf32, #tpu.memory_space<vmem>>, vector<1x8x32xf32>
    %391 = vector.shape_cast %390 : vector<1x8x32xf32> to vector<8x32xf32>
    %392 = vector.extract_strided_slice %368 {offsets = [0, 64], sizes = [8, 32], strides = [1, 1]} : vector<8x96xf32> to vector<8x32xf32>
    %393 = vector.broadcast %365 : vector<1x32xf32> to vector<8x32xf32>
    %394 = arith.addf %392, %393 : vector<8x32xf32>
    %395 = arith.mulf %378, %394 : vector<8x32xf32>
    %396 = arith.addf %391, %395 : vector<8x32xf32>
    %397 = math.tanh %396 : vector<8x32xf32>
    %398 = arith.subf %367, %397 : vector<8x32xf32>
    %399 = arith.mulf %388, %398 : vector<8x32xf32>
    %400 = arith.addf %397, %399 : vector<8x32xf32>
    %c1_i32_179 = arith.constant 1 : i32
    %cst_180 = arith.constant dense<0.000000e+00> : vector<8x96xf32>
    %401 = tpu.matmul %400, %364, %cst_180 {dimension_numbers = #tpu.dot_dimension_numbers<[1], [0], [0], [1], [0, 0, 1, 1], [], []>} : vector<8x32xf32>, vector<32x96xf32>, vector<8x96xf32> -> vector<8x96xf32>
    %402 = arith.index_cast %c1_i32_179 : i32 to index
    %c0_181 = arith.constant 0 : index
    %c0_182 = arith.constant 0 : index
    %403 = vector.load %arg15[%402, %c0_181, %c0_182] : memref<8x8x32xf32, #tpu.memory_space<vmem>>, vector<1x8x32xf32>
    %404 = vector.shape_cast %403 : vector<1x8x32xf32> to vector<8x32xf32>
    %405 = vector.extract_strided_slice %401 {offsets = [0, 0], sizes = [8, 32], strides = [1, 1]} : vector<8x96xf32> to vector<8x32xf32>
    %406 = arith.addf %404, %405 : vector<8x32xf32>
    %407 = arith.negf %406 : vector<8x32xf32>
    %408 = math.exp %407 : vector<8x32xf32>
    %cst_183 = arith.constant 1.000000e+00 : f32
    %409 = vector.broadcast %cst_183 : f32 to vector<8x32xf32>
    %410 = arith.addf %409, %408 : vector<8x32xf32>
    %411 = arith.divf %409, %410 : vector<8x32xf32>
    %412 = arith.index_cast %c1_i32_179 : i32 to index
    %c0_184 = arith.constant 0 : index
    %c0_185 = arith.constant 0 : index
    %413 = vector.load %arg16[%412, %c0_184, %c0_185] : memref<8x8x32xf32, #tpu.memory_space<vmem>>, vector<1x8x32xf32>
    %414 = vector.shape_cast %413 : vector<1x8x32xf32> to vector<8x32xf32>
    %415 = vector.extract_strided_slice %401 {offsets = [0, 32], sizes = [8, 32], strides = [1, 1]} : vector<8x96xf32> to vector<8x32xf32>
    %416 = arith.addf %414, %415 : vector<8x32xf32>
    %417 = arith.negf %416 : vector<8x32xf32>
    %418 = math.exp %417 : vector<8x32xf32>
    %cst_186 = arith.constant 1.000000e+00 : f32
    %419 = vector.broadcast %cst_186 : f32 to vector<8x32xf32>
    %420 = arith.addf %419, %418 : vector<8x32xf32>
    %421 = arith.divf %419, %420 : vector<8x32xf32>
    %422 = arith.index_cast %c1_i32_179 : i32 to index
    %c0_187 = arith.constant 0 : index
    %c0_188 = arith.constant 0 : index
    %423 = vector.load %arg17[%422, %c0_187, %c0_188] : memref<8x8x32xf32, #tpu.memory_space<vmem>>, vector<1x8x32xf32>
    %424 = vector.shape_cast %423 : vector<1x8x32xf32> to vector<8x32xf32>
    %425 = vector.extract_strided_slice %401 {offsets = [0, 64], sizes = [8, 32], strides = [1, 1]} : vector<8x96xf32> to vector<8x32xf32>
    %426 = vector.broadcast %365 : vector<1x32xf32> to vector<8x32xf32>
    %427 = arith.addf %425, %426 : vector<8x32xf32>
    %428 = arith.mulf %411, %427 : vector<8x32xf32>
    %429 = arith.addf %424, %428 : vector<8x32xf32>
    %430 = math.tanh %429 : vector<8x32xf32>
    %431 = arith.subf %400, %430 : vector<8x32xf32>
    %432 = arith.mulf %421, %431 : vector<8x32xf32>
    %433 = arith.addf %430, %432 : vector<8x32xf32>
    %c2_i32_189 = arith.constant 2 : i32
    %cst_190 = arith.constant dense<0.000000e+00> : vector<8x96xf32>
    %434 = tpu.matmul %433, %364, %cst_190 {dimension_numbers = #tpu.dot_dimension_numbers<[1], [0], [0], [1], [0, 0, 1, 1], [], []>} : vector<8x32xf32>, vector<32x96xf32>, vector<8x96xf32> -> vector<8x96xf32>
    %435 = arith.index_cast %c2_i32_189 : i32 to index
    %c0_191 = arith.constant 0 : index
    %c0_192 = arith.constant 0 : index
    %436 = vector.load %arg15[%435, %c0_191, %c0_192] : memref<8x8x32xf32, #tpu.memory_space<vmem>>, vector<1x8x32xf32>
    %437 = vector.shape_cast %436 : vector<1x8x32xf32> to vector<8x32xf32>
    %438 = vector.extract_strided_slice %434 {offsets = [0, 0], sizes = [8, 32], strides = [1, 1]} : vector<8x96xf32> to vector<8x32xf32>
    %439 = arith.addf %437, %438 : vector<8x32xf32>
    %440 = arith.negf %439 : vector<8x32xf32>
    %441 = math.exp %440 : vector<8x32xf32>
    %cst_193 = arith.constant 1.000000e+00 : f32
    %442 = vector.broadcast %cst_193 : f32 to vector<8x32xf32>
    %443 = arith.addf %442, %441 : vector<8x32xf32>
    %444 = arith.divf %442, %443 : vector<8x32xf32>
    %445 = arith.index_cast %c2_i32_189 : i32 to index
    %c0_194 = arith.constant 0 : index
    %c0_195 = arith.constant 0 : index
    %446 = vector.load %arg16[%445, %c0_194, %c0_195] : memref<8x8x32xf32, #tpu.memory_space<vmem>>, vector<1x8x32xf32>
    %447 = vector.shape_cast %446 : vector<1x8x32xf32> to vector<8x32xf32>
    %448 = vector.extract_strided_slice %434 {offsets = [0, 32], sizes = [8, 32], strides = [1, 1]} : vector<8x96xf32> to vector<8x32xf32>
    %449 = arith.addf %447, %448 : vector<8x32xf32>
    %450 = arith.negf %449 : vector<8x32xf32>
    %451 = math.exp %450 : vector<8x32xf32>
    %cst_196 = arith.constant 1.000000e+00 : f32
    %452 = vector.broadcast %cst_196 : f32 to vector<8x32xf32>
    %453 = arith.addf %452, %451 : vector<8x32xf32>
    %454 = arith.divf %452, %453 : vector<8x32xf32>
    %455 = arith.index_cast %c2_i32_189 : i32 to index
    %c0_197 = arith.constant 0 : index
    %c0_198 = arith.constant 0 : index
    %456 = vector.load %arg17[%455, %c0_197, %c0_198] : memref<8x8x32xf32, #tpu.memory_space<vmem>>, vector<1x8x32xf32>
    %457 = vector.shape_cast %456 : vector<1x8x32xf32> to vector<8x32xf32>
    %458 = vector.extract_strided_slice %434 {offsets = [0, 64], sizes = [8, 32], strides = [1, 1]} : vector<8x96xf32> to vector<8x32xf32>
    %459 = vector.broadcast %365 : vector<1x32xf32> to vector<8x32xf32>
    %460 = arith.addf %458, %459 : vector<8x32xf32>
    %461 = arith.mulf %444, %460 : vector<8x32xf32>
    %462 = arith.addf %457, %461 : vector<8x32xf32>
    %463 = math.tanh %462 : vector<8x32xf32>
    %464 = arith.subf %433, %463 : vector<8x32xf32>
    %465 = arith.mulf %454, %464 : vector<8x32xf32>
    %466 = arith.addf %463, %465 : vector<8x32xf32>
    %c3_i32_199 = arith.constant 3 : i32
    %cst_200 = arith.constant dense<0.000000e+00> : vector<8x96xf32>
    %467 = tpu.matmul %466, %364, %cst_200 {dimension_numbers = #tpu.dot_dimension_numbers<[1], [0], [0], [1], [0, 0, 1, 1], [], []>} : vector<8x32xf32>, vector<32x96xf32>, vector<8x96xf32> -> vector<8x96xf32>
    %468 = arith.index_cast %c3_i32_199 : i32 to index
    %c0_201 = arith.constant 0 : index
    %c0_202 = arith.constant 0 : index
    %469 = vector.load %arg15[%468, %c0_201, %c0_202] : memref<8x8x32xf32, #tpu.memory_space<vmem>>, vector<1x8x32xf32>
    %470 = vector.shape_cast %469 : vector<1x8x32xf32> to vector<8x32xf32>
    %471 = vector.extract_strided_slice %467 {offsets = [0, 0], sizes = [8, 32], strides = [1, 1]} : vector<8x96xf32> to vector<8x32xf32>
    %472 = arith.addf %470, %471 : vector<8x32xf32>
    %473 = arith.negf %472 : vector<8x32xf32>
    %474 = math.exp %473 : vector<8x32xf32>
    %cst_203 = arith.constant 1.000000e+00 : f32
    %475 = vector.broadcast %cst_203 : f32 to vector<8x32xf32>
    %476 = arith.addf %475, %474 : vector<8x32xf32>
    %477 = arith.divf %475, %476 : vector<8x32xf32>
    %478 = arith.index_cast %c3_i32_199 : i32 to index
    %c0_204 = arith.constant 0 : index
    %c0_205 = arith.constant 0 : index
    %479 = vector.load %arg16[%478, %c0_204, %c0_205] : memref<8x8x32xf32, #tpu.memory_space<vmem>>, vector<1x8x32xf32>
    %480 = vector.shape_cast %479 : vector<1x8x32xf32> to vector<8x32xf32>
    %481 = vector.extract_strided_slice %467 {offsets = [0, 32], sizes = [8, 32], strides = [1, 1]} : vector<8x96xf32> to vector<8x32xf32>
    %482 = arith.addf %480, %481 : vector<8x32xf32>
    %483 = arith.negf %482 : vector<8x32xf32>
    %484 = math.exp %483 : vector<8x32xf32>
    %cst_206 = arith.constant 1.000000e+00 : f32
    %485 = vector.broadcast %cst_206 : f32 to vector<8x32xf32>
    %486 = arith.addf %485, %484 : vector<8x32xf32>
    %487 = arith.divf %485, %486 : vector<8x32xf32>
    %488 = arith.index_cast %c3_i32_199 : i32 to index
    %c0_207 = arith.constant 0 : index
    %c0_208 = arith.constant 0 : index
    %489 = vector.load %arg17[%488, %c0_207, %c0_208] : memref<8x8x32xf32, #tpu.memory_space<vmem>>, vector<1x8x32xf32>
    %490 = vector.shape_cast %489 : vector<1x8x32xf32> to vector<8x32xf32>
    %491 = vector.extract_strided_slice %467 {offsets = [0, 64], sizes = [8, 32], strides = [1, 1]} : vector<8x96xf32> to vector<8x32xf32>
    %492 = vector.broadcast %365 : vector<1x32xf32> to vector<8x32xf32>
    %493 = arith.addf %491, %492 : vector<8x32xf32>
    %494 = arith.mulf %477, %493 : vector<8x32xf32>
    %495 = arith.addf %490, %494 : vector<8x32xf32>
    %496 = math.tanh %495 : vector<8x32xf32>
    %497 = arith.subf %466, %496 : vector<8x32xf32>
    %498 = arith.mulf %487, %497 : vector<8x32xf32>
    %499 = arith.addf %496, %498 : vector<8x32xf32>
    %c4_i32_209 = arith.constant 4 : i32
    %cst_210 = arith.constant dense<0.000000e+00> : vector<8x96xf32>
    %500 = tpu.matmul %499, %364, %cst_210 {dimension_numbers = #tpu.dot_dimension_numbers<[1], [0], [0], [1], [0, 0, 1, 1], [], []>} : vector<8x32xf32>, vector<32x96xf32>, vector<8x96xf32> -> vector<8x96xf32>
    %501 = arith.index_cast %c4_i32_209 : i32 to index
    %c0_211 = arith.constant 0 : index
    %c0_212 = arith.constant 0 : index
    %502 = vector.load %arg15[%501, %c0_211, %c0_212] : memref<8x8x32xf32, #tpu.memory_space<vmem>>, vector<1x8x32xf32>
    %503 = vector.shape_cast %502 : vector<1x8x32xf32> to vector<8x32xf32>
    %504 = vector.extract_strided_slice %500 {offsets = [0, 0], sizes = [8, 32], strides = [1, 1]} : vector<8x96xf32> to vector<8x32xf32>
    %505 = arith.addf %503, %504 : vector<8x32xf32>
    %506 = arith.negf %505 : vector<8x32xf32>
    %507 = math.exp %506 : vector<8x32xf32>
    %cst_213 = arith.constant 1.000000e+00 : f32
    %508 = vector.broadcast %cst_213 : f32 to vector<8x32xf32>
    %509 = arith.addf %508, %507 : vector<8x32xf32>
    %510 = arith.divf %508, %509 : vector<8x32xf32>
    %511 = arith.index_cast %c4_i32_209 : i32 to index
    %c0_214 = arith.constant 0 : index
    %c0_215 = arith.constant 0 : index
    %512 = vector.load %arg16[%511, %c0_214, %c0_215] : memref<8x8x32xf32, #tpu.memory_space<vmem>>, vector<1x8x32xf32>
    %513 = vector.shape_cast %512 : vector<1x8x32xf32> to vector<8x32xf32>
    %514 = vector.extract_strided_slice %500 {offsets = [0, 32], sizes = [8, 32], strides = [1, 1]} : vector<8x96xf32> to vector<8x32xf32>
    %515 = arith.addf %513, %514 : vector<8x32xf32>
    %516 = arith.negf %515 : vector<8x32xf32>
    %517 = math.exp %516 : vector<8x32xf32>
    %cst_216 = arith.constant 1.000000e+00 : f32
    %518 = vector.broadcast %cst_216 : f32 to vector<8x32xf32>
    %519 = arith.addf %518, %517 : vector<8x32xf32>
    %520 = arith.divf %518, %519 : vector<8x32xf32>
    %521 = arith.index_cast %c4_i32_209 : i32 to index
    %c0_217 = arith.constant 0 : index
    %c0_218 = arith.constant 0 : index
    %522 = vector.load %arg17[%521, %c0_217, %c0_218] : memref<8x8x32xf32, #tpu.memory_space<vmem>>, vector<1x8x32xf32>
    %523 = vector.shape_cast %522 : vector<1x8x32xf32> to vector<8x32xf32>
    %524 = vector.extract_strided_slice %500 {offsets = [0, 64], sizes = [8, 32], strides = [1, 1]} : vector<8x96xf32> to vector<8x32xf32>
    %525 = vector.broadcast %365 : vector<1x32xf32> to vector<8x32xf32>
    %526 = arith.addf %524, %525 : vector<8x32xf32>
    %527 = arith.mulf %510, %526 : vector<8x32xf32>
    %528 = arith.addf %523, %527 : vector<8x32xf32>
    %529 = math.tanh %528 : vector<8x32xf32>
    %530 = arith.subf %499, %529 : vector<8x32xf32>
    %531 = arith.mulf %520, %530 : vector<8x32xf32>
    %532 = arith.addf %529, %531 : vector<8x32xf32>
    %c5_i32_219 = arith.constant 5 : i32
    %cst_220 = arith.constant dense<0.000000e+00> : vector<8x96xf32>
    %533 = tpu.matmul %532, %364, %cst_220 {dimension_numbers = #tpu.dot_dimension_numbers<[1], [0], [0], [1], [0, 0, 1, 1], [], []>} : vector<8x32xf32>, vector<32x96xf32>, vector<8x96xf32> -> vector<8x96xf32>
    %534 = arith.index_cast %c5_i32_219 : i32 to index
    %c0_221 = arith.constant 0 : index
    %c0_222 = arith.constant 0 : index
    %535 = vector.load %arg15[%534, %c0_221, %c0_222] : memref<8x8x32xf32, #tpu.memory_space<vmem>>, vector<1x8x32xf32>
    %536 = vector.shape_cast %535 : vector<1x8x32xf32> to vector<8x32xf32>
    %537 = vector.extract_strided_slice %533 {offsets = [0, 0], sizes = [8, 32], strides = [1, 1]} : vector<8x96xf32> to vector<8x32xf32>
    %538 = arith.addf %536, %537 : vector<8x32xf32>
    %539 = arith.negf %538 : vector<8x32xf32>
    %540 = math.exp %539 : vector<8x32xf32>
    %cst_223 = arith.constant 1.000000e+00 : f32
    %541 = vector.broadcast %cst_223 : f32 to vector<8x32xf32>
    %542 = arith.addf %541, %540 : vector<8x32xf32>
    %543 = arith.divf %541, %542 : vector<8x32xf32>
    %544 = arith.index_cast %c5_i32_219 : i32 to index
    %c0_224 = arith.constant 0 : index
    %c0_225 = arith.constant 0 : index
    %545 = vector.load %arg16[%544, %c0_224, %c0_225] : memref<8x8x32xf32, #tpu.memory_space<vmem>>, vector<1x8x32xf32>
    %546 = vector.shape_cast %545 : vector<1x8x32xf32> to vector<8x32xf32>
    %547 = vector.extract_strided_slice %533 {offsets = [0, 32], sizes = [8, 32], strides = [1, 1]} : vector<8x96xf32> to vector<8x32xf32>
    %548 = arith.addf %546, %547 : vector<8x32xf32>
    %549 = arith.negf %548 : vector<8x32xf32>
    %550 = math.exp %549 : vector<8x32xf32>
    %cst_226 = arith.constant 1.000000e+00 : f32
    %551 = vector.broadcast %cst_226 : f32 to vector<8x32xf32>
    %552 = arith.addf %551, %550 : vector<8x32xf32>
    %553 = arith.divf %551, %552 : vector<8x32xf32>
    %554 = arith.index_cast %c5_i32_219 : i32 to index
    %c0_227 = arith.constant 0 : index
    %c0_228 = arith.constant 0 : index
    %555 = vector.load %arg17[%554, %c0_227, %c0_228] : memref<8x8x32xf32, #tpu.memory_space<vmem>>, vector<1x8x32xf32>
    %556 = vector.shape_cast %555 : vector<1x8x32xf32> to vector<8x32xf32>
    %557 = vector.extract_strided_slice %533 {offsets = [0, 64], sizes = [8, 32], strides = [1, 1]} : vector<8x96xf32> to vector<8x32xf32>
    %558 = vector.broadcast %365 : vector<1x32xf32> to vector<8x32xf32>
    %559 = arith.addf %557, %558 : vector<8x32xf32>
    %560 = arith.mulf %543, %559 : vector<8x32xf32>
    %561 = arith.addf %556, %560 : vector<8x32xf32>
    %562 = math.tanh %561 : vector<8x32xf32>
    %563 = arith.subf %532, %562 : vector<8x32xf32>
    %564 = arith.mulf %553, %563 : vector<8x32xf32>
    %565 = arith.addf %562, %564 : vector<8x32xf32>
    %c6_i32_229 = arith.constant 6 : i32
    %cst_230 = arith.constant dense<0.000000e+00> : vector<8x96xf32>
    %566 = tpu.matmul %565, %364, %cst_230 {dimension_numbers = #tpu.dot_dimension_numbers<[1], [0], [0], [1], [0, 0, 1, 1], [], []>} : vector<8x32xf32>, vector<32x96xf32>, vector<8x96xf32> -> vector<8x96xf32>
    %567 = arith.index_cast %c6_i32_229 : i32 to index
    %c0_231 = arith.constant 0 : index
    %c0_232 = arith.constant 0 : index
    %568 = vector.load %arg15[%567, %c0_231, %c0_232] : memref<8x8x32xf32, #tpu.memory_space<vmem>>, vector<1x8x32xf32>
    %569 = vector.shape_cast %568 : vector<1x8x32xf32> to vector<8x32xf32>
    %570 = vector.extract_strided_slice %566 {offsets = [0, 0], sizes = [8, 32], strides = [1, 1]} : vector<8x96xf32> to vector<8x32xf32>
    %571 = arith.addf %569, %570 : vector<8x32xf32>
    %572 = arith.negf %571 : vector<8x32xf32>
    %573 = math.exp %572 : vector<8x32xf32>
    %cst_233 = arith.constant 1.000000e+00 : f32
    %574 = vector.broadcast %cst_233 : f32 to vector<8x32xf32>
    %575 = arith.addf %574, %573 : vector<8x32xf32>
    %576 = arith.divf %574, %575 : vector<8x32xf32>
    %577 = arith.index_cast %c6_i32_229 : i32 to index
    %c0_234 = arith.constant 0 : index
    %c0_235 = arith.constant 0 : index
    %578 = vector.load %arg16[%577, %c0_234, %c0_235] : memref<8x8x32xf32, #tpu.memory_space<vmem>>, vector<1x8x32xf32>
    %579 = vector.shape_cast %578 : vector<1x8x32xf32> to vector<8x32xf32>
    %580 = vector.extract_strided_slice %566 {offsets = [0, 32], sizes = [8, 32], strides = [1, 1]} : vector<8x96xf32> to vector<8x32xf32>
    %581 = arith.addf %579, %580 : vector<8x32xf32>
    %582 = arith.negf %581 : vector<8x32xf32>
    %583 = math.exp %582 : vector<8x32xf32>
    %cst_236 = arith.constant 1.000000e+00 : f32
    %584 = vector.broadcast %cst_236 : f32 to vector<8x32xf32>
    %585 = arith.addf %584, %583 : vector<8x32xf32>
    %586 = arith.divf %584, %585 : vector<8x32xf32>
    %587 = arith.index_cast %c6_i32_229 : i32 to index
    %c0_237 = arith.constant 0 : index
    %c0_238 = arith.constant 0 : index
    %588 = vector.load %arg17[%587, %c0_237, %c0_238] : memref<8x8x32xf32, #tpu.memory_space<vmem>>, vector<1x8x32xf32>
    %589 = vector.shape_cast %588 : vector<1x8x32xf32> to vector<8x32xf32>
    %590 = vector.extract_strided_slice %566 {offsets = [0, 64], sizes = [8, 32], strides = [1, 1]} : vector<8x96xf32> to vector<8x32xf32>
    %591 = vector.broadcast %365 : vector<1x32xf32> to vector<8x32xf32>
    %592 = arith.addf %590, %591 : vector<8x32xf32>
    %593 = arith.mulf %576, %592 : vector<8x32xf32>
    %594 = arith.addf %589, %593 : vector<8x32xf32>
    %595 = math.tanh %594 : vector<8x32xf32>
    %596 = arith.subf %565, %595 : vector<8x32xf32>
    %597 = arith.mulf %586, %596 : vector<8x32xf32>
    %598 = arith.addf %595, %597 : vector<8x32xf32>
    %c7_i32_239 = arith.constant 7 : i32
    %cst_240 = arith.constant dense<0.000000e+00> : vector<8x96xf32>
    %599 = tpu.matmul %598, %364, %cst_240 {dimension_numbers = #tpu.dot_dimension_numbers<[1], [0], [0], [1], [0, 0, 1, 1], [], []>} : vector<8x32xf32>, vector<32x96xf32>, vector<8x96xf32> -> vector<8x96xf32>
    %600 = arith.index_cast %c7_i32_239 : i32 to index
    %c0_241 = arith.constant 0 : index
    %c0_242 = arith.constant 0 : index
    %601 = vector.load %arg15[%600, %c0_241, %c0_242] : memref<8x8x32xf32, #tpu.memory_space<vmem>>, vector<1x8x32xf32>
    %602 = vector.shape_cast %601 : vector<1x8x32xf32> to vector<8x32xf32>
    %603 = vector.extract_strided_slice %599 {offsets = [0, 0], sizes = [8, 32], strides = [1, 1]} : vector<8x96xf32> to vector<8x32xf32>
    %604 = arith.addf %602, %603 : vector<8x32xf32>
    %605 = arith.negf %604 : vector<8x32xf32>
    %606 = math.exp %605 : vector<8x32xf32>
    %cst_243 = arith.constant 1.000000e+00 : f32
    %607 = vector.broadcast %cst_243 : f32 to vector<8x32xf32>
    %608 = arith.addf %607, %606 : vector<8x32xf32>
    %609 = arith.divf %607, %608 : vector<8x32xf32>
    %610 = arith.index_cast %c7_i32_239 : i32 to index
    %c0_244 = arith.constant 0 : index
    %c0_245 = arith.constant 0 : index
    %611 = vector.load %arg16[%610, %c0_244, %c0_245] : memref<8x8x32xf32, #tpu.memory_space<vmem>>, vector<1x8x32xf32>
    %612 = vector.shape_cast %611 : vector<1x8x32xf32> to vector<8x32xf32>
    %613 = vector.extract_strided_slice %599 {offsets = [0, 32], sizes = [8, 32], strides = [1, 1]} : vector<8x96xf32> to vector<8x32xf32>
    %614 = arith.addf %612, %613 : vector<8x32xf32>
    %615 = arith.negf %614 : vector<8x32xf32>
    %616 = math.exp %615 : vector<8x32xf32>
    %cst_246 = arith.constant 1.000000e+00 : f32
    %617 = vector.broadcast %cst_246 : f32 to vector<8x32xf32>
    %618 = arith.addf %617, %616 : vector<8x32xf32>
    %619 = arith.divf %617, %618 : vector<8x32xf32>
    %620 = arith.index_cast %c7_i32_239 : i32 to index
    %c0_247 = arith.constant 0 : index
    %c0_248 = arith.constant 0 : index
    %621 = vector.load %arg17[%620, %c0_247, %c0_248] : memref<8x8x32xf32, #tpu.memory_space<vmem>>, vector<1x8x32xf32>
    %622 = vector.shape_cast %621 : vector<1x8x32xf32> to vector<8x32xf32>
    %623 = vector.extract_strided_slice %599 {offsets = [0, 64], sizes = [8, 32], strides = [1, 1]} : vector<8x96xf32> to vector<8x32xf32>
    %624 = vector.broadcast %365 : vector<1x32xf32> to vector<8x32xf32>
    %625 = arith.addf %623, %624 : vector<8x32xf32>
    %626 = arith.mulf %609, %625 : vector<8x32xf32>
    %627 = arith.addf %622, %626 : vector<8x32xf32>
    %628 = math.tanh %627 : vector<8x32xf32>
    %629 = arith.subf %598, %628 : vector<8x32xf32>
    %630 = arith.mulf %619, %629 : vector<8x32xf32>
    %631 = arith.addf %628, %630 : vector<8x32xf32>
    %c8_i32_249 = arith.constant 8 : i32
    %c1_250 = arith.constant 1 : index
    %c0_251 = arith.constant 0 : index
    %c0_252 = arith.constant 0 : index
    %632 = vector.load %arg13[%c1_250, %c0_251, %c0_252] : memref<2x8x32xf32, #tpu.memory_space<vmem>>, vector<1x8x32xf32>
    %633 = vector.shape_cast %632 : vector<1x8x32xf32> to vector<8x32xf32>
    %634 = vector.shape_cast %631 : vector<8x32xf32> to vector<1x8x32xf32>
    tpu.vector_store %arg13[%c1_250, %c0_251, %c0_252], %634 {strides = array<i32>} : memref<2x8x32xf32, #tpu.memory_space<vmem>>, vector<1x8x32xf32>,
    %c0_i32_253 = arith.constant 0 : i32
    %635 = arith.cmpi eq, %arg0, %c0_i32_253 : i32
    %636 = arith.extui %635 : i1 to i32
    %c0_i32_254 = arith.constant 0 : i32
    %637 = arith.cmpi ne, %636, %c0_i32_254 : i32
    scf.if %637 {
      %c1_255 = arith.constant 1 : index
      %c0_256 = arith.constant 0 : index
      %c0_257 = arith.constant 0 : index
      %638 = vector.load %arg13[%c1_255, %c0_256, %c0_257] : memref<2x8x32xf32, #tpu.memory_space<vmem>>, vector<1x8x32xf32>
      %639 = vector.shape_cast %638 : vector<1x8x32xf32> to vector<8x32xf32>
      %c0_258 = arith.constant 0 : index
      %c0_259 = arith.constant 0 : index
      %640 = vector.load %arg10[%c0_258, %c0_259] : memref<32x4xf32, #tpu.memory_space<vmem>>, vector<32x4xf32>
      %cst_260 = arith.constant dense<0.000000e+00> : vector<8x4xf32>
      %641 = tpu.matmul %639, %640, %cst_260 {dimension_numbers = #tpu.dot_dimension_numbers<[1], [0], [0], [1], [0, 0, 1, 1], [], []>} : vector<8x32xf32>, vector<32x4xf32>, vector<8x4xf32> -> vector<8x4xf32>
      %c0_261 = arith.constant 0 : index
      %c0_262 = arith.constant 0 : index
      %642 = vector.load %arg11[%c0_261, %c0_262] : memref<1x4xf32, #tpu.memory_space<vmem>>, vector<1x4xf32>
      %643 = vector.broadcast %642 : vector<1x4xf32> to vector<8x4xf32>
      %644 = arith.addf %641, %643 : vector<8x4xf32>
      %c0_263 = arith.constant 0 : index
      %c0_264 = arith.constant 0 : index
      %645 = vector.load %arg12[%c0_263, %c0_264] : memref<8x4xf32, #tpu.memory_space<vmem>>, vector<8x4xf32>
      tpu.vector_store %arg12[%c0_263, %c0_264], %644 {strides = array<i32>} : memref<8x4xf32, #tpu.memory_space<vmem>>, vector<8x4xf32>,
    } else {
    }
    return
  }
  func.func @transform_0(%arg0: i32) -> (i32, i32, i32) {
    %c0_i32 = arith.constant 0 : i32
    %c0_i32_0 = arith.constant 0 : i32
    %c0_i32_1 = arith.constant 0 : i32
    return %arg0, %c0_i32, %c0_i32_0 : i32, i32, i32
  }
  func.func @transform_1(%arg0: i32) -> (i32, i32, i32) {
    %c0_i32 = arith.constant 0 : i32
    %c0_i32_0 = arith.constant 0 : i32
    %c0_i32_1 = arith.constant 0 : i32
    %c0_i32_2 = arith.constant 0 : i32
    return %c0_i32, %c0_i32_0, %c0_i32_1 : i32, i32, i32
  }
  func.func @transform_2(%arg0: i32) -> (i32, i32) {
    %c0_i32 = arith.constant 0 : i32
    %c0_i32_0 = arith.constant 0 : i32
    %c0_i32_1 = arith.constant 0 : i32
    return %c0_i32, %c0_i32_0 : i32, i32
  }
  func.func @transform_3(%arg0: i32) -> (i32, i32, i32) {
    %c0_i32 = arith.constant 0 : i32
    %c0_i32_0 = arith.constant 0 : i32
    %c0_i32_1 = arith.constant 0 : i32
    %c0_i32_2 = arith.constant 0 : i32
    return %c0_i32, %c0_i32_0, %c0_i32_1 : i32, i32, i32
  }
  func.func @transform_4(%arg0: i32) -> (i32, i32) {
    %c0_i32 = arith.constant 0 : i32
    %c0_i32_0 = arith.constant 0 : i32
    %c0_i32_1 = arith.constant 0 : i32
    return %c0_i32, %c0_i32_0 : i32, i32
  }
  func.func @transform_5(%arg0: i32) -> (i32, i32, i32) {
    %c0_i32 = arith.constant 0 : i32
    %c0_i32_0 = arith.constant 0 : i32
    %c0_i32_1 = arith.constant 0 : i32
    %c0_i32_2 = arith.constant 0 : i32
    return %c0_i32, %c0_i32_0, %c0_i32_1 : i32, i32, i32
  }
  func.func @transform_6(%arg0: i32) -> (i32, i32) {
    %c0_i32 = arith.constant 0 : i32
    %c0_i32_0 = arith.constant 0 : i32
    %c0_i32_1 = arith.constant 0 : i32
    return %c0_i32, %c0_i32_0 : i32, i32
  }
  func.func @transform_7(%arg0: i32) -> (i32, i32, i32) {
    %c0_i32 = arith.constant 0 : i32
    %c0_i32_0 = arith.constant 0 : i32
    %c0_i32_1 = arith.constant 0 : i32
    %c0_i32_2 = arith.constant 0 : i32
    return %c0_i32, %c0_i32_0, %c0_i32_1 : i32, i32, i32
  }
  func.func @transform_8(%arg0: i32) -> (i32, i32) {
    %c0_i32 = arith.constant 0 : i32
    %c0_i32_0 = arith.constant 0 : i32
    %c0_i32_1 = arith.constant 0 : i32
    return %c0_i32, %c0_i32_0 : i32, i32
  }
  func.func @transform_9(%arg0: i32) -> (i32, i32) {
    %c0_i32 = arith.constant 0 : i32
    %c0_i32_0 = arith.constant 0 : i32
    %c0_i32_1 = arith.constant 0 : i32
    return %c0_i32, %c0_i32_0 : i32, i32
  }
  func.func @transform_10(%arg0: i32) -> (i32, i32) {
    %c0_i32 = arith.constant 0 : i32
    %c0_i32_0 = arith.constant 0 : i32
    %c0_i32_1 = arith.constant 0 : i32
    return %c0_i32, %c0_i32_0 : i32, i32
  }
  func.func @transform_11(%arg0: i32) -> (i32, i32) {
    %c0_i32 = arith.constant 0 : i32
    %c0_i32_0 = arith.constant 0 : i32
    %c0_i32_1 = arith.constant 0 : i32
    return %c0_i32, %c0_i32_0 : i32, i32
  }
}

</mosaic_0001>

<bundles_post_ra>
// kernel: tpu_custom_call.1
= control target key start
LH: loop header
LB: loop body
LE: loop exit
PB: predicated region body
PF: predicated region fallthrough
CT: control target
= control target key end

     0   :  { %16 = vsyncpa [#allocation8], 0  ;;  %s4176_s0 = inlined_call_operand.hbm [shape: f32[8,8,16], index: 0, kind: input, shape index: {}]   ;;  %s4177_s1 = inlined_call_operand.hbm [shape: f32[3,16,32], index: 1, kind: input, shape index: {}]   ;;  %s4178_s2 = inlined_call_operand.vmem [shape: f32[32,96], index: 2, kind: input, shape index: {}]   ;;  %s4179_s3 = inlined_call_operand.vmem [shape: f32[3,1,32], index: 3, kind: input, shape index: {}]   ;;  %s4180_s4 = inlined_call_operand.vmem [shape: f32[1,32], index: 4, kind: input, shape index: {}]   ;;  %s4181_s5 = inlined_call_operand.hbm [shape: f32[3,32,32], index: 5, kind: input, shape index: {}]   ;;  %s4182_s6 = inlined_call_operand.hbm [shape: f32[32,96], index: 6, kind: input, shape index: {}]   ;;  %s4183_s7 = inlined_call_operand.vmem [shape: f32[3,1,32], index: 7, kind: input, shape index: {}]   ;;  %s4184_s8 = inlined_call_operand.vmem [shape: f32[1,32], index: 8, kind: input, shape index: {}]   ;;  %s4185_s9 = inlined_call_operand.vmem [shape: f32[32,4], index: 9, kind: input, shape index: {}]   ;;  %s4186_s10 = inlined_call_operand.vmem [shape: f32[1,4], index: 10, kind: input, shape index: {}]   ;;  %s4187_s11 = inlined_call_operand.vmem [shape: f32[8,4], index: 11, kind: output, shape index: {}]  }
   0x1   :  { %17 = vsyncpa [#allocation10], 0 }
   0x2   :  { %18 = vsyncpa [#allocation13], 0  ;;  %s3572_s17 = smov [#allocation9]   ;;  %s3573_s19 = smov [#allocation7]  }
   0x3   :  { %s36_s18 = sshll.u32 %s3572_s17, 4  ;;  %s24_s20 = sshll.u32 %s3573_s19, 4  ;;  %s37_s18 = int_to_ptr.vmem [resolvable:$true] %s36_s18  ;;  %s25_s20 = int_to_ptr.vmem [resolvable:$true] %s24_s20 }
   0x4   :  { %s3494_s21 = scalar_lea.vmem %s37_s18, 768  ;;  %p3499_p1 = scmp.lt.s32.totalorder %s37_s18, %s37_s18 }
   0x5   :  { %p3495_p0 = scmp.ne.s32.totalorder %s37_s18, %s3494_s21  ;;  %p3500_p2 = scmp.lt.s32.totalorder %s3494_s21, %s3494_s21 }
   0x7   :  { %p3501_p3 = por %p3500_p2, %p3499_p1 }
   0x9   :  { %p3502_p4 = pnand %p3501_p3, %p3495_p0 }
   0xb   :  { %3505 = shalt.err (!%p3502_p4)
}
   0xc   :  { %s3574_s22 = smov 128   ;;  %s3575_s23 = smov 8  }
   0xd   :  { %42 = dma.hbm_to_vmem [thread:$0]  %s4177_s1, 768, %s37_s18, [#allocation10], %s3574_s22, %s3574_s22, %s3575_s23  }
   0xe   :  { %s3514_s26 = scalar_lea.vmem %s25_s20, 1024  ;;  %p3519_p6 = scmp.lt.s32.totalorder %s25_s20, %s25_s20 }
   0xf   :  { %p3515_p5 = scmp.ne.s32.totalorder %s25_s20, %s3514_s26  ;;  %p3520_p7 = scmp.lt.s32.totalorder %s3514_s26, %s3514_s26 }
  0x11   :  { %p3521_p8 = por %p3520_p7, %p3519_p6 }
  0x13   :  { %p3522_p9 = pnand %p3521_p8, %p3515_p5 }
  0x15   :  { %3525 = shalt.err (!%p3522_p9)
}
  0x16   :  { %30 = dma.hbm_to_vmem [thread:$0]  %s4176_s0, 1024, %s25_s20, [#allocation8], %s3574_s22, %s3574_s22, %s3575_s23  }
  0x17   :  { %s3576_s29 = smov [#allocation11]   ;;  %s3577_s12 = smov [#allocation12]  }
  0x18   :  { %s54_s30 = sshll.u32 %s3576_s29, 4  ;;  %s66_s13 = sshll.u32 %s3577_s12, 4  ;;  %s55_s30 = int_to_ptr.vmem [resolvable:$true] %s54_s30  ;;  %s67_s13 = int_to_ptr.vmem [resolvable:$true] %s66_s13 }
  0x19   :  { %s3534_s1 = scalar_lea.vmem %s55_s30, 1536  ;;  %p3539_p11 = scmp.lt.s32.totalorder %s55_s30, %s55_s30 }
  0x1a   :  { %p3535_p10 = scmp.ne.s32.totalorder %s55_s30, %s3534_s1  ;;  %p3540_p12 = scmp.lt.s32.totalorder %s3534_s1, %s3534_s1 }
  0x1c   :  { %p3541_p13 = por %p3540_p12, %p3539_p11 }
  0x1e   :  { %p3542_p0 = pnand %p3541_p13, %p3535_p10 }
  0x20   :  { %3545 = shalt.err (!%p3542_p0)
}
  0x21   :  { %60 = dma.hbm_to_vmem [thread:$0]  %s4181_s5, 1536, %s55_s30, [#allocation10], %s3574_s22, %s3574_s22, %s3575_s23  }
  0x22   :  { %s3554_s0 = scalar_lea.vmem %s67_s13, 512  ;;  %p3559_p2 = scmp.lt.s32.totalorder %s67_s13, %s67_s13 }
  0x23   :  { %p3555_p1 = scmp.ne.s32.totalorder %s67_s13, %s3554_s0  ;;  %p3560_p3 = scmp.lt.s32.totalorder %s3554_s0, %s3554_s0 }
  0x25   :  { %p3561_p4 = por %p3560_p3, %p3559_p2 }
  0x27   :  { %p3562_p5 = pnand %p3561_p4, %p3555_p1 }
  0x29   :  { %3565 = shalt.err (!%p3562_p5)
}
  0x2a   :  { %72 = dma.hbm_to_vmem [thread:$0]  %s4182_s6, 512, %s67_s13, [#allocation13], %s3574_s22, %s3574_s22, %s3575_s23  }
  0x2b   :  { %3566 = dma.done.wait [#allocation8], 1024  }
  0x2c   :  { %3567 = vsyncadd [#allocation8], 4294966272 }
  0x2d   :  { %3568 = dma.done.wait [#allocation10], 2304  }
  0x2e   :  { %3569 = vsyncadd [#allocation10], 4294964992 }
  0x2f   :  { %3570 = dma.done.wait [#allocation13], 512  }
  0x30   :  { %3571 = vsyncadd [#allocation13], 4294966784  ;;  %vm97_vm0 = vcmask 261120   ;;  %v3578_v0 = vmov 0.0   ;;  %vm117_vm1 = vcmask 130048   ;;  %v109_v1 = vld [vmem:[#allocation9 + $0x8] sm:$0xff] }
  0x31   :  { %98 = vst.msk [vmem:[#allocation2] sm:$0xff] %vm97_vm0, %v3578_v0  ;;  %99 = vst.msk [vmem:[#allocation2 + $0x8] sm:$0xff] %vm97_vm0, %v3578_v0  ;;  %v108_v2 = vld [vmem:[#allocation9] sm:$0xff]  ;;  %v3670_v3 = vld [vmem:[#allocation7 + $0x30] sm:$0xff]  ;;  %3312 = vmatprep.subr.mxu1 %v109_v1  ;;  %3017 = vmatprep.subr.mxu0 %v109_v1  ;;  %s3579_s24 = smov 64   ;;  %vm3580_vm2 = vmmov 0  }
  0x32   :  { %3030 = vmatprep.mubr.msk.f32.mxu1 %vm117_vm1, %v3670_v3  ;;  %3314 = vmatpush3.msra.mxu1 %v109_v1  ;;  %v3674_v4 = vld [vmem:[#allocation7 + $0x38] sm:$0xff]  ;;  %v100_v6 = vld [vmem:[#allocation7] sm:$0xff]  ;;  %v257_v7 = vld [vmem:[#allocation9 + $0x10] sm:$0xff]  ;;  %s3581_s12 = smov 96   ;;  %vm2747_vm3 = vcmask 31744  }
  0x33   :  { %v258_v5 = vld [vmem:[#allocation9 + $0x18] sm:$0xff]  ;;  %3313 = vmatprep.subr.mxu1 %v108_v2  ;;  %3018 = vmatpush3.msra.mxu0 %v109_v1  ;;  %v101_v8 = vld [vmem:[#allocation7 + $0x8] sm:$0xff]  ;;  %v102_v10 = vld [vmem:[#allocation7 + $0x10] sm:$0xff] }
  0x34   :  { %3315 = vmatpush3.msra.mxu1 %v108_v2  ;;  %3019 = vmatprep.subr.mxu0 %v108_v2  ;;  %v3682_v9 = vld [vmem:[%s4178_s2 + $0x18] sm:$0xff]  ;;  %v3690_v11 = vld [vmem:[%s4178_s2 + $0x10] sm:$0xff]  ;;  %v2788_v12 = vld [vmem:[%s4180_s4] ss:$0 sm:$0xff] }
  0x35   :  { %3031 = vmatmul.mubr.msk.f32.vlgmr.msra.gmra.mxu1 %vm117_vm1, %v3674_v4  ;;  %3033 = vmatprep.subr.mxu1 %v258_v5  ;;  %v103_v13 = vld [vmem:[#allocation7 + $0x18] sm:$0xff]  ;;  %v104_v14 = vld [vmem:[#allocation7 + $0x20] sm:$0xff]  ;;  %v3711_v16 = vld [vmem:[%s4178_s2] sm:$0xff] }
  0x36   :  { %3034 = vmatpush3.msra.mxu1 %v258_v5  ;;  %3037 = vmatprep.mubr.msk.f32.mxu1 %vm117_vm1, %v100_v6  ;;  %v3702_v15 = vld [vmem:[%s4178_s2 + $0x8] sm:$0xff]  ;;  %v105_v17 = vld [vmem:[#allocation7 + $0x28] sm:$0xff]  ;;  %v381_v19 = vld [vmem:[#allocation9 + $0x20] sm:$0xff] }
  0x37   :  { %3035 = vmatprep.subr.mxu1 %v257_v7  ;;  %3020 = vmatpush3.msra.mxu0 %v108_v2  ;;  %v382_v18 = vld [vmem:[#allocation9 + $0x28] sm:$0xff]  ;;  %v2756_v21 = vld [vmem:[%s4179_s3] ss:$0 sm:$0xff]  ;;  %v2766_v25 = vld [vmem:[%s4179_s3 + $0x1] ss:$0 sm:$0xff] }
  0x38   :  { %3036 = vmatpush3.msra.mxu1 %v257_v7  ;;  %3021 = vmatprep.mubr.msk.f32.mxu0 %vm117_vm1, %v100_v6  ;;  %v3729_v20 = vld [vmem:[#allocation2] sm:$0xff] }
  0x39   :  { %3038 = vmatmul.mubr.msk.f32.vlgmr.msra.gmra.mxu1 %vm117_vm1, %v101_v8  ;;  %3065 = vmatprep.subr.mxu1 %v3578_v0  ;;  %v3789_v57 = vld [vmem:[%s4179_s3 + $0x2] ss:$0 sm:$0xff] }
  0x3a   :  { %3066 = vmatpush3.msra.mxu1 %v3682_v9  ;;  %3040 = vmatprep.mubr.msk.f32.mxu1 %vm117_vm1, %v102_v10 }
  0x3b   :  { %3067 = vmatprep.subr.mxu1 %v3578_v0  ;;  %3022 = vmatmul.mubr.msk.f32.vlgmr.msra.gmra.mxu0 %vm117_vm1, %v101_v8 }
  0x3c   :  { %3068 = vmatpush3.msra.mxu1 %v3690_v11  ;;  %609 = vrot.lane.b32.xlu0 %v2788_v12, %s3579_s24 }
  0x3d   :  { %3041 = vmatmul.mubr.msk.f32.gmra.mxu1 %vm117_vm1, %v103_v13  ;;  %3069 = vmatprep.subr.mxu1 %v3578_v0 }
  0x3e   :  { %3043 = vmatprep.mubr.msk.f32.mxu1 %vm117_vm1, %v104_v14  ;;  %3070 = vmatpush3.msra.mxu1 %v3702_v15 }
  0x3f   :  { %3071 = vmatprep.subr.mxu1 %v3578_v0  ;;  %3024 = vmatprep.mubr.msk.f32.mxu0 %vm117_vm1, %v102_v10 }
  0x40   :  { %3072 = vmatpush3.msra.mxu1 %v3711_v16  ;;  %3025 = vmatmul.mubr.msk.f32.gmra.mxu0 %vm117_vm1, %v103_v13 }
  0x41   :  { %3044 = vmatmul.mubr.msk.f32.gmra.mxu1 %vm117_vm1, %v105_v17  ;;  %3027 = vmatprep.mubr.msk.f32.mxu0 %vm117_vm1, %v104_v14 }
  0x42   :  { %3046 = vmatprep.mubr.msk.f32.mxu1 %vm117_vm1, %v3670_v3  ;;  %3049 = vmatprep.subr.mxu0 %v382_v18 }
  0x43   :  { %3050 = vmatpush3.msra.mxu0 %v382_v18  ;;  %3076 = vmatprep.subr.mxu1 %v3578_v0 }
  0x44   :  { %3028 = vmatmul.mubr.msk.f32.gmra.mxu0 %vm117_vm1, %v105_v17  ;;  %3051 = vmatprep.subr.mxu0 %v381_v19 }
  0x45   :  { %3047 = vmatmul.mubr.msk.f32.gmra.mxu1 %vm117_vm1, %v3674_v4  ;;  %3052 = vmatpush3.msra.mxu0 %v381_v19 }
  0x46   :  { %3073 = vmatprep.mubr.msk.f32.mxu1 %vm3580_vm2, %v3578_v0  ;;  %3053 = vmatprep.mubr.msk.f32.mxu0 %vm117_vm1, %v100_v6 }
  0x47   :  { %3087 = vmatprep.subr.mxu0 %v3578_v0 }
  0x48   :  { %3054 = vmatmul.mubr.msk.f32.vlgmr.msra.gmra.mxu0 %vm117_vm1, %v101_v8 }
  0x49   :  { %3074 = vmatmul.mubr.msk.f32.vlgmr.msra.gmra.mxu1 %vm97_vm0, %v3729_v20  ;;  %3088 = vmatpush3.msra.mxu0 %v3682_v9 }
  0x4a   :  { %3077 = vmatpush3.msra.mxu1 %v3682_v9  ;;  %3084 = vmatprep.mubr.msk.f32.mxu1 %vm3580_vm2, %v3578_v0 }
  0x4b   :  { %3078 = vmatprep.subr.mxu1 %v3578_v0  ;;  %3056 = vmatprep.mubr.msk.f32.mxu0 %vm117_vm1, %v102_v10 }
  0x4c   :  { %3079 = vmatpush3.msra.mxu1 %v3690_v11  ;;  %3057 = vmatmul.mubr.msk.f32.gmra.mxu0 %vm117_vm1, %v103_v13 }
  0x4d   :  { %3080 = vmatprep.subr.mxu1 %v3578_v0  ;;  %3089 = vmatprep.subr.mxu0 %v3578_v0 }
  0x4e   :  { %3081 = vmatpush3.msra.mxu1 %v3702_v15  ;;  %3090 = vmatpush3.msra.mxu0 %v3690_v11 }
  0x4f   :  { %3082 = vmatprep.subr.mxu1 %v3578_v0  ;;  %3059 = vmatprep.mubr.msk.f32.mxu0 %vm117_vm1, %v104_v14 }
  0x50   :  { %3083 = vmatpush3.msra.mxu1 %v3711_v16  ;;  %3060 = vmatmul.mubr.msk.f32.gmra.mxu0 %vm117_vm1, %v105_v17 }
  0x51   :  { %3091 = vmatprep.subr.mxu0 %v3578_v0  ;;  %3062 = vmatprep.mubr.msk.f32.mxu0 %vm117_vm1, %v3670_v3 }
  0x52   :  { %3092 = vmatpush3.msra.mxu0 %v3702_v15  ;;  %3098 = vmatprep.subr.mxu1 %v3578_v0 }
  0x53   :  { %3093 = vmatprep.subr.mxu0 %v3578_v0 }
  0x54   :  { %3063 = vmatmul.mubr.msk.f32.gmra.mxu0 %vm117_vm1, %v3674_v4 }
  0x55   :  { %3094 = vmatpush3.msra.mxu0 %v3711_v16  ;;  %3095 = vmatprep.mubr.msk.f32.mxu0 %vm3580_vm2, %v3578_v0 }
  0x56   :  { %3109 = vmatprep.subr.mxu0 %v3578_v0 }
  0xae   :  { %v3782_v53 = vpop.permute.xlu0 %609 }
  0xf5   :  { %v3032_v22 = vpop.f32.mrf.mxu1 }
  0xf6   :  { %v244_v23 = vadd.f32 %v3032_v22, %v2756_v21 }
  0xf7   :  { %v238_v24 = vpop.f32.mrf.mxu1 }
  0xf8   :  { %255 = vst.msk [vmem:[#allocation4 + $0x38] sm:$0xff] %vm97_vm0, %v244_v23  ;;  %v239_v26 = vadd.f32 %v2756_v21, %v238_v24 }
  0xf9   :  { %v3039_v27 = vpop.f32.mrf.mxu1 }
  0xfa   :  { %254 = vst.msk [vmem:[#allocation4 + $0x30] sm:$0xff] %vm97_vm0, %v239_v26  ;;  %v339_v28 = vadd.f32 %v3039_v27, %v2766_v25 }
  0xfb   :  { %v333_v29 = vpop.f32.mrf.mxu1  ;;  %v3023_v30 = vpop.f32.mrf.mxu0 }
  0xfc   :  { %373 = vst.msk [vmem:[#allocation5 + $0x8] sm:$0xff] %vm97_vm0, %v339_v28  ;;  %v334_v31 = vadd.f32 %v2766_v25, %v333_v29  ;;  %v214_v32 = vadd.f32 %v3023_v30, %v2756_v21 }
  0xfd   :  { %v3042_v33 = vpop.f32.mrf.mxu1  ;;  %v208_v34 = vpop.f32.mrf.mxu0 }
  0xfe   :  { %372 = vst.msk [vmem:[#allocation5] sm:$0xff] %vm97_vm0, %v334_v31  ;;  %v349_v35 = vadd.f32 %v3042_v33, %v2766_v25  ;;  %249 = vst.msk [vmem:[#allocation4 + $0x8] sm:$0xff] %vm97_vm0, %v214_v32  ;;  %v209_v36 = vadd.f32 %v2756_v21, %v208_v34 }
  0xff   :  { %v343_v37 = vpop.f32.mrf.mxu1 }
 0x100   :  { %375 = vst.msk [vmem:[#allocation5 + $0x18] sm:$0xff] %vm97_vm0, %v349_v35  ;;  %v344_v38 = vadd.f32 %v2766_v25, %v343_v37  ;;  %248 = vst.msk [vmem:[#allocation4] sm:$0xff] %vm97_vm0, %v209_v36  ;;  %v3026_v39 = vpop.f32.mrf.mxu0 }
 0x101   :  { %v3045_v40 = vpop.f32.mrf.mxu1  ;;  %v224_v41 = vadd.f32 %v3026_v39, %v2756_v21 }
 0x102   :  { %374 = vst.msk [vmem:[#allocation5 + $0x10] sm:$0xff] %vm97_vm0, %v344_v38  ;;  %v359_v42 = vadd.f32 %v3045_v40, %v2766_v25  ;;  %v218_v43 = vpop.f32.mrf.mxu0 }
 0x103   :  { %v353_v44 = vpop.f32.mrf.mxu1  ;;  %251 = vst.msk [vmem:[#allocation4 + $0x18] sm:$0xff] %vm97_vm0, %v224_v41  ;;  %v219_v45 = vadd.f32 %v2756_v21, %v218_v43 }
 0x104   :  { %377 = vst.msk [vmem:[#allocation5 + $0x28] sm:$0xff] %vm97_vm0, %v359_v42  ;;  %v354_v46 = vadd.f32 %v2766_v25, %v353_v44  ;;  %v3029_v47 = vpop.f32.mrf.mxu0 }
 0x105   :  { %v3048_v48 = vpop.f32.mrf.mxu1  ;;  %250 = vst.msk [vmem:[#allocation4 + $0x10] sm:$0xff] %vm97_vm0, %v219_v45  ;;  %v234_v49 = vadd.f32 %v3029_v47, %v2756_v21  ;;  %v591_v6 = vld [vmem:[#allocation5] sm:$0xff]  ;;  %v698_v41 = vld [vmem:[#allocation4 + $0x8] sm:$0xff] }
 0x106   :  { %376 = vst.msk [vmem:[#allocation5 + $0x20] sm:$0xff] %vm97_vm0, %v354_v46  ;;  %v369_v50 = vadd.f32 %v3048_v48, %v2766_v25  ;;  %v228_v51 = vpop.f32.mrf.mxu0  ;;  %v707_v46 = vld [vmem:[#allocation5 + $0x8] sm:$0xff] }
 0x107   :  { %v363_v52 = vpop.f32.mrf.mxu1  ;;  %253 = vst.msk [vmem:[#allocation4 + $0x28] sm:$0xff] %vm97_vm0, %v234_v49  ;;  %v229_v54 = vadd.f32 %v2756_v21, %v228_v51  ;;  %v583_v1 = vld [vmem:[#allocation4] sm:$0xff] }
 0x108   :  { %379 = vst.msk [vmem:[#allocation5 + $0x38] sm:$0xff] %vm97_vm0, %v369_v50  ;;  %v364_v55 = vadd.f32 %v2766_v25, %v363_v52  ;;  %v3055_v56 = vpop.f32.mrf.mxu0 }
 0x109   :  { %v579_v58 = vpop.f32.mrf.mxu1  ;;  %252 = vst.msk [vmem:[#allocation4 + $0x20] sm:$0xff] %vm97_vm0, %v229_v54  ;;  %v463_v59 = vadd.f32 %v3055_v56, %v3789_v57 }
 0x10a   :  { %378 = vst.msk [vmem:[#allocation5 + $0x30] sm:$0xff] %vm97_vm0, %v364_v55  ;;  %593 = vrot.lane.b32.xlu0 %v579_v58, %s3581_s12  ;;  %v612_v60 = vadd.f32 %v3782_v53, %v579_v58  ;;  %v457_v61 = vpop.f32.mrf.mxu0  ;;  %v584_v2 = vadd.f32 %v583_v1, %v579_v58 }
 0x10b   :  { %v3075_v62 = vpop.f32.mrf.mxu1  ;;  %497 = vst.msk [vmem:[#allocation6 + $0x8] sm:$0xff] %vm97_vm0, %v463_v59  ;;  %v458_v63 = vadd.f32 %v3789_v57, %v457_v61 }
 0x10c   :  { %614 = vrot.lane.b32.xlu1 %v612_v60, %s3579_s24  ;;  %v2786_v3 = vmul.f32 -1.442695, %v584_v2  ;;  %v3058_v29 = vpop.f32.mrf.mxu0 }
 0x10d   :  { %496 = vst.msk [vmem:[#allocation6] sm:$0xff] %vm97_vm0, %v458_v63  ;;  %v473_v30 = vadd.f32 %v3058_v29, %v3789_v57 }
 0x10e   :  { %3326 = vpow2.f32 %v2786_v3  ;;  %v467_v31 = vpop.f32.mrf.mxu0  ;;  %v808_v3 = vld [vmem:[#allocation4 + $0x10] sm:$0xff] }
 0x10f   :  { %499 = vst.msk [vmem:[#allocation6 + $0x18] sm:$0xff] %vm97_vm0, %v473_v30  ;;  %v468_v32 = vadd.f32 %v3789_v57, %v467_v31  ;;  %v918_v31 = vld [vmem:[#allocation4 + $0x18] sm:$0xff] }
 0x110   :  { %v3061_v33 = vpop.f32.mrf.mxu0 }
 0x111   :  { %498 = vst.msk [vmem:[#allocation6 + $0x10] sm:$0xff] %vm97_vm0, %v468_v32  ;;  %v483_v34 = vadd.f32 %v3061_v33, %v3789_v57 }
 0x112   :  { %v477_v35 = vpop.f32.mrf.mxu0  ;;  %v720_v54 = vld [vmem:[#allocation6 + $0x8] sm:$0xff] }
 0x113   :  { %501 = vst.msk [vmem:[#allocation6 + $0x28] sm:$0xff] %vm97_vm0, %v483_v34  ;;  %v478_v36 = vadd.f32 %v3789_v57, %v477_v35 }
 0x114   :  { %v603_v17 = vld [vmem:[#allocation6] sm:$0xff]  ;;  %v3064_v37 = vpop.f32.mrf.mxu0 }
 0x115   :  { %500 = vst.msk [vmem:[#allocation6 + $0x20] sm:$0xff] %vm97_vm0, %v478_v36  ;;  %v493_v38 = vadd.f32 %v3064_v37, %v3789_v57  ;;  %v927_v36 = vld [vmem:[#allocation5 + $0x18] sm:$0xff] }
 0x116   :  { %v487_v39 = vpop.f32.mrf.mxu0 }
 0x117   :  { %503 = vst.msk [vmem:[#allocation6 + $0x38] sm:$0xff] %vm97_vm0, %v493_v38  ;;  %v488_v40 = vadd.f32 %v3789_v57, %v487_v39 }
 0x119   :  { %502 = vst.msk [vmem:[#allocation6 + $0x30] sm:$0xff] %vm97_vm0, %v488_v40 }
 0x11b   :  { %v3327_v4 = vpop.eup %3326 }
 0x11c   :  { %v588_v5 = vadd.f32 1.0, %v3327_v4 }
 0x11e   :  { %3328 = vrcp.f32 %v588_v5 }
 0x12b   :  { %v3329_v13 = vpop.eup %3328 }
 0x17c   :  { %v594_v7 = vpop.permute.xlu0 %593 }
 0x17d   :  { %v596_v8 = vadd.f32 %v594_v7, %v591_v6 }
 0x17e   :  { %v615_v12 = vpop.permute.xlu1 %614 }
 0x17f   :  { %v2787_v10 = vmul.f32 -1.442695, %v596_v8  ;;  %v617_v14 = vmul.f32 %v3329_v13, %v615_v12  ;;  %v817_v8 = vld [vmem:[#allocation5 + $0x10] sm:$0xff] }
 0x181   :  { %3330 = vpow2.f32 %v2787_v10  ;;  %v618_v18 = vadd.f32 %v617_v14, %v603_v17 }
 0x183   :  { %3332 = vtanh.f32 %v618_v18 }
 0x18e   :  { %v3331_v19 = vpop.eup %3330 }
 0x18f   :  { %v600_v21 = vadd.f32 1.0, %v3331_v19  ;;  %v830_v19 = vld [vmem:[#allocation6 + $0x10] sm:$0xff] }
 0x190   :  { %v3333_v22 = vpop.eup %3332 }
 0x191   :  { %3334 = vrcp.f32 %v600_v21  ;;  %v620_v23 = vsub.f32 %v3729_v20, %v3333_v22 }
 0x19e   :  { %v3335_v24 = vpop.eup %3334 }
 0x19f   :  { %v621_v25 = vmul.f32 %v3335_v24, %v620_v23 }
 0x1a1   :  { %v622_v26 = vadd.f32 %v3333_v22, %v621_v25 }
 0x1a3   :  { %623 = vst.msk [vmem:[#allocation3] sm:$0xff] %vm97_vm0, %v622_v26  ;;  %3085 = vmatmul.mubr.msk.f32.vlgmr.msra.gmra.mxu1 %vm97_vm0, %v622_v26 }
 0x1a4   :  { %3099 = vmatpush3.msra.mxu1 %v3682_v9  ;;  %3106 = vmatprep.mubr.msk.f32.mxu1 %vm3580_vm2, %v3578_v0 }
 0x1a5   :  { %3100 = vmatprep.subr.mxu1 %v3578_v0 }
 0x1a6   :  { %3101 = vmatpush3.msra.mxu1 %v3690_v11 }
 0x1a7   :  { %3102 = vmatprep.subr.mxu1 %v3578_v0 }
 0x1a8   :  { %3103 = vmatpush3.msra.mxu1 %v3702_v15 }
 0x1a9   :  { %3104 = vmatprep.subr.mxu1 %v3578_v0 }
 0x1aa   :  { %3105 = vmatpush3.msra.mxu1 %v3711_v16 }
 0x1ab   :  { %3120 = vmatprep.subr.mxu1 %v3578_v0 }
 0x263   :  { %v693_v20 = vpop.f32.mrf.mxu1 }
 0x264   :  { %v721_v27 = vadd.f32 %v693_v20, %v3782_v53  ;;  %709 = vrot.lane.b32.xlu1 %v693_v20, %s3581_s12  ;;  %v699_v42 = vadd.f32 %v698_v41, %v693_v20 }
 0x265   :  { %v3086_v28 = vpop.f32.mrf.mxu1 }
 0x266   :  { %723 = vrot.lane.b32.xlu0 %v721_v27, %s3579_s24  ;;  %v2790_v43 = vmul.f32 -1.442695, %v699_v42 }
 0x268   :  { %3336 = vpow2.f32 %v2790_v43  ;;  %v940_v43 = vld [vmem:[#allocation6 + $0x18] sm:$0xff] }
 0x275   :  { %v3337_v44 = vpop.eup %3336 }
 0x276   :  { %v703_v45 = vadd.f32 1.0, %v3337_v44 }
 0x278   :  { %3338 = vrcp.f32 %v703_v45 }
 0x285   :  { %v3339_v51 = vpop.eup %3338 }
 0x2d6   :  { %v710_v47 = vpop.permute.xlu1 %709 }
 0x2d7   :  { %v712_v48 = vadd.f32 %v710_v47, %v707_v46 }
 0x2d8   :  { %v724_v50 = vpop.permute.xlu0 %723 }
 0x2d9   :  { %v2791_v49 = vmul.f32 -1.442695, %v712_v48  ;;  %v726_v52 = vmul.f32 %v3339_v51, %v724_v50 }
 0x2db   :  { %3340 = vpow2.f32 %v2791_v49  ;;  %v727_v55 = vadd.f32 %v726_v52, %v720_v54 }
 0x2dd   :  { %3342 = vtanh.f32 %v727_v55 }
 0x2e8   :  { %v3341_v56 = vpop.eup %3340 }
 0x2e9   :  { %v716_v57 = vadd.f32 1.0, %v3341_v56  ;;  %v1028_v56 = vld [vmem:[#allocation4 + $0x20] sm:$0xff] }
 0x2ea   :  { %v3343_v58 = vpop.eup %3342 }
 0x2eb   :  { %3344 = vrcp.f32 %v716_v57  ;;  %v729_v59 = vsub.f32 %v622_v26, %v3343_v58 }
 0x2f8   :  { %v3345_v60 = vpop.eup %3344 }
 0x2f9   :  { %v730_v61 = vmul.f32 %v3345_v60, %v729_v59 }
 0x2fb   :  { %v731_v62 = vadd.f32 %v3343_v58, %v730_v61  ;;  %v1037_v61 = vld [vmem:[#allocation5 + $0x20] sm:$0xff] }
 0x2fd   :  { %733 = vst.msk [vmem:[#allocation3 + $0x8] sm:$0xff] %vm97_vm0, %v731_v62  ;;  %3096 = vmatmul.mubr.msk.f32.vlgmr.msra.gmra.mxu0 %vm97_vm0, %v731_v62 }
 0x2fe   :  { %3110 = vmatpush3.msra.mxu0 %v3682_v9  ;;  %3117 = vmatprep.mubr.msk.f32.mxu0 %vm3580_vm2, %v3578_v0 }
 0x2ff   :  { %3111 = vmatprep.subr.mxu0 %v3578_v0 }
 0x300   :  { %3112 = vmatpush3.msra.mxu0 %v3690_v11 }
 0x301   :  { %3113 = vmatprep.subr.mxu0 %v3578_v0 }
 0x302   :  { %3114 = vmatpush3.msra.mxu0 %v3702_v15 }
 0x303   :  { %3115 = vmatprep.subr.mxu0 %v3578_v0 }
 0x304   :  { %3116 = vmatpush3.msra.mxu0 %v3711_v16 }
 0x305   :  { %3131 = vmatprep.subr.mxu0 %v3578_v0 }
 0x3bd   :  { %v803_v63 = vpop.f32.mrf.mxu0 }
 0x3be   :  { %v831_v1 = vadd.f32 %v803_v63, %v3782_v53  ;;  %819 = vrot.lane.b32.xlu1 %v803_v63, %s3581_s12  ;;  %v809_v4 = vadd.f32 %v808_v3, %v803_v63 }
 0x3bf   :  { %v3097_v2 = vpop.f32.mrf.mxu0 }
 0x3c0   :  { %833 = vrot.lane.b32.xlu0 %v831_v1, %s3579_s24  ;;  %v2793_v5 = vmul.f32 -1.442695, %v809_v4 }
 0x3c2   :  { %3346 = vpow2.f32 %v2793_v5  ;;  %v1050_v5 = vld [vmem:[#allocation6 + $0x20] sm:$0xff] }
 0x3cf   :  { %v3347_v6 = vpop.eup %3346 }
 0x3d0   :  { %v813_v7 = vadd.f32 1.0, %v3347_v6 }
 0x3d2   :  { %3348 = vrcp.f32 %v813_v7 }
 0x3df   :  { %v3349_v17 = vpop.eup %3348 }
 0x430   :  { %v820_v10 = vpop.permute.xlu1 %819 }
 0x431   :  { %v822_v12 = vadd.f32 %v820_v10, %v817_v8 }
 0x432   :  { %v834_v14 = vpop.permute.xlu0 %833 }
 0x433   :  { %v2794_v13 = vmul.f32 -1.442695, %v822_v12  ;;  %v836_v18 = vmul.f32 %v3349_v17, %v834_v14 }
 0x435   :  { %3350 = vpow2.f32 %v2794_v13  ;;  %v837_v21 = vadd.f32 %v836_v18, %v830_v19 }
 0x437   :  { %3352 = vtanh.f32 %v837_v21  ;;  %v1406_v21 = vld [vmem:[#allocation11 + $0x18] sm:$0xff] }
 0x442   :  { %v3351_v22 = vpop.eup %3350 }
 0x443   :  { %v826_v23 = vadd.f32 1.0, %v3351_v22  ;;  %v1138_v22 = vld [vmem:[#allocation4 + $0x28] sm:$0xff] }
 0x444   :  { %v3353_v24 = vpop.eup %3352 }
 0x445   :  { %3354 = vrcp.f32 %v826_v23  ;;  %v839_v25 = vsub.f32 %v731_v62, %v3353_v24 }
 0x452   :  { %v3355_v26 = vpop.eup %3354 }
 0x453   :  { %v840_v20 = vmul.f32 %v3355_v26, %v839_v25  ;;  %v1147_v25 = vld [vmem:[#allocation5 + $0x28] sm:$0xff] }
 0x455   :  { %v841_v27 = vadd.f32 %v3353_v24, %v840_v20 }
 0x457   :  { %843 = vst.msk [vmem:[#allocation3 + $0x10] sm:$0xff] %vm97_vm0, %v841_v27  ;;  %3107 = vmatmul.mubr.msk.f32.vlgmr.msra.gmra.mxu1 %vm97_vm0, %v841_v27 }
 0x458   :  { %3121 = vmatpush3.msra.mxu1 %v3682_v9  ;;  %3128 = vmatprep.mubr.msk.f32.mxu1 %vm3580_vm2, %v3578_v0 }
 0x459   :  { %3122 = vmatprep.subr.mxu1 %v3578_v0 }
 0x45a   :  { %3123 = vmatpush3.msra.mxu1 %v3690_v11 }
 0x45b   :  { %3124 = vmatprep.subr.mxu1 %v3578_v0 }
 0x45c   :  { %3125 = vmatpush3.msra.mxu1 %v3702_v15 }
 0x45d   :  { %3126 = vmatprep.subr.mxu1 %v3578_v0 }
 0x45e   :  { %3127 = vmatpush3.msra.mxu1 %v3711_v16 }
 0x45f   :  { %3142 = vmatprep.subr.mxu1 %v3578_v0 }
 0x517   :  { %v913_v28 = vpop.f32.mrf.mxu1 }
 0x518   :  { %v941_v29 = vadd.f32 %v913_v28, %v3782_v53  ;;  %929 = vrot.lane.b32.xlu1 %v913_v28, %s3581_s12  ;;  %v919_v32 = vadd.f32 %v918_v31, %v913_v28 }
 0x519   :  { %v3108_v30 = vpop.f32.mrf.mxu1 }
 0x51a   :  { %943 = vrot.lane.b32.xlu0 %v941_v29, %s3579_s24  ;;  %v2796_v33 = vmul.f32 -1.442695, %v919_v32  ;;  %v1160_v30 = vld [vmem:[#allocation6 + $0x28] sm:$0xff] }
 0x51c   :  { %3356 = vpow2.f32 %v2796_v33 }
 0x529   :  { %v3357_v34 = vpop.eup %3356 }
 0x52a   :  { %v923_v35 = vadd.f32 1.0, %v3357_v34 }
 0x52c   :  { %3358 = vrcp.f32 %v923_v35 }
 0x539   :  { %v3359_v41 = vpop.eup %3358 }
 0x58a   :  { %v930_v37 = vpop.permute.xlu1 %929 }
 0x58b   :  { %v932_v38 = vadd.f32 %v930_v37, %v927_v36 }
 0x58c   :  { %v944_v40 = vpop.permute.xlu0 %943 }
 0x58d   :  { %v2797_v39 = vmul.f32 -1.442695, %v932_v38  ;;  %v946_v42 = vmul.f32 %v3359_v41, %v944_v40  ;;  %v3892_v40 = vld [vmem:[#allocation3] sm:$0xff]  ;;  %v1404_v41 = vld [vmem:[#allocation11 + $0x8] sm:$0xff] }
 0x58f   :  { %3360 = vpow2.f32 %v2797_v39  ;;  %v947_v44 = vadd.f32 %v946_v42, %v940_v43  ;;  %v1405_v39 = vld [vmem:[#allocation11 + $0x10] sm:$0xff]  ;;  %v1403_v42 = vld [vmem:[#allocation11] sm:$0xff]  ;;  %v3896_v43 = vld [vmem:[#allocation3 + $0x8] sm:$0xff] }
 0x591   :  { %3362 = vtanh.f32 %v947_v44  ;;  %v3900_v44 = vld [vmem:[#allocation3 + $0x10] sm:$0xff] }
 0x59c   :  { %v3361_v45 = vpop.eup %3360 }
 0x59d   :  { %v936_v46 = vadd.f32 1.0, %v3361_v45 }
 0x59e   :  { %v3363_v47 = vpop.eup %3362 }
 0x59f   :  { %3364 = vrcp.f32 %v936_v46  ;;  %v949_v48 = vsub.f32 %v841_v27, %v3363_v47 }
 0x5ac   :  { %v3365_v49 = vpop.eup %3364 }
 0x5ad   :  { %v950_v50 = vmul.f32 %v3365_v49, %v949_v48 }
 0x5af   :  { %v951_v51 = vadd.f32 %v3363_v47, %v950_v50 }
 0x5b1   :  { %953 = vst.msk [vmem:[#allocation3 + $0x18] sm:$0xff] %vm97_vm0, %v951_v51  ;;  %3118 = vmatmul.mubr.msk.f32.vlgmr.msra.gmra.mxu0 %vm97_vm0, %v951_v51 }
 0x5b2   :  { %3132 = vmatpush3.msra.mxu0 %v3682_v9  ;;  %3139 = vmatprep.mubr.msk.f32.mxu0 %vm3580_vm2, %v3578_v0 }
 0x5b3   :  { %3133 = vmatprep.subr.mxu0 %v3578_v0 }
 0x5b4   :  { %3134 = vmatpush3.msra.mxu0 %v3690_v11 }
 0x5b5   :  { %3135 = vmatprep.subr.mxu0 %v3578_v0 }
 0x5b6   :  { %3136 = vmatpush3.msra.mxu0 %v3702_v15 }
 0x5b7   :  { %3137 = vmatprep.subr.mxu0 %v3578_v0 }
 0x5b8   :  { %3138 = vmatpush3.msra.mxu0 %v3711_v16  ;;  %v3904_v45 = vld [vmem:[#allocation3 + $0x18] sm:$0xff] }
 0x5b9   :  { %3153 = vmatprep.subr.mxu0 %v1406_v21 }
 0x671   :  { %v1023_v52 = vpop.f32.mrf.mxu0 }
 0x672   :  { %v1051_v54 = vadd.f32 %v1023_v52, %v3782_v53  ;;  %1039 = vrot.lane.b32.xlu1 %v1023_v52, %s3581_s12  ;;  %v1029_v57 = vadd.f32 %v1028_v56, %v1023_v52 }
 0x673   :  { %v3119_v55 = vpop.f32.mrf.mxu0 }
 0x674   :  { %1053 = vrot.lane.b32.xlu0 %v1051_v54, %s3579_s24  ;;  %v2799_v58 = vmul.f32 -1.442695, %v1029_v57  ;;  %v1555_v54 = vld [vmem:[#allocation11 + $0x38] sm:$0xff] }
 0x676   :  { %3366 = vpow2.f32 %v2799_v58 }
 0x683   :  { %v3367_v59 = vpop.eup %3366 }
 0x684   :  { %v1033_v60 = vadd.f32 1.0, %v3367_v59 }
 0x686   :  { %3368 = vrcp.f32 %v1033_v60 }
 0x693   :  { %v3369_v3 = vpop.eup %3368 }
 0x6e4   :  { %v1040_v62 = vpop.permute.xlu1 %1039 }
 0x6e5   :  { %v1042_v63 = vadd.f32 %v1040_v62, %v1037_v61 }
 0x6e6   :  { %v1054_v2 = vpop.permute.xlu0 %1053 }
 0x6e7   :  { %v2800_v1 = vmul.f32 -1.442695, %v1042_v63  ;;  %v1056_v4 = vmul.f32 %v3369_v3, %v1054_v2  ;;  %v1248_v3 = vld [vmem:[#allocation4 + $0x30] sm:$0xff] }
 0x6e9   :  { %3370 = vpow2.f32 %v2800_v1  ;;  %v1057_v6 = vadd.f32 %v1056_v4, %v1050_v5 }
 0x6eb   :  { %3372 = vtanh.f32 %v1057_v6 }
 0x6f6   :  { %v3371_v7 = vpop.eup %3370 }
 0x6f7   :  { %v1046_v8 = vadd.f32 1.0, %v3371_v7 }
 0x6f8   :  { %v3373_v10 = vpop.eup %3372 }
 0x6f9   :  { %3374 = vrcp.f32 %v1046_v8  ;;  %v1059_v12 = vsub.f32 %v951_v51, %v3373_v10  ;;  %v3922_v51 = vld [vmem:[%s4183_s7] ss:$0 sm:$0xff] }
 0x6fa   :  { %v1257_v8 = vld [vmem:[#allocation5 + $0x30] sm:$0xff] }
 0x706   :  { %v3375_v13 = vpop.eup %3374 }
 0x707   :  { %v1060_v14 = vmul.f32 %v3375_v13, %v1059_v12 }
 0x709   :  { %v1061_v17 = vadd.f32 %v3373_v10, %v1060_v14 }
 0x70b   :  { %1063 = vst.msk [vmem:[#allocation3 + $0x20] sm:$0xff] %vm97_vm0, %v1061_v17  ;;  %3129 = vmatmul.mubr.msk.f32.vlgmr.msra.gmra.mxu1 %vm97_vm0, %v1061_v17 }
 0x70c   :  { %3143 = vmatpush3.msra.mxu1 %v3682_v9  ;;  %3150 = vmatprep.mubr.msk.f32.mxu1 %vm3580_vm2, %v3578_v0 }
 0x70d   :  { %3144 = vmatprep.subr.mxu1 %v3578_v0 }
 0x70e   :  { %3145 = vmatpush3.msra.mxu1 %v3690_v11 }
 0x70f   :  { %3146 = vmatprep.subr.mxu1 %v3578_v0 }
 0x710   :  { %3147 = vmatpush3.msra.mxu1 %v3702_v15 }
 0x711   :  { %3148 = vmatprep.subr.mxu1 %v3578_v0 }
 0x712   :  { %3149 = vmatpush3.msra.mxu1 %v3711_v16  ;;  %v3908_v46 = vld [vmem:[#allocation3 + $0x20] sm:$0xff] }
 0x713   :  { %3173 = vmatprep.subr.mxu1 %v1555_v54 }
 0x7cb   :  { %v1133_v18 = vpop.f32.mrf.mxu1 }
 0x7cc   :  { %v1161_v19 = vadd.f32 %v1133_v18, %v3782_v53  ;;  %1149 = vrot.lane.b32.xlu1 %v1133_v18, %s3581_s12  ;;  %v1139_v11 = vadd.f32 %v1138_v22, %v1133_v18 }
 0x7cd   :  { %v3130_v9 = vpop.f32.mrf.mxu1 }
 0x7ce   :  { %1163 = vrot.lane.b32.xlu0 %v1161_v19, %s3579_s24  ;;  %v2802_v23 = vmul.f32 -1.442695, %v1139_v11  ;;  %v1270_v19 = vld [vmem:[#allocation6 + $0x30] sm:$0xff] }
 0x7d0   :  { %3376 = vpow2.f32 %v2802_v23 }
 0x7dd   :  { %v3377_v24 = vpop.eup %3376 }
 0x7de   :  { %v1143_v15 = vadd.f32 1.0, %v3377_v24 }
 0x7e0   :  { %3378 = vrcp.f32 %v1143_v15 }
 0x7ed   :  { %v3379_v28 = vpop.eup %3378 }
 0x83e   :  { %v1150_v26 = vpop.permute.xlu1 %1149 }
 0x83f   :  { %v1152_v16 = vadd.f32 %v1150_v26, %v1147_v25  ;;  %v1554_v26 = vld [vmem:[#allocation11 + $0x30] sm:$0xff] }
 0x840   :  { %v1164_v27 = vpop.permute.xlu0 %1163 }
 0x841   :  { %v2803_v20 = vmul.f32 -1.442695, %v1152_v16  ;;  %v1166_v29 = vmul.f32 %v3379_v28, %v1164_v27  ;;  %v1553_v16 = vld [vmem:[#allocation11 + $0x28] sm:$0xff] }
 0x843   :  { %3380 = vpow2.f32 %v2803_v20  ;;  %v1167_v31 = vadd.f32 %v1166_v29, %v1160_v30  ;;  %v1552_v20 = vld [vmem:[#allocation11 + $0x20] sm:$0xff] }
 0x845   :  { %3382 = vtanh.f32 %v1167_v31  ;;  %v3968_v31 = vld [vmem:[%s4183_s7 + $0x1] ss:$0 sm:$0xff] }
 0x850   :  { %v3381_v32 = vpop.eup %3380 }
 0x851   :  { %v1156_v33 = vadd.f32 1.0, %v3381_v32 }
 0x852   :  { %v3383_v34 = vpop.eup %3382 }
 0x853   :  { %3384 = vrcp.f32 %v1156_v33  ;;  %v1169_v35 = vsub.f32 %v1061_v17, %v3383_v34 }
 0x860   :  { %v3385_v36 = vpop.eup %3384 }
 0x861   :  { %v1170_v37 = vmul.f32 %v3385_v36, %v1169_v35 }
 0x863   :  { %v3886_v38 = vadd.f32 %v3383_v34, %v1170_v37 }
 0x865   :  { %1173 = vst.msk [vmem:[#allocation3 + $0x28] sm:$0xff] %vm97_vm0, %v3886_v38  ;;  %3140 = vmatmul.mubr.msk.f32.vlgmr.msra.gmra.mxu0 %vm97_vm0, %v3886_v38 }
 0x866   :  { %3154 = vmatpush3.msra.mxu0 %v1406_v21  ;;  %3161 = vmatprep.mubr.msk.f32.mxu0 %vm97_vm0, %v3892_v40 }
 0x867   :  { %3155 = vmatprep.subr.mxu0 %v1405_v39 }
 0x868   :  { %3156 = vmatpush3.msra.mxu0 %v1405_v39 }
 0x869   :  { %3157 = vmatprep.subr.mxu0 %v1404_v41 }
 0x86a   :  { %3158 = vmatpush3.msra.mxu0 %v1404_v41 }
 0x86b   :  { %3159 = vmatprep.subr.mxu0 %v1403_v42 }
 0x86c   :  { %3160 = vmatpush3.msra.mxu0 %v1403_v42  ;;  %v3912_v47 = vld [vmem:[#allocation3 + $0x28] sm:$0xff] }
 0x86d   :  { %3162 = vmatmul.mubr.msk.f32.vlgmr.msra.gmra.mxu0 %vm97_vm0, %v3896_v43 }
 0x86e   :  { %3164 = vmatprep.mubr.msk.f32.mxu0 %vm97_vm0, %v3900_v44 }
 0x871   :  { %3165 = vmatmul.mubr.msk.f32.gmra.mxu0 %vm97_vm0, %v3904_v45 }
 0x872   :  { %3167 = vmatprep.mubr.msk.f32.mxu0 %vm97_vm0, %v3908_v46 }
 0x875   :  { %3168 = vmatmul.mubr.msk.f32.gmra.mxu0 %vm97_vm0, %v3912_v47 }
 0x925   :  { %v1243_v48 = vpop.f32.mrf.mxu0 }
 0x926   :  { %v1271_v49 = vadd.f32 %v1243_v48, %v3782_v53  ;;  %1259 = vrot.lane.b32.xlu1 %v1243_v48, %s3581_s12  ;;  %v1249_v4 = vadd.f32 %v1248_v3, %v1243_v48 }
 0x927   :  { %v3141_v50 = vpop.f32.mrf.mxu0 }
 0x928   :  { %1273 = vrot.lane.b32.xlu0 %v1271_v49, %s3579_s24  ;;  %v2805_v5 = vmul.f32 -1.442695, %v1249_v4  ;;  %v3982_v49 = vld [vmem:[#allocation12 + $0x18] sm:$0xff]  ;;  %v3984_v50 = vld [vmem:[#allocation12 + $0x10] sm:$0xff] }
 0x92a   :  { %3386 = vpow2.f32 %v2805_v5 }
 0x92d   :  { %v3163_v52 = vpop.f32.mrf.mxu0 }
 0x92e   :  { %v1510_v55 = vadd.f32 %v3163_v52, %v3922_v51  ;;  %v1681_v52 = vld [vmem:[#allocation11 + $0x58] sm:$0xff] }
 0x92f   :  { %v1504_v56 = vpop.f32.mrf.mxu0  ;;  %3193 = vmatprep.subr.mxu0 %v1681_v52 }
 0x930   :  { %1544 = vst.msk [vmem:[#allocation4 + $0x8] sm:$0xff] %vm97_vm0, %v1510_v55  ;;  %v1505_v57 = vadd.f32 %v3922_v51, %v1504_v56  ;;  %3194 = vmatpush3.msra.mxu0 %v1681_v52  ;;  %v3988_v55 = vld [vmem:[#allocation12 + $0x8] sm:$0xff] }
 0x931   :  { %v3166_v58 = vpop.f32.mrf.mxu0  ;;  %v1679_v56 = vld [vmem:[#allocation11 + $0x48] sm:$0xff] }
 0x932   :  { %1543 = vst.msk [vmem:[#allocation4] sm:$0xff] %vm97_vm0, %v1505_v57  ;;  %v1520_v59 = vadd.f32 %v3166_v58, %v3922_v51  ;;  %v3994_v57 = vld [vmem:[#allocation12] sm:$0xff] }
 0x933   :  { %v1514_v60 = vpop.f32.mrf.mxu0  ;;  %v1678_v58 = vld [vmem:[#allocation11 + $0x40] sm:$0xff] }
 0x934   :  { %1546 = vst.msk [vmem:[#allocation4 + $0x18] sm:$0xff] %vm97_vm0, %v1520_v59  ;;  %v1515_v61 = vadd.f32 %v3922_v51, %v1514_v60  ;;  %v2842_v59 = vld [vmem:[%s4184_s8] ss:$0 sm:$0xff]  ;;  %v1358_v60 = vld [vmem:[#allocation4 + $0x38] sm:$0xff] }
 0x935   :  { %v3169_v62 = vpop.f32.mrf.mxu0 }
 0x936   :  { %1545 = vst.msk [vmem:[#allocation4 + $0x10] sm:$0xff] %vm97_vm0, %v1515_v61  ;;  %v1530_v63 = vadd.f32 %v3169_v62, %v3922_v51 }
 0x937   :  { %v1524_v1 = vpop.f32.mrf.mxu0  ;;  %v3387_v6 = vpop.eup %3386 }
 0x938   :  { %1548 = vst.msk [vmem:[#allocation4 + $0x28] sm:$0xff] %vm97_vm0, %v1530_v63  ;;  %v1525_v2 = vadd.f32 %v3922_v51, %v1524_v1  ;;  %v1253_v7 = vadd.f32 1.0, %v3387_v6 }
 0x93a   :  { %1547 = vst.msk [vmem:[#allocation4 + $0x20] sm:$0xff] %vm97_vm0, %v1525_v2  ;;  %3388 = vrcp.f32 %v1253_v7  ;;  %v1367_v2 = vld [vmem:[#allocation5 + $0x38] sm:$0xff] }
 0x947   :  { %v3389_v17 = vpop.eup %3388 }
 0x998   :  { %v1260_v10 = vpop.permute.xlu1 %1259 }
 0x999   :  { %v1262_v12 = vadd.f32 %v1260_v10, %v1257_v8  ;;  %v1380_v10 = vld [vmem:[#allocation6 + $0x38] sm:$0xff] }
 0x99a   :  { %v1274_v14 = vpop.permute.xlu0 %1273 }
 0x99b   :  { %v2806_v13 = vmul.f32 -1.442695, %v1262_v12  ;;  %v1276_v18 = vmul.f32 %v3389_v17, %v1274_v14 }
 0x99d   :  { %3390 = vpow2.f32 %v2806_v13  ;;  %v1277_v9 = vadd.f32 %v1276_v18, %v1270_v19 }
 0x99f   :  { %3392 = vtanh.f32 %v1277_v9 }
 0x9aa   :  { %v3391_v21 = vpop.eup %3390 }
 0x9ab   :  { %v1266_v22 = vadd.f32 1.0, %v3391_v21 }
 0x9ac   :  { %v3393_v11 = vpop.eup %3392 }
 0x9ad   :  { %3394 = vrcp.f32 %v1266_v22  ;;  %v1279_v23 = vsub.f32 %v3886_v38, %v3393_v11 }
 0x9ba   :  { %v3395_v24 = vpop.eup %3394 }
 0x9bb   :  { %v1280_v15 = vmul.f32 %v3395_v24, %v1279_v23  ;;  %v2830_v24 = vld [vmem:[%s4183_s7 + $0x2] ss:$0 sm:$0xff] }
 0x9bd   :  { %v3937_v25 = vadd.f32 %v3393_v11, %v1280_v15  ;;  %v4012_v11 = vld [vmem:[#allocation2 + $0x8] sm:$0xff] }
 0x9bf   :  { %1283 = vst.msk [vmem:[#allocation3 + $0x30] sm:$0xff] %vm97_vm0, %v3937_v25  ;;  %3151 = vmatmul.mubr.msk.f32.vlgmr.msra.gmra.mxu1 %vm97_vm0, %v3937_v25 }
 0x9c0   :  { %3174 = vmatpush3.msra.mxu1 %v1555_v54  ;;  %3181 = vmatprep.mubr.msk.f32.mxu1 %vm97_vm0, %v3892_v40  ;;  %v1680_v54 = vld [vmem:[#allocation11 + $0x50] sm:$0xff] }
 0x9c1   :  { %3175 = vmatprep.subr.mxu1 %v1554_v26  ;;  %3195 = vmatprep.subr.mxu0 %v1680_v54 }
 0x9c2   :  { %3176 = vmatpush3.msra.mxu1 %v1554_v26  ;;  %3196 = vmatpush3.msra.mxu0 %v1680_v54 }
 0x9c3   :  { %3177 = vmatprep.subr.mxu1 %v1553_v16  ;;  %3197 = vmatprep.subr.mxu0 %v1679_v56 }
 0x9c4   :  { %3178 = vmatpush3.msra.mxu1 %v1553_v16  ;;  %3198 = vmatpush3.msra.mxu0 %v1679_v56 }
 0x9c5   :  { %3179 = vmatprep.subr.mxu1 %v1552_v20  ;;  %3199 = vmatprep.subr.mxu0 %v1678_v58 }
 0x9c6   :  { %3180 = vmatpush3.msra.mxu1 %v1552_v20  ;;  %v3945_v27 = vld [vmem:[#allocation3 + $0x30] sm:$0xff]  ;;  %3200 = vmatpush3.msra.mxu0 %v1678_v58 }
 0x9c7   :  { %3182 = vmatmul.mubr.msk.f32.vlgmr.msra.gmra.mxu1 %vm97_vm0, %v3896_v43  ;;  %3170 = vmatprep.mubr.msk.f32.mxu0 %vm97_vm0, %v3945_v27 }
 0x9c8   :  { %3184 = vmatprep.mubr.msk.f32.mxu1 %vm97_vm0, %v3900_v44  ;;  %3213 = vmatprep.subr.mxu1 %v3578_v0 }
 0x9c9   :  { %3214 = vmatpush3.msra.mxu1 %v3982_v49  ;;  %3235 = vmatprep.subr.mxu0 %v3578_v0 }
 0x9ca   :  { %3215 = vmatprep.subr.mxu1 %v3578_v0 }
 0x9cb   :  { %3185 = vmatmul.mubr.msk.f32.gmra.mxu1 %vm97_vm0, %v3904_v45 }
 0x9cc   :  { %3187 = vmatprep.mubr.msk.f32.mxu1 %vm97_vm0, %v3908_v46  ;;  %3216 = vmatpush3.msra.mxu1 %v3984_v50 }
 0x9cd   :  { %3217 = vmatprep.subr.mxu1 %v3578_v0 }
 0x9ce   :  { %3218 = vmatpush3.msra.mxu1 %v3988_v55 }
 0x9cf   :  { %3188 = vmatmul.mubr.msk.f32.gmra.mxu1 %vm97_vm0, %v3912_v47  ;;  %3219 = vmatprep.subr.mxu1 %v3578_v0 }
 0x9d0   :  { %3190 = vmatprep.mubr.msk.f32.mxu1 %vm97_vm0, %v3945_v27  ;;  %3220 = vmatpush3.msra.mxu1 %v3994_v57 }
 0x9d1   :  { %3224 = vmatprep.subr.mxu1 %v3578_v0 }
 0xa7f   :  { %v1353_v28 = vpop.f32.mrf.mxu1 }
 0xa80   :  { %v1381_v29 = vadd.f32 %v1353_v28, %v3782_v53  ;;  %1369 = vrot.lane.b32.xlu1 %v1353_v28, %s3581_s12  ;;  %v1359_v61 = vadd.f32 %v1358_v60, %v1353_v28 }
 0xa81   :  { %v3152_v30 = vpop.f32.mrf.mxu1 }
 0xa82   :  { %1383 = vrot.lane.b32.xlu0 %v1381_v29, %s3579_s24  ;;  %v2808_v62 = vmul.f32 -1.442695, %v1359_v61 }
 0xa84   :  { %1909 = vrot.lane.b32.xlu1 %v2842_v59, %s3579_s24  ;;  %3396 = vpow2.f32 %v2808_v62 }
 0xa87   :  { %v3183_v32 = vpop.f32.mrf.mxu1 }
 0xa88   :  { %v1636_v33 = vadd.f32 %v3183_v32, %v3968_v31 }
 0xa89   :  { %v1630_v34 = vpop.f32.mrf.mxu1 }
 0xa8a   :  { %1670 = vst.msk [vmem:[#allocation5 + $0x8] sm:$0xff] %vm97_vm0, %v1636_v33  ;;  %v1631_v35 = vadd.f32 %v3968_v31, %v1630_v34 }
 0xa8b   :  { %v3186_v36 = vpop.f32.mrf.mxu1 }
 0xa8c   :  { %1669 = vst.msk [vmem:[#allocation5] sm:$0xff] %vm97_vm0, %v1631_v35  ;;  %v1646_v53 = vadd.f32 %v3186_v36, %v3968_v31 }
 0xa8d   :  { %v1640_v37 = vpop.f32.mrf.mxu1 }
 0xa8e   :  { %1672 = vst.msk [vmem:[#allocation5 + $0x18] sm:$0xff] %vm97_vm0, %v1646_v53  ;;  %v1641_v38 = vadd.f32 %v3968_v31, %v1640_v37 }
 0xa8f   :  { %v3189_v39 = vpop.f32.mrf.mxu1 }
 0xa90   :  { %1671 = vst.msk [vmem:[#allocation5 + $0x10] sm:$0xff] %vm97_vm0, %v1641_v38  ;;  %v1656_v41 = vadd.f32 %v3189_v39, %v3968_v31 }
 0xa91   :  { %v1650_v42 = vpop.f32.mrf.mxu1  ;;  %v3397_v63 = vpop.eup %3396 }
 0xa92   :  { %1674 = vst.msk [vmem:[#allocation5 + $0x28] sm:$0xff] %vm97_vm0, %v1656_v41  ;;  %v1651_v48 = vadd.f32 %v3968_v31, %v1650_v42  ;;  %v1363_v1 = vadd.f32 1.0, %v3397_v63  ;;  %v1883_v42 = vld [vmem:[#allocation4] sm:$0xff] }
 0xa93   :  { %v1891_v59 = vld [vmem:[#allocation5] sm:$0xff] }
 0xa94   :  { %1673 = vst.msk [vmem:[#allocation5 + $0x20] sm:$0xff] %vm97_vm0, %v1651_v48  ;;  %3398 = vrcp.f32 %v1363_v1 }
 0xaa1   :  { %v3399_v7 = vpop.eup %3398 }
 0xaf2   :  { %v1370_v3 = vpop.permute.xlu1 %1369 }
 0xaf3   :  { %v1372_v4 = vadd.f32 %v1370_v3, %v1367_v2 }
 0xaf4   :  { %v1384_v6 = vpop.permute.xlu0 %1383 }
 0xaf5   :  { %v2809_v5 = vmul.f32 -1.442695, %v1372_v4  ;;  %v1386_v8 = vmul.f32 %v3399_v7, %v1384_v6 }
 0xaf7   :  { %3400 = vpow2.f32 %v2809_v5  ;;  %v1387_v12 = vadd.f32 %v1386_v8, %v1380_v10 }
 0xaf9   :  { %3402 = vtanh.f32 %v1387_v12 }
 0xb04   :  { %v3401_v13 = vpop.eup %3400 }
 0xb05   :  { %v1376_v14 = vadd.f32 1.0, %v3401_v13 }
 0xb06   :  { %v3403_v17 = vpop.eup %3402 }
 0xb07   :  { %3404 = vrcp.f32 %v1376_v14  ;;  %v1389_v18 = vsub.f32 %v3937_v25, %v3403_v17 }
 0xb14   :  { %v3405_v19 = vpop.eup %3404 }
 0xb15   :  { %v1390_v9 = vmul.f32 %v3405_v19, %v1389_v18  ;;  %v1996_v18 = vld [vmem:[#allocation4 + $0x8] sm:$0xff] }
 0xb17   :  { %v1391_v21 = vadd.f32 %v3403_v17, %v1390_v9 }
 0xb19   :  { %1393 = vst.msk [vmem:[#allocation3 + $0x38] sm:$0xff] %vm97_vm0, %v1391_v21  ;;  %1394 = vst.msk [vmem:[#allocation2] sm:$0xff] %vm97_vm0, %v1391_v21 }
 0xb20   :  { %v1402_v22 = vld [vmem:[#allocation3 + $0x38] sm:$0xff] }
 0xb21   :  { %3171 = vmatmul.mubr.msk.f32.gmra.mxu0 %vm97_vm0, %v1402_v22  ;;  %3191 = vmatmul.mubr.msk.f32.gmra.mxu1 %vm97_vm0, %v1402_v22 }
 0xb22   :  { %3201 = vmatprep.mubr.msk.f32.mxu0 %vm97_vm0, %v3892_v40  ;;  %3221 = vmatprep.mubr.msk.f32.mxu1 %vm3580_vm2, %v3578_v0 }
 0xb25   :  { %3202 = vmatmul.mubr.msk.f32.vlgmr.msra.gmra.mxu0 %vm97_vm0, %v3896_v43  ;;  %3222 = vmatmul.mubr.msk.f32.vlgmr.msra.gmra.mxu1 %vm97_vm0, %v4012_v11 }
 0xb26   :  { %3204 = vmatprep.mubr.msk.f32.mxu0 %vm97_vm0, %v3900_v44  ;;  %3225 = vmatpush3.msra.mxu1 %v3982_v49 }
 0xb27   :  { %3226 = vmatprep.subr.mxu1 %v3578_v0  ;;  %3232 = vmatprep.mubr.msk.f32.mxu1 %vm3580_vm2, %v3578_v0 }
 0xb28   :  { %3227 = vmatpush3.msra.mxu1 %v3984_v50  ;;  %3236 = vmatpush3.msra.mxu0 %v3982_v49 }
 0xb29   :  { %3205 = vmatmul.mubr.msk.f32.gmra.mxu0 %vm97_vm0, %v3904_v45  ;;  %3228 = vmatprep.subr.mxu1 %v3578_v0 }
 0xb2a   :  { %3207 = vmatprep.mubr.msk.f32.mxu0 %vm97_vm0, %v3908_v46  ;;  %3229 = vmatpush3.msra.mxu1 %v3988_v55  ;;  %v4051_v46 = vpop.permute.xlu1 %1909 }
 0xb2b   :  { %3230 = vmatprep.subr.mxu1 %v3578_v0  ;;  %3237 = vmatprep.subr.mxu0 %v3578_v0 }
 0xb2c   :  { %3231 = vmatpush3.msra.mxu1 %v3994_v57  ;;  %3238 = vmatpush3.msra.mxu0 %v3984_v50 }
 0xb2d   :  { %3208 = vmatmul.mubr.msk.f32.gmra.mxu0 %vm97_vm0, %v3912_v47  ;;  %3239 = vmatprep.subr.mxu0 %v3578_v0 }
 0xb2e   :  { %3210 = vmatprep.mubr.msk.f32.mxu0 %vm97_vm0, %v3945_v27  ;;  %3240 = vmatpush3.msra.mxu0 %v3988_v55 }
 0xb2f   :  { %3241 = vmatprep.subr.mxu0 %v3578_v0  ;;  %3246 = vmatprep.subr.mxu1 %v3578_v0 }
 0xb30   :  { %3242 = vmatpush3.msra.mxu0 %v3994_v57 }
 0xb31   :  { %3211 = vmatmul.mubr.msk.f32.gmra.mxu0 %vm97_vm0, %v1402_v22  ;;  %3257 = vmatprep.subr.mxu0 %v3578_v0 }
 0xb32   :  { %3243 = vmatprep.mubr.msk.f32.mxu0 %vm3580_vm2, %v3578_v0 }
 0xbe1   :  { %v3172_v40 = vpop.f32.mrf.mxu0  ;;  %v3192_v43 = vpop.f32.mrf.mxu1 }
 0xbe2   :  { %v1540_v44 = vadd.f32 %v3172_v40, %v3922_v51  ;;  %v1666_v45 = vadd.f32 %v3192_v43, %v3968_v31 }
 0xbe3   :  { %v1534_v47 = vpop.f32.mrf.mxu0  ;;  %v1660_v23 = vpop.f32.mrf.mxu1 }
 0xbe4   :  { %1550 = vst.msk [vmem:[#allocation4 + $0x38] sm:$0xff] %vm97_vm0, %v1540_v44  ;;  %1676 = vst.msk [vmem:[#allocation5 + $0x38] sm:$0xff] %vm97_vm0, %v1666_v45  ;;  %v1535_v15 = vadd.f32 %v3922_v51, %v1534_v47  ;;  %v1661_v25 = vadd.f32 %v3968_v31, %v1660_v23 }
 0xbe5   :  { %v3203_v26 = vpop.f32.mrf.mxu0  ;;  %v1879_v16 = vpop.f32.mrf.mxu1 }
 0xbe6   :  { %1549 = vst.msk [vmem:[#allocation4 + $0x30] sm:$0xff] %vm97_vm0, %v1535_v15  ;;  %1675 = vst.msk [vmem:[#allocation5 + $0x30] sm:$0xff] %vm97_vm0, %v1661_v25  ;;  %v1762_v20 = vadd.f32 %v3203_v26, %v2830_v24  ;;  %v1912_v27 = vadd.f32 %v4051_v46, %v1879_v16  ;;  %1893 = vrot.lane.b32.xlu0 %v1879_v16, %s3581_s12  ;;  %v1884_v48 = vadd.f32 %v1883_v42, %v1879_v16 }
 0xbe7   :  { %v1756_v28 = vpop.f32.mrf.mxu0  ;;  %v3223_v29 = vpop.f32.mrf.mxu1 }
 0xbe8   :  { %1796 = vst.msk [vmem:[#allocation6 + $0x8] sm:$0xff] %vm97_vm0, %v1762_v20  ;;  %v1757_v30 = vadd.f32 %v2830_v24, %v1756_v28  ;;  %1914 = vrot.lane.b32.xlu1 %v1912_v27, %s3579_s24  ;;  %v2840_v52 = vmul.f32 -1.442695, %v1884_v48 }
 0xbe9   :  { %v3206_v51 = vpop.f32.mrf.mxu0 }
 0xbea   :  { %1795 = vst.msk [vmem:[#allocation6] sm:$0xff] %vm97_vm0, %v1757_v30  ;;  %v1772_v31 = vadd.f32 %v3206_v51, %v2830_v24  ;;  %3406 = vpow2.f32 %v2840_v52 }
 0xbeb   :  { %v1766_v32 = vpop.f32.mrf.mxu0 }
 0xbec   :  { %1798 = vst.msk [vmem:[#allocation6 + $0x18] sm:$0xff] %vm97_vm0, %v1772_v31  ;;  %v1767_v33 = vadd.f32 %v2830_v24, %v1766_v32  ;;  %v2101_v32 = vld [vmem:[#allocation4 + $0x10] sm:$0xff] }
 0xbed   :  { %v3209_v34 = vpop.f32.mrf.mxu0 }
 0xbee   :  { %1797 = vst.msk [vmem:[#allocation6 + $0x10] sm:$0xff] %vm97_vm0, %v1767_v33  ;;  %v1782_v35 = vadd.f32 %v3209_v34, %v2830_v24 }
 0xbef   :  { %v1776_v36 = vpop.f32.mrf.mxu0 }
 0xbf0   :  { %1800 = vst.msk [vmem:[#allocation6 + $0x28] sm:$0xff] %vm97_vm0, %v1782_v35  ;;  %v1777_v53 = vadd.f32 %v2830_v24, %v1776_v36 }
 0xbf1   :  { %v3212_v37 = vpop.f32.mrf.mxu0  ;;  %v1903_v2 = vld [vmem:[#allocation6] sm:$0xff] }
 0xbf2   :  { %1799 = vst.msk [vmem:[#allocation6 + $0x20] sm:$0xff] %vm97_vm0, %v1777_v53  ;;  %v1792_v38 = vadd.f32 %v3212_v37, %v2830_v24  ;;  %v2109_v53 = vld [vmem:[#allocation5 + $0x10] sm:$0xff] }
 0xbf3   :  { %v1786_v39 = vpop.f32.mrf.mxu0 }
 0xbf4   :  { %1802 = vst.msk [vmem:[#allocation6 + $0x38] sm:$0xff] %vm97_vm0, %v1792_v38  ;;  %v1787_v41 = vadd.f32 %v2830_v24, %v1786_v39  ;;  %v2016_v24 = vld [vmem:[#allocation6 + $0x8] sm:$0xff] }
 0xbf5   :  { %v2121_v52 = vld [vmem:[#allocation6 + $0x10] sm:$0xff] }
 0xbf6   :  { %1801 = vst.msk [vmem:[#allocation6 + $0x30] sm:$0xff] %vm97_vm0, %v1787_v41 }
 0xbf7   :  { %v3407_v54 = vpop.eup %3406 }
 0xbf8   :  { %v1888_v56 = vadd.f32 1.0, %v3407_v54 }
 0xbfa   :  { %3408 = vrcp.f32 %v1888_v56 }
 0xc07   :  { %v3409_v63 = vpop.eup %3408 }
 0xc58   :  { %v1894_v58 = vpop.permute.xlu0 %1893 }
 0xc59   :  { %v1896_v60 = vadd.f32 %v1894_v58, %v1891_v59 }
 0xc5a   :  { %v1915_v62 = vpop.permute.xlu1 %1914 }
 0xc5b   :  { %v2841_v61 = vmul.f32 -1.442695, %v1896_v60  ;;  %v1917_v1 = vmul.f32 %v3409_v63, %v1915_v62 }
 0xc5d   :  { %3410 = vpow2.f32 %v2841_v61  ;;  %v1918_v3 = vadd.f32 %v1917_v1, %v1903_v2 }
 0xc5f   :  { %3412 = vtanh.f32 %v1918_v3 }
 0xc6a   :  { %v3411_v4 = vpop.eup %3410 }
 0xc6b   :  { %v1900_v5 = vadd.f32 1.0, %v3411_v4  ;;  %v2206_v4 = vld [vmem:[#allocation4 + $0x18] sm:$0xff] }
 0xc6c   :  { %v3413_v6 = vpop.eup %3412 }
 0xc6d   :  { %3414 = vrcp.f32 %v1900_v5  ;;  %v1920_v7 = vsub.f32 %v4012_v11, %v3413_v6  ;;  %v2004_v11 = vld [vmem:[#allocation5 + $0x8] sm:$0xff] }
 0xc7a   :  { %v3415_v8 = vpop.eup %3414 }
 0xc7b   :  { %v1921_v10 = vmul.f32 %v3415_v8, %v1920_v7 }
 0xc7d   :  { %v1922_v12 = vadd.f32 %v3413_v6, %v1921_v10  ;;  %v2214_v10 = vld [vmem:[#allocation5 + $0x18] sm:$0xff] }
 0xc7f   :  { %3233 = vmatmul.mubr.msk.f32.vlgmr.msra.gmra.mxu1 %vm97_vm0, %v1922_v12 }
 0xc80   :  { %3247 = vmatpush3.msra.mxu1 %v3982_v49  ;;  %3254 = vmatprep.mubr.msk.f32.mxu1 %vm3580_vm2, %v3578_v0 }
 0xc81   :  { %3248 = vmatprep.subr.mxu1 %v3578_v0 }
 0xc82   :  { %3249 = vmatpush3.msra.mxu1 %v3984_v50 }
 0xc83   :  { %3250 = vmatprep.subr.mxu1 %v3578_v0 }
 0xc84   :  { %3251 = vmatpush3.msra.mxu1 %v3988_v55 }
 0xc85   :  { %3252 = vmatprep.subr.mxu1 %v3578_v0 }
 0xc86   :  { %3253 = vmatpush3.msra.mxu1 %v3994_v57 }
 0xc87   :  { %3268 = vmatprep.subr.mxu1 %v3578_v0 }
 0xd3f   :  { %v1992_v13 = vpop.f32.mrf.mxu1 }
 0xd40   :  { %v2017_v14 = vadd.f32 %v1992_v13, %v4051_v46  ;;  %2006 = vrot.lane.b32.xlu0 %v1992_v13, %s3581_s12  ;;  %v1997_v19 = vadd.f32 %v1996_v18, %v1992_v13 }
 0xd41   :  { %v3234_v17 = vpop.f32.mrf.mxu1 }
 0xd42   :  { %2019 = vrot.lane.b32.xlu1 %v2017_v14, %s3579_s24  ;;  %v2844_v9 = vmul.f32 -1.442695, %v1997_v19 }
 0xd44   :  { %3416 = vpow2.f32 %v2844_v9  ;;  %v2226_v9 = vld [vmem:[#allocation6 + $0x18] sm:$0xff] }
 0xd51   :  { %v3417_v21 = vpop.eup %3416 }
 0xd52   :  { %v2001_v22 = vadd.f32 1.0, %v3417_v21 }
 0xd54   :  { %3418 = vrcp.f32 %v2001_v22 }
 0xd61   :  { %v3419_v47 = vpop.eup %3418 }
 0xdb2   :  { %v2007_v40 = vpop.permute.xlu0 %2006 }
 0xdb3   :  { %v2009_v43 = vadd.f32 %v2007_v40, %v2004_v11 }
 0xdb4   :  { %v2020_v45 = vpop.permute.xlu1 %2019 }
 0xdb5   :  { %v2845_v44 = vmul.f32 -1.442695, %v2009_v43  ;;  %v2022_v23 = vmul.f32 %v3419_v47, %v2020_v45 }
 0xdb7   :  { %3420 = vpow2.f32 %v2845_v44  ;;  %v2023_v15 = vadd.f32 %v2022_v23, %v2016_v24 }
 0xdb9   :  { %3422 = vtanh.f32 %v2023_v15 }
 0xdc4   :  { %v3421_v25 = vpop.eup %3420 }
 0xdc5   :  { %v2013_v26 = vadd.f32 1.0, %v3421_v25  ;;  %v2311_v25 = vld [vmem:[#allocation4 + $0x20] sm:$0xff] }
 0xdc6   :  { %v3423_v16 = vpop.eup %3422 }
 0xdc7   :  { %3424 = vrcp.f32 %v2013_v26  ;;  %v2025_v20 = vsub.f32 %v1922_v12, %v3423_v16 }
 0xdd4   :  { %v3425_v27 = vpop.eup %3424 }
 0xdd5   :  { %v2026_v28 = vmul.f32 %v3425_v27, %v2025_v20 }
 0xdd7   :  { %v2027_v29 = vadd.f32 %v3423_v16, %v2026_v28  ;;  %v2319_v28 = vld [vmem:[#allocation5 + $0x20] sm:$0xff] }
 0xdd9   :  { %3244 = vmatmul.mubr.msk.f32.vlgmr.msra.gmra.mxu0 %vm97_vm0, %v2027_v29 }
 0xdda   :  { %3258 = vmatpush3.msra.mxu0 %v3982_v49  ;;  %3265 = vmatprep.mubr.msk.f32.mxu0 %vm3580_vm2, %v3578_v0 }
 0xddb   :  { %3259 = vmatprep.subr.mxu0 %v3578_v0 }
 0xddc   :  { %3260 = vmatpush3.msra.mxu0 %v3984_v50 }
 0xddd   :  { %3261 = vmatprep.subr.mxu0 %v3578_v0 }
 0xdde   :  { %3262 = vmatpush3.msra.mxu0 %v3988_v55 }
 0xddf   :  { %3263 = vmatprep.subr.mxu0 %v3578_v0 }
 0xde0   :  { %3264 = vmatpush3.msra.mxu0 %v3994_v57 }
 0xde1   :  { %3279 = vmatprep.subr.mxu0 %v3578_v0 }
 0xe99   :  { %v2097_v30 = vpop.f32.mrf.mxu0 }
 0xe9a   :  { %v2122_v51 = vadd.f32 %v2097_v30, %v4051_v46  ;;  %2111 = vrot.lane.b32.xlu0 %v2097_v30, %s3581_s12  ;;  %v2102_v33 = vadd.f32 %v2101_v32, %v2097_v30 }
 0xe9b   :  { %v3245_v31 = vpop.f32.mrf.mxu0 }
 0xe9c   :  { %2124 = vrot.lane.b32.xlu1 %v2122_v51, %s3579_s24  ;;  %v2847_v34 = vmul.f32 -1.442695, %v2102_v33 }
 0xe9e   :  { %3426 = vpow2.f32 %v2847_v34  ;;  %v2331_v34 = vld [vmem:[#allocation6 + $0x20] sm:$0xff] }
 0xeab   :  { %v3427_v35 = vpop.eup %3426 }
 0xeac   :  { %v2106_v36 = vadd.f32 1.0, %v3427_v35 }
 0xeae   :  { %3428 = vrcp.f32 %v2106_v36 }
 0xebb   :  { %v3429_v42 = vpop.eup %3428 }
 0xf0c   :  { %v2112_v37 = vpop.permute.xlu0 %2111 }
 0xf0d   :  { %v2114_v38 = vadd.f32 %v2112_v37, %v2109_v53 }
 0xf0e   :  { %v2125_v41 = vpop.permute.xlu1 %2124 }
 0xf0f   :  { %v2848_v39 = vmul.f32 -1.442695, %v2114_v38  ;;  %v2127_v48 = vmul.f32 %v3429_v42, %v2125_v41 }
 0xf11   :  { %3430 = vpow2.f32 %v2848_v39  ;;  %v2128_v54 = vadd.f32 %v2127_v48, %v2121_v52 }
 0xf13   :  { %3432 = vtanh.f32 %v2128_v54  ;;  %v2416_v54 = vld [vmem:[#allocation4 + $0x28] sm:$0xff] }
 0xf1e   :  { %v3431_v56 = vpop.eup %3430 }
 0xf1f   :  { %v2118_v58 = vadd.f32 1.0, %v3431_v56 }
 0xf20   :  { %v3433_v59 = vpop.eup %3432 }
 0xf21   :  { %3434 = vrcp.f32 %v2118_v58  ;;  %v2130_v60 = vsub.f32 %v2027_v29, %v3433_v59 }
 0xf2e   :  { %v3435_v61 = vpop.eup %3434 }
 0xf2f   :  { %v2131_v62 = vmul.f32 %v3435_v61, %v2130_v60 }
 0xf31   :  { %v2132_v63 = vadd.f32 %v3433_v59, %v2131_v62 }
 0xf33   :  { %3255 = vmatmul.mubr.msk.f32.vlgmr.msra.gmra.mxu1 %vm97_vm0, %v2132_v63 }
 0xf34   :  { %3269 = vmatpush3.msra.mxu1 %v3982_v49  ;;  %3276 = vmatprep.mubr.msk.f32.mxu1 %vm3580_vm2, %v3578_v0 }
 0xf35   :  { %3270 = vmatprep.subr.mxu1 %v3578_v0 }
 0xf36   :  { %3271 = vmatpush3.msra.mxu1 %v3984_v50 }
 0xf37   :  { %3272 = vmatprep.subr.mxu1 %v3578_v0 }
 0xf38   :  { %3273 = vmatpush3.msra.mxu1 %v3988_v55 }
 0xf39   :  { %3274 = vmatprep.subr.mxu1 %v3578_v0 }
 0xf3a   :  { %3275 = vmatpush3.msra.mxu1 %v3994_v57 }
 0xf3b   :  { %3290 = vmatprep.subr.mxu1 %v3578_v0 }
 0xff3   :  { %v2202_v1 = vpop.f32.mrf.mxu1 }
 0xff4   :  { %v2227_v2 = vadd.f32 %v2202_v1, %v4051_v46  ;;  %2216 = vrot.lane.b32.xlu0 %v2202_v1, %s3581_s12  ;;  %v2207_v5 = vadd.f32 %v2206_v4, %v2202_v1 }
 0xff5   :  { %v3256_v3 = vpop.f32.mrf.mxu1 }
 0xff6   :  { %2229 = vrot.lane.b32.xlu1 %v2227_v2, %s3579_s24  ;;  %v2850_v6 = vmul.f32 -1.442695, %v2207_v5  ;;  %v2436_v2 = vld [vmem:[#allocation6 + $0x28] sm:$0xff] }
 0xff8   :  { %3436 = vpow2.f32 %v2850_v6 }
0x1005   :  { %v3437_v7 = vpop.eup %3436 }
0x1006   :  { %v2211_v8 = vadd.f32 1.0, %v3437_v7 }
0x1008   :  { %3438 = vrcp.f32 %v2211_v8 }
0x1015   :  { %v3439_v18 = vpop.eup %3438 }
0x1066   :  { %v2217_v12 = vpop.permute.xlu0 %2216 }
0x1067   :  { %v2219_v13 = vadd.f32 %v2217_v12, %v2214_v10 }
0x1068   :  { %v2230_v17 = vpop.permute.xlu1 %2229 }
0x1069   :  { %v2851_v14 = vmul.f32 -1.442695, %v2219_v13  ;;  %v2232_v19 = vmul.f32 %v3439_v18, %v2230_v17  ;;  %v2521_v18 = vld [vmem:[#allocation4 + $0x30] sm:$0xff] }
0x106b   :  { %3440 = vpow2.f32 %v2851_v14  ;;  %v2233_v21 = vadd.f32 %v2232_v19, %v2226_v9 }
0x106d   :  { %3442 = vtanh.f32 %v2233_v21 }
0x1078   :  { %v3441_v22 = vpop.eup %3440 }
0x1079   :  { %v2223_v11 = vadd.f32 1.0, %v3441_v22 }
0x107a   :  { %v3443_v40 = vpop.eup %3442 }
0x107b   :  { %3444 = vrcp.f32 %v2223_v11  ;;  %v2235_v43 = vsub.f32 %v2132_v63, %v3443_v40  ;;  %v2529_v11 = vld [vmem:[#allocation5 + $0x30] sm:$0xff] }
0x1088   :  { %v3445_v44 = vpop.eup %3444 }
0x1089   :  { %v2236_v45 = vmul.f32 %v3445_v44, %v2235_v43 }
0x108b   :  { %v2237_v47 = vadd.f32 %v3443_v40, %v2236_v45 }
0x108d   :  { %3266 = vmatmul.mubr.msk.f32.vlgmr.msra.gmra.mxu0 %vm97_vm0, %v2237_v47 }
0x108e   :  { %3280 = vmatpush3.msra.mxu0 %v3982_v49  ;;  %3287 = vmatprep.mubr.msk.f32.mxu0 %vm3580_vm2, %v3578_v0 }
0x108f   :  { %3281 = vmatprep.subr.mxu0 %v3578_v0 }
0x1090   :  { %3282 = vmatpush3.msra.mxu0 %v3984_v50 }
0x1091   :  { %3283 = vmatprep.subr.mxu0 %v3578_v0 }
0x1092   :  { %3284 = vmatpush3.msra.mxu0 %v3988_v55 }
0x1093   :  { %3285 = vmatprep.subr.mxu0 %v3578_v0 }
0x1094   :  { %3286 = vmatpush3.msra.mxu0 %v3994_v57 }
0x1095   :  { %3301 = vmatprep.subr.mxu0 %v3578_v0 }
0x114d   :  { %v2307_v23 = vpop.f32.mrf.mxu0 }
0x114e   :  { %v2332_v24 = vadd.f32 %v2307_v23, %v4051_v46  ;;  %2321 = vrot.lane.b32.xlu0 %v2307_v23, %s3581_s12  ;;  %v2312_v26 = vadd.f32 %v2311_v25, %v2307_v23 }
0x114f   :  { %v3267_v15 = vpop.f32.mrf.mxu0 }
0x1150   :  { %2334 = vrot.lane.b32.xlu1 %v2332_v24, %s3579_s24  ;;  %v2853_v16 = vmul.f32 -1.442695, %v2312_v26  ;;  %v2541_v24 = vld [vmem:[#allocation6 + $0x30] sm:$0xff] }
0x1152   :  { %3446 = vpow2.f32 %v2853_v16 }
0x115f   :  { %v3447_v20 = vpop.eup %3446 }
0x1160   :  { %v2316_v27 = vadd.f32 1.0, %v3447_v20 }
0x1162   :  { %3448 = vrcp.f32 %v2316_v27 }
0x116f   :  { %v3449_v32 = vpop.eup %3448 }
0x11c0   :  { %v2322_v29 = vpop.permute.xlu0 %2321 }
0x11c1   :  { %v2324_v30 = vadd.f32 %v2322_v29, %v2319_v28 }
0x11c2   :  { %v2335_v31 = vpop.permute.xlu1 %2334 }
0x11c3   :  { %v2854_v51 = vmul.f32 -1.442695, %v2324_v30  ;;  %v2337_v33 = vmul.f32 %v3449_v32, %v2335_v31  ;;  %v2666_v32 = vld [vmem:[%s4185_s9 + $0x18] sm:$0xff] }
0x11c5   :  { %3450 = vpow2.f32 %v2854_v51  ;;  %v2338_v35 = vadd.f32 %v2337_v33, %v2331_v34  ;;  %v2665_v33 = vld [vmem:[%s4185_s9 + $0x10] sm:$0xff]  ;;  %v2663_v34 = vld [vmem:[%s4185_s9] sm:$0xff] }
0x11c7   :  { %3452 = vtanh.f32 %v2338_v35  ;;  %v2626_v35 = vld [vmem:[#allocation4 + $0x38] sm:$0xff] }
0x11d2   :  { %v3451_v36 = vpop.eup %3450 }
0x11d3   :  { %v2328_v53 = vadd.f32 1.0, %v3451_v36 }
0x11d4   :  { %v3453_v37 = vpop.eup %3452 }
0x11d5   :  { %3454 = vrcp.f32 %v2328_v53  ;;  %v2340_v38 = vsub.f32 %v2237_v47, %v3453_v37 }
0x11e2   :  { %v3455_v39 = vpop.eup %3454 }
0x11e3   :  { %v2341_v41 = vmul.f32 %v3455_v39, %v2340_v38  ;;  %v2634_v39 = vld [vmem:[#allocation5 + $0x38] sm:$0xff] }
0x11e5   :  { %v2342_v42 = vadd.f32 %v3453_v37, %v2341_v41 }
0x11e7   :  { %3277 = vmatmul.mubr.msk.f32.vlgmr.msra.gmra.mxu1 %vm97_vm0, %v2342_v42 }
0x11e8   :  { %3291 = vmatpush3.msra.mxu1 %v3982_v49  ;;  %3298 = vmatprep.mubr.msk.f32.mxu1 %vm3580_vm2, %v3578_v0 }
0x11e9   :  { %3292 = vmatprep.subr.mxu1 %v3578_v0 }
0x11ea   :  { %3293 = vmatpush3.msra.mxu1 %v3984_v50 }
0x11eb   :  { %3294 = vmatprep.subr.mxu1 %v3578_v0 }
0x11ec   :  { %3295 = vmatpush3.msra.mxu1 %v3988_v55  ;;  %v2424_v55 = vld [vmem:[#allocation5 + $0x28] sm:$0xff] }
0x11ed   :  { %3296 = vmatprep.subr.mxu1 %v3578_v0 }
0x11ee   :  { %3297 = vmatpush3.msra.mxu1 %v3994_v57 }
0x12a7   :  { %v2412_v48 = vpop.f32.mrf.mxu1 }
0x12a8   :  { %v2437_v52 = vadd.f32 %v2412_v48, %v4051_v46  ;;  %2426 = vrot.lane.b32.xlu0 %v2412_v48, %s3581_s12  ;;  %v2417_v56 = vadd.f32 %v2416_v54, %v2412_v48 }
0x12a9   :  { %v3278_v49 = vpop.f32.mrf.mxu1 }
0x12aa   :  { %2439 = vrot.lane.b32.xlu1 %v2437_v52, %s3579_s24  ;;  %v2856_v58 = vmul.f32 -1.442695, %v2417_v56  ;;  %v2646_v56 = vld [vmem:[#allocation6 + $0x38] sm:$0xff] }
0x12ac   :  { %3456 = vpow2.f32 %v2856_v58 }
0x12b9   :  { %v3457_v50 = vpop.eup %3456 }
0x12ba   :  { %v2421_v59 = vadd.f32 1.0, %v3457_v50 }
0x12bc   :  { %3458 = vrcp.f32 %v2421_v59 }
0x12c9   :  { %v3459_v63 = vpop.eup %3458 }
0x131a   :  { %v2427_v60 = vpop.permute.xlu0 %2426 }
0x131b   :  { %v2429_v61 = vadd.f32 %v2427_v60, %v2424_v55 }
0x131c   :  { %v2440_v57 = vpop.permute.xlu1 %2439 }
0x131d   :  { %v2857_v62 = vmul.f32 -1.442695, %v2429_v61  ;;  %v2442_v1 = vmul.f32 %v3459_v63, %v2440_v57  ;;  %v2864_v63 = vld [vmem:[%s4186_s10] ss:$0 sm:$0xff] }
0x131f   :  { %3460 = vpow2.f32 %v2857_v62  ;;  %v2443_v3 = vadd.f32 %v2442_v1, %v2436_v2 }
0x1321   :  { %3462 = vtanh.f32 %v2443_v3 }
0x132c   :  { %v3461_v4 = vpop.eup %3460 }
0x132d   :  { %v2433_v5 = vadd.f32 1.0, %v3461_v4 }
0x132e   :  { %v3463_v6 = vpop.eup %3462 }
0x132f   :  { %3464 = vrcp.f32 %v2433_v5  ;;  %v2445_v7 = vsub.f32 %v2342_v42, %v3463_v6 }
0x133c   :  { %v3465_v8 = vpop.eup %3464 }
0x133d   :  { %v2446_v10 = vmul.f32 %v3465_v8, %v2445_v7 }
0x133f   :  { %v2447_v12 = vadd.f32 %v3463_v6, %v2446_v10 }
0x1341   :  { %3288 = vmatmul.mubr.msk.f32.vlgmr.msra.gmra.mxu0 %vm97_vm0, %v2447_v12 }
0x1342   :  { %3309 = vmatprep.mubr.msk.f32.mxu0 %vm3580_vm2, %v3578_v0  ;;  %3302 = vmatpush3.msra.mxu0 %v2666_v32 }
0x1343   :  { %3303 = vmatprep.subr.mxu0 %v3578_v0 }
0x1344   :  { %3304 = vmatpush3.msra.mxu0 %v2665_v33 }
0x1345   :  { %3305 = vmatprep.subr.mxu0 %v3578_v0 }
0x1401   :  { %v2517_v13 = vpop.f32.mrf.mxu0 }
0x1402   :  { %v2542_v14 = vadd.f32 %v2517_v13, %v4051_v46  ;;  %2531 = vrot.lane.b32.xlu0 %v2517_v13, %s3581_s12  ;;  %v2522_v19 = vadd.f32 %v2521_v18, %v2517_v13 }
0x1403   :  { %v3289_v17 = vpop.f32.mrf.mxu0 }
0x1404   :  { %2544 = vrot.lane.b32.xlu1 %v2542_v14, %s3579_s24  ;;  %v2859_v9 = vmul.f32 -1.442695, %v2522_v19 }
0x1406   :  { %3466 = vpow2.f32 %v2859_v9 }
0x1413   :  { %v3467_v21 = vpop.eup %3466 }
0x1414   :  { %v2526_v22 = vadd.f32 1.0, %v3467_v21 }
0x1416   :  { %3468 = vrcp.f32 %v2526_v22 }
0x1423   :  { %v3469_v47 = vpop.eup %3468 }
0x1474   :  { %v2532_v40 = vpop.permute.xlu0 %2531 }
0x1475   :  { %v2534_v43 = vadd.f32 %v2532_v40, %v2529_v11 }
0x1476   :  { %v2545_v45 = vpop.permute.xlu1 %2544 }
0x1477   :  { %v2860_v44 = vmul.f32 -1.442695, %v2534_v43  ;;  %v2547_v23 = vmul.f32 %v3469_v47, %v2545_v45 }
0x1479   :  { %3470 = vpow2.f32 %v2860_v44  ;;  %v2548_v15 = vadd.f32 %v2547_v23, %v2541_v24 }
0x147b   :  { %3472 = vtanh.f32 %v2548_v15 }
0x1486   :  { %v3471_v25 = vpop.eup %3470 }
0x1487   :  { %v2538_v26 = vadd.f32 1.0, %v3471_v25 }
0x1488   :  { %v3473_v16 = vpop.eup %3472 }
0x1489   :  { %3474 = vrcp.f32 %v2538_v26  ;;  %v2550_v20 = vsub.f32 %v2447_v12, %v3473_v16 }
0x1496   :  { %v3475_v27 = vpop.eup %3474 }
0x1497   :  { %v2551_v28 = vmul.f32 %v3475_v27, %v2550_v20 }
0x1499   :  { %v2552_v29 = vadd.f32 %v3473_v16, %v2551_v28 }
0x149b   :  { %3299 = vmatmul.mubr.msk.f32.vlgmr.msra.gmra.mxu1 %vm97_vm0, %v2552_v29 }
0x155b   :  { %v2622_v30 = vpop.f32.mrf.mxu1 }
0x155c   :  { %v2647_v51 = vadd.f32 %v2622_v30, %v4051_v46  ;;  %2636 = vrot.lane.b32.xlu0 %v2622_v30, %s3581_s12  ;;  %v2664_v46 = vld [vmem:[%s4185_s9 + $0x8] sm:$0xff]  ;;  %v2627_v36 = vadd.f32 %v2626_v35, %v2622_v30 }
0x155d   :  { %v3300_v31 = vpop.f32.mrf.mxu1  ;;  %3306 = vmatpush3.msra.mxu0 %v2664_v46 }
0x155e   :  { %2649 = vrot.lane.b32.xlu1 %v2647_v51, %s3579_s24  ;;  %3307 = vmatprep.subr.mxu0 %v3578_v0  ;;  %v2862_v53 = vmul.f32 -1.442695, %v2627_v36 }
0x155f   :  { %3308 = vmatpush3.msra.mxu0 %v2663_v34 }
0x1560   :  { %3476 = vpow2.f32 %v2862_v53 }
0x156d   :  { %v3477_v37 = vpop.eup %3476 }
0x156e   :  { %v2631_v38 = vadd.f32 1.0, %v3477_v37 }
0x1570   :  { %3478 = vrcp.f32 %v2631_v38 }
0x157d   :  { %v3479_v49 = vpop.eup %3478 }
0x15ce   :  { %v2637_v41 = vpop.permute.xlu0 %2636 }
0x15cf   :  { %v2639_v42 = vadd.f32 %v2637_v41, %v2634_v39 }
0x15d0   :  { %v2650_v52 = vpop.permute.xlu1 %2649 }
0x15d1   :  { %v2863_v48 = vmul.f32 -1.442695, %v2639_v42  ;;  %v2652_v54 = vmul.f32 %v3479_v49, %v2650_v52 }
0x15d3   :  { %3480 = vpow2.f32 %v2863_v48  ;;  %v2653_v58 = vadd.f32 %v2652_v54, %v2646_v56 }
0x15d5   :  { %3482 = vtanh.f32 %v2653_v58 }
0x15e0   :  { %v3481_v0 = vpop.eup %3480 }
0x15e1   :  { %v2643_v50 = vadd.f32 1.0, %v3481_v0 }
0x15e2   :  { %v3483_v59 = vpop.eup %3482 }
0x15e3   :  { %3484 = vrcp.f32 %v2643_v50  ;;  %v2655_v55 = vsub.f32 %v2552_v29, %v3483_v59 }
0x15f0   :  { %v3485_v60 = vpop.eup %3484 }
0x15f1   :  { %v2656_v61 = vmul.f32 %v3485_v60, %v2655_v55 }
0x15f3   :  { %v2657_v62 = vadd.f32 %v3483_v59, %v2656_v61 }
0x15f5   :  { %2658 = vst.msk [vmem:[#allocation2 + $0x8] sm:$0xff] %vm97_vm0, %v2657_v62 }
0x15fc   :  { %v2662_v57 = vld [vmem:[#allocation2 + $0x8] sm:$0xff] }
0x15fd   :  { %3310 = vmatmul.mubr.msk.f32.vlgmr.msra.gmra.mxu0 %vm97_vm0, %v2662_v57 }
0x16bd   :  { %v2743_v1 = vpop.f32.mrf.mxu0 }
0x16be   :  { %v2744_v2 = vadd.f32 %v2864_v63, %v2743_v1 }
0x16bf   :  { %v3311_v3 = vpop.f32.mrf.mxu0 }
0x16c0   :  { %2748 = vst.msk [vmem:[%s4187_s11] sm:$0xff] %vm2747_vm3, %v2744_v2 }
0x16c1   :  { %2753 = vsyncpa [#allocation8], 1 }
0x16c2   :  { %2754 = vsyncpa [#allocation10], 1 }
0x16c3   :  { %2755 = vsyncpa [#allocation13], 1 }

</bundles_post_ra>
